<compile_context>
chip_gen: v5e
topology: v5e:2x2
jax: 0.10.0
libtpu: 0.0.40
codegen_flags: <defaults>
</compile_context>

<pallas_src>
import numpy as np
import jax
import jax.numpy as jnp
from jax import lax
from jax.experimental import pallas as pl
from jax.experimental.pallas import tpu as pltpu

F1, D_MULT, KT = 8, 2, 64     # time_kernel = (8, (1, 64), (1, 1))
F2, KS = 16, 16               # separa_kernel = (16, (1, 16), (1, 1))
POOL1, POOL2 = 4, 8


# ---------------------------------------------------------------------------
# Fused Pallas kernel: step1 + step2 + step3 + FC for B batch items per grid step
# ---------------------------------------------------------------------------
def eegnet_fused_kernel(x_ref, w12_ref, b12_ref, p1_ref, w3_ref, b3_ref,
                        wp_ref, bfc_ref, out_ref,
                        xp_ref, col1_ref, h2p_ref, col3_ref):
    B, Cp, T = x_ref.shape
    Tp = T + KT - 1
    T4 = T // POOL1
    padl = (KT - 1) // 2

    def elu(h):
        return jnp.where(h > 0, h, jnp.exp(jnp.minimum(h, 0.0)) - 1.0)

    # ---- step1 "same" padding folded in-kernel (no wrapper jnp.pad HBM round trip) ----
    xp_ref[:, :, :padl] = jnp.zeros((B, Cp, padl), jnp.bfloat16)
    xp_ref[:, :, padl + T:] = jnp.zeros((B, Cp, Tp - padl - T), jnp.bfloat16)
    xp_ref[:, :, padl:padl + T] = x_ref[...].astype(jnp.bfloat16)

    # ---- im2col for the fused step1+step2 matmul: one whole-batch slab copy per tap ----
    # col1[b, k*Cp + c, t] = xpad[b, c, t + k]
    for k in range(KT):
        col1_ref[:, k * Cp:(k + 1) * Cp, :] = xp_ref[:, :, k:k + T]

    w12 = w12_ref[...]                    # (F2, KT*Cp) bf16 (BN1/BN2 scales folded in)
    b12 = b12_ref[...]                    # (F2, 1) f32
    p1 = p1_ref[...]                      # (T, T4+KS-1) bf16: pool-by-4 + step3 same-pad
    for b in range(B):
        # temporal conv + BN1 + depthwise conv + BN2 as one matmul
        h2 = jnp.dot(w12, col1_ref[b], preferred_element_type=jnp.float32) + b12
        h2 = elu(h2)                                                       # (F2, T)
        # AvgPool(1,4) with step3 "same" padding folded in (zero edge columns)
        h2p_ref[b] = jnp.dot(h2.astype(jnp.bfloat16), p1,
                             preferred_element_type=jnp.float32).astype(jnp.bfloat16)

    # ---- im2col for the step3 separable conv: one whole-batch slab copy per tap ----
    # col3[b, k*F2 + j, t] = h2p[b, j, t + k]
    for k in range(KS):
        col3_ref[:, k * F2:(k + 1) * F2, :] = h2p_ref[:, :, k:k + T4]

    w3 = w3_ref[...]                      # (F2, KS*F2) bf16 (BN3 scale folded in)
    b3 = b3_ref[...]                      # (F2, 1) f32
    wp = wp_ref[...]                      # (ncls, F2, T4) f32: AvgPool(1,8) folded into FC
    bfc = bfc_ref[...]                    # (ncls, 1) f32
    for b in range(B):
        # depthwise + pointwise + BN3 as one matmul
        h4 = jnp.dot(w3, col3_ref[b], preferred_element_type=jnp.float32) + b3
        h4 = elu(h4)                                                       # (F2, T4)
        # AvgPool(1,8) + Flatten + Linear (pool folded into wp)
        prod = wp * h4[None, :, :]                                         # (ncls, F2, T4)
        red = jnp.sum(jnp.sum(prod, axis=2), axis=1, keepdims=True)        # (ncls, 1)
        out_ref[0, :, b:b + 1] = red + bfc


# ---------------------------------------------------------------------------
# Parameter setup (glue)
# ---------------------------------------------------------------------------
def _max_norm(w, max_val, eps=1e-8):
    # per-output-unit L2 norm clip (MaxNormConstraint*, applied once at setup time)
    axes = tuple(range(1, w.ndim))
    norms = jnp.sqrt(jnp.sum(w * w, axis=axes, keepdims=True))
    desired = jnp.clip(norms, 0.0, max_val)
    return w * (desired / (eps + norms))


def init_params(key, n_channels, n_samples, n_classes):
    assert n_samples % (POOL1 * POOL2) == 0
    feat_dim = F2 * (n_samples // (POOL1 * POOL2))
    ks = jax.random.split(key, 5)

    def glorot(k, shape, fan_in, fan_out):
        lim = float(np.sqrt(6.0 / (fan_in + fan_out)))
        return jax.random.uniform(k, shape, jnp.float32, -lim, lim)

    w_time = glorot(ks[0], (F1, 1, 1, KT), KT, F1 * KT)                 # Conv2d(1,8,(1,64))
    w_dw = glorot(ks[1], (F1 * D_MULT, 1, n_channels, 1),
                  n_channels, D_MULT * n_channels)                      # groups=8
    w_sep_dw = glorot(ks[2], (F1 * D_MULT, 1, 1, KS), KS, KS)           # groups=16
    w_sep_pw = glorot(ks[3], (F2, F1 * D_MULT, 1, 1), F1 * D_MULT, F2)  # 1x1 conv
    w_fc = glorot(ks[4], (n_classes, feat_dim), feat_dim, n_classes)
    b_fc = jnp.zeros((n_classes,), jnp.float32)

    w_dw = _max_norm(w_dw, 1.0)      # depthwise_norm_rate = 1
    w_fc = _max_norm(w_fc, 0.25)     # fc_norm_rate = 0.25

    def bn(c):   # fresh BatchNorm2d: gamma=1, beta=0, running mean=0, var=1
        return dict(gamma=jnp.ones((c,), jnp.float32), beta=jnp.zeros((c,), jnp.float32),
                    mean=jnp.zeros((c,), jnp.float32), var=jnp.ones((c,), jnp.float32),
                    eps=1e-5)

    return dict(w_time=w_time, w_dw=w_dw, w_sep_dw=w_sep_dw, w_sep_pw=w_sep_pw,
                w_fc=w_fc, b_fc=b_fc, bn1=bn(F1), bn2=bn(F1 * D_MULT), bn3=bn(F2))


def _scratch_bytes(B, Cp, T):
    """bf16 scratch bytes (lane-padded) for one grid step with B items."""
    Tp = T + KT - 1
    T4 = T // POOL1
    T4p = T4 + KS - 1
    pad128 = lambda n: ((n + 127) // 128) * 128
    elems = (B * Cp * pad128(Tp) + B * KT * Cp * pad128(T)
             + B * F2 * pad128(T4p) + B * KS * F2 * pad128(T4))
    return 2 * elems


def _pick_batch_block(n, Cp, T, max_b=8, budget=24 << 20):
    """Largest divisor B of n with scratch under budget; prefer an even grid length
    (v7x dual TensorCore balance), then >=2 grid blocks, then the largest B."""
    divs = [d for d in range(1, min(n, max_b) + 1)
            if n % d == 0 and _scratch_bytes(d, Cp, T) <= budget]
    if not divs:
        divs = [1]
    even_g = [d for d in divs if (n // d) >= 2 and (n // d) % 2 == 0]
    ge2 = [d for d in divs if (n // d) >= 2]
    if even_g:
        return max(even_g)
    if ge2:
        return max(ge2)
    return max(divs)


def _prep_fused_args(params, C, Cp, T):
    wt = params['w_time'][:, 0, 0, :]        # (F1, KT)
    wdw = params['w_dw'][:, 0, :, 0]         # (F2, C)   out j uses input group j // D
    wsd = params['w_sep_dw'][:, 0, 0, :]     # (F2, KS)
    wsp = params['w_sep_pw'][:, :, 0, 0]     # (F2, F2)

    def bn_fold(p):
        scale = p['gamma'] / jnp.sqrt(p['var'] + p['eps'])
        shift = p['beta'] - p['mean'] * scale
        return scale.astype(jnp.float32), shift.astype(jnp.float32)

    s1, b1 = bn_fold(params['bn1'])
    s2, b2 = bn_fold(params['bn2'])
    s3, b3 = bn_fold(params['bn3'])

    g = jnp.arange(F2) // D_MULT             # depthwise group of output channel j
    wdw_p = jnp.pad(wdw, ((0, 0), (0, Cp - C)))   # zero columns for padded channels
    # W12[j, k*Cp + c] = s2[j] * s1[g] * wt[g, k] * wdw[j, c]
    w12 = (s2[:, None, None] * s1[g][:, None, None] *
           wt[g][:, :, None] * wdw_p[:, None, :]).reshape(F2, KT * Cp)
    b12 = (s2 * b1[g] * jnp.sum(wdw, axis=1) + b2).reshape(F2, 1)

    # W3[o, k*F2 + j] = s3[o] * wsp[o, j] * wsd[j, k]
    w3 = (s3[:, None, None] * wsp[:, None, :] * wsd.T[None, :, :]).reshape(F2, KS * F2)
    b3m = b3.reshape(F2, 1)

    T4 = T // POOL1
    T8 = T4 // POOL2
    padl3 = (KS - 1) // 2
    padr3 = KS - 1 - padl3
    # Per-item AvgPool(1,4) matrix with the step3 "same" padding folded in (zero edges).
    pool1 = jnp.kron(jnp.eye(T4, dtype=jnp.float32),
                     jnp.ones((POOL1, 1), jnp.float32)) / POOL1               # (T, T4)
    p1 = jnp.concatenate([jnp.zeros((T, padl3), jnp.float32), pool1,
                          jnp.zeros((T, padr3), jnp.float32)], axis=1)        # (T, T4+15)

    ncls = params['w_fc'].shape[0]
    # FC weights with AvgPool(1,8) folded in; shared per item (not tiled by batch).
    wfc3 = params['w_fc'].reshape(ncls, F2, T8)
    wp = jnp.repeat(wfc3, POOL2, axis=2) / POOL2                              # (ncls, F2, T4)
    bfc = params['b_fc'].reshape(ncls, 1)

    return (w12.astype(jnp.bfloat16), b12.astype(jnp.float32),
            p1.astype(jnp.bfloat16), w3.astype(jnp.bfloat16),
            b3m.astype(jnp.float32), wp.astype(jnp.float32),
            bfc.astype(jnp.float32), ncls)


def _full_spec(a):
    nd = a.ndim
    return pl.BlockSpec(a.shape, lambda n, _nd=nd: (0,) * _nd)


# ---------------------------------------------------------------------------
# Forward wrapper
# ---------------------------------------------------------------------------
@jax.jit
def eegnet_forward(x, params):
    N, C, T = x.shape
    assert T % (POOL1 * POOL2) == 0
    Cp = ((C + 7) // 8) * 8
    x = x.astype(jnp.float32)
    if Cp != C:
        x = jnp.pad(x, ((0, 0), (0, Cp - C), (0, 0)))

    B = _pick_batch_block(N, Cp, T)
    G = N // B
    Tp = T + KT - 1
    T4 = T // POOL1
    T4p = T4 + KS - 1

    w12, b12, p1, w3, b3m, wp, bfc, ncls = _prep_fused_args(params, C, Cp, T)
    weights = (w12, b12, p1, w3, b3m, wp, bfc)

    # VMEM budget derived from actual buffer sizes (scratch + double-buffered blocks).
    need = (_scratch_bytes(B, Cp, T)
            + 2 * B * Cp * T * 4
            + 2 * sum(int(np.prod(w.shape)) * w.dtype.itemsize for w in weights)
            + 2 * ncls * B * 4)
    vmem_limit = int(min(max(2 * need, 32 << 20), 96 << 20))

    out = pl.pallas_call(
        eegnet_fused_kernel,
        out_shape=jax.ShapeDtypeStruct((G, ncls, B), jnp.float32),
        grid_spec=pltpu.PrefetchScalarGridSpec(
            num_scalar_prefetch=0,
            grid=(G,),
            in_specs=[pl.BlockSpec((B, Cp, T), lambda n: (n, 0, 0))]
                     + [_full_spec(a) for a in weights],
            out_specs=pl.BlockSpec((1, ncls, B), lambda n: (n, 0, 0)),
            scratch_shapes=[
                pltpu.VMEM((B, Cp, Tp), jnp.bfloat16),        # zero-padded input
                pltpu.VMEM((B, KT * Cp, T), jnp.bfloat16),    # step1/2 im2col
                pltpu.VMEM((B, F2, T4p), jnp.bfloat16),       # pooled + padded step2 output
                pltpu.VMEM((B, KS * F2, T4), jnp.bfloat16),   # step3 im2col
            ],
        ),
        compiler_params=pltpu.CompilerParams(
            dimension_semantics=("parallel",),
            vmem_limit_bytes=vmem_limit,
        ),
    )(x, *weights)

    # (G, ncls, B) -> (N, ncls); items within a block are consecutive batch rows.
    return jnp.transpose(out, (0, 2, 1)).reshape(N, ncls)


# ---------------------------------------------------------------------------
# Pure-JAX reference (for verification only)
# ---------------------------------------------------------------------------
def eegnet_reference(x, params):
    def bn(h, p):
        scale = p['gamma'] / jnp.sqrt(p['var'] + p['eps'])
        shift = p['beta'] - p['mean'] * scale
        return h * scale[None, :, None, None] + shift[None, :, None, None]

    def elu(h):
        return jnp.where(h > 0, h, jnp.exp(jnp.minimum(h, 0.0)) - 1.0)

    dn = ('NCHW', 'OIHW', 'NCHW')
    h = x[:, None, :, :].astype(jnp.float32)
    h = jnp.pad(h, ((0, 0), (0, 0), (0, 0), ((KT - 1) // 2, KT - 1 - (KT - 1) // 2)))
    h = lax.conv_general_dilated(h, params['w_time'], (1, 1), 'VALID', dimension_numbers=dn)
    h = bn(h, params['bn1'])
    h = lax.conv_general_dilated(h, params['w_dw'], (1, 1), 'VALID',
                                 dimension_numbers=dn, feature_group_count=F1)
    h = elu(bn(h, params['bn2']))
    n, c, hh, w = h.shape
    h = h.reshape(n, c, hh, w // POOL1, POOL1).mean(-1)
    h = jnp.pad(h, ((0, 0), (0, 0), (0, 0), ((KS - 1) // 2, KS - 1 - (KS - 1) // 2)))
    h = lax.conv_general_dilated(h, params['w_sep_dw'], (1, 1), 'VALID',
                                 dimension_numbers=dn, feature_group_count=F2)
    h = lax.conv_general_dilated(h, params['w_sep_pw'], (1, 1), 'VALID', dimension_numbers=dn)
    h = elu(bn(h, params['bn3']))
    n, c, hh, w = h.shape
    h = h.reshape(n, c, hh, w // POOL2, POOL2).mean(-1)
    h = h.reshape(n, -1)
    return h @ params['w_fc'].T + params['b_fc'][None, :]


# ---------------------------------------------------------------------------
if __name__ == "__main__":
    # small but structurally-faithful shapes: 8 electrodes, 128 samples (1s @ 128Hz)
    N, C, T, n_classes = 4, 8, 128, 4
    key = jax.random.PRNGKey(0)
    kx, kp = jax.random.split(key)
    x = jax.random.normal(kx, (N, C, T), jnp.float32)
    params = init_params(kp, C, T, n_classes)

    out = eegnet_forward(x, params)
    out = jax.block_until_ready(out)

    ref = eegnet_reference(x, params)
    # bf16 MXU operands (f32 accumulation) -> looser tolerance than a pure-f32 kernel.
    np.testing.assert_allclose(np.asarray(out), np.asarray(ref), rtol=2e-2, atol=2e-2)

    # TODO(synk): dropout layers are identity (eval mode); stochastic training-mode
    # dropout is not implemented in the kernel.
    print("KERNEL_OK")
</pallas_src>

<mosaic_0001>
module attributes {stable_mosaic.version = 11 : i64} {
  func.func @eegnet_fused_kernel(%arg0: i32, %arg1: memref<2x8x128xf32, #tpu.memory_space<vmem>>, %arg2: memref<16x512xbf16, #tpu.memory_space<vmem>>, %arg3: memref<16x1xf32, #tpu.memory_space<vmem>>, %arg4: memref<128x47xbf16, #tpu.memory_space<vmem>>, %arg5: memref<16x256xbf16, #tpu.memory_space<vmem>>, %arg6: memref<16x1xf32, #tpu.memory_space<vmem>>, %arg7: memref<4x16x32xf32, #tpu.memory_space<vmem>>, %arg8: memref<4x1xf32, #tpu.memory_space<vmem>>, %arg9: memref<1x4x2xf32, #tpu.memory_space<vmem>>, %arg10: memref<2x8x191xbf16, #tpu.memory_space<vmem>>, %arg11: memref<2x512x128xbf16, #tpu.memory_space<vmem>>, %arg12: memref<2x16x47xbf16, #tpu.memory_space<vmem>>, %arg13: memref<2x256x32xbf16, #tpu.memory_space<vmem>>) attributes {dimension_semantics = [#tpu.dimension_semantics<parallel>], iteration_bounds = array<i64: 2>, scalar_prefetch = 0 : i64, scratch_operands = 4 : i64, tpu.core_type = #tpu.core_type<tc>, window_params = [{transform_indices = @transform_0, window_bounds = array<i64: 2, 8, 128>}, {pipeline_mode = #tpu.pipeline_mode<synchronous>, transform_indices = @transform_1, window_bounds = array<i64: 16, 512>}, {pipeline_mode = #tpu.pipeline_mode<synchronous>, transform_indices = @transform_2, window_bounds = array<i64: 16, 1>}, {pipeline_mode = #tpu.pipeline_mode<synchronous>, transform_indices = @transform_3, window_bounds = array<i64: 128, 47>}, {pipeline_mode = #tpu.pipeline_mode<synchronous>, transform_indices = @transform_4, window_bounds = array<i64: 16, 256>}, {pipeline_mode = #tpu.pipeline_mode<synchronous>, transform_indices = @transform_5, window_bounds = array<i64: 16, 1>}, {pipeline_mode = #tpu.pipeline_mode<synchronous>, transform_indices = @transform_6, window_bounds = array<i64: 4, 16, 32>}, {pipeline_mode = #tpu.pipeline_mode<synchronous>, transform_indices = @transform_7, window_bounds = array<i64: 4, 1>}, {transform_indices = @transform_8, window_bounds = array<i64: 1, 4, 2>}]} {
    %cst = arith.constant 0.000000e+00 : bf16
    %0 = vector.broadcast %cst : bf16 to vector<2x8x31xbf16>
    %c0 = arith.constant 0 : index
    %c0_0 = arith.constant 0 : index
    %c0_1 = arith.constant 0 : index
    %1 = vector.load %arg10[%c0, %c0_0, %c0_1] : memref<2x8x191xbf16, #tpu.memory_space<vmem>>, vector<2x8x31xbf16>
    tpu.vector_store %arg10[%c0, %c0_0, %c0_1], %0 {strides = array<i32>} : memref<2x8x191xbf16, #tpu.memory_space<vmem>>, vector<2x8x31xbf16>,
    %cst_2 = arith.constant 0.000000e+00 : bf16
    %2 = vector.broadcast %cst_2 : bf16 to vector<2x8x32xbf16>
    %c0_3 = arith.constant 0 : index
    %c0_4 = arith.constant 0 : index
    %c159 = arith.constant 159 : index
    %3 = vector.load %arg10[%c0_3, %c0_4, %c159] : memref<2x8x191xbf16, #tpu.memory_space<vmem>>, vector<2x8x32xbf16>
    tpu.vector_store %arg10[%c0_3, %c0_4, %c159], %2 {strides = array<i32>} : memref<2x8x191xbf16, #tpu.memory_space<vmem>>, vector<2x8x32xbf16>,
    %c0_5 = arith.constant 0 : index
    %c0_6 = arith.constant 0 : index
    %c0_7 = arith.constant 0 : index
    %4 = vector.load %arg1[%c0_5, %c0_6, %c0_7] : memref<2x8x128xf32, #tpu.memory_space<vmem>>, vector<2x8x128xf32>
    %5 = arith.truncf %4 : vector<2x8x128xf32> to vector<2x8x128xbf16>
    %c0_8 = arith.constant 0 : index
    %c0_9 = arith.constant 0 : index
    %c31 = arith.constant 31 : index
    %6 = vector.load %arg10[%c0_8, %c0_9, %c31] : memref<2x8x191xbf16, #tpu.memory_space<vmem>>, vector<2x8x128xbf16>
    tpu.vector_store %arg10[%c0_8, %c0_9, %c31], %5 {strides = array<i32>} : memref<2x8x191xbf16, #tpu.memory_space<vmem>>, vector<2x8x128xbf16>,
    %c0_10 = arith.constant 0 : index
    %c0_11 = arith.constant 0 : index
    %c0_12 = arith.constant 0 : index
    %7 = vector.load %arg10[%c0_10, %c0_11, %c0_12] : memref<2x8x191xbf16, #tpu.memory_space<vmem>>, vector<2x8x128xbf16>
    %c0_13 = arith.constant 0 : index
    %c0_14 = arith.constant 0 : index
    %c0_15 = arith.constant 0 : index
    %8 = vector.load %arg11[%c0_13, %c0_14, %c0_15] : memref<2x512x128xbf16, #tpu.memory_space<vmem>>, vector<2x8x128xbf16>
    tpu.vector_store %arg11[%c0_13, %c0_14, %c0_15], %7 {strides = array<i32>} : memref<2x512x128xbf16, #tpu.memory_space<vmem>>, vector<2x8x128xbf16>,
    %c0_16 = arith.constant 0 : index
    %c0_17 = arith.constant 0 : index
    %c1 = arith.constant 1 : index
    %9 = vector.load %arg10[%c0_16, %c0_17, %c1] : memref<2x8x191xbf16, #tpu.memory_space<vmem>>, vector<2x8x128xbf16>
    %c0_18 = arith.constant 0 : index
    %c8 = arith.constant 8 : index
    %c0_19 = arith.constant 0 : index
    %10 = vector.load %arg11[%c0_18, %c8, %c0_19] : memref<2x512x128xbf16, #tpu.memory_space<vmem>>, vector<2x8x128xbf16>
    tpu.vector_store %arg11[%c0_18, %c8, %c0_19], %9 {strides = array<i32>} : memref<2x512x128xbf16, #tpu.memory_space<vmem>>, vector<2x8x128xbf16>,
    %c0_20 = arith.constant 0 : index
    %c0_21 = arith.constant 0 : index
    %c2 = arith.constant 2 : index
    %11 = vector.load %arg10[%c0_20, %c0_21, %c2] : memref<2x8x191xbf16, #tpu.memory_space<vmem>>, vector<2x8x128xbf16>
    %c0_22 = arith.constant 0 : index
    %c16 = arith.constant 16 : index
    %c0_23 = arith.constant 0 : index
    %12 = vector.load %arg11[%c0_22, %c16, %c0_23] : memref<2x512x128xbf16, #tpu.memory_space<vmem>>, vector<2x8x128xbf16>
    tpu.vector_store %arg11[%c0_22, %c16, %c0_23], %11 {strides = array<i32>} : memref<2x512x128xbf16, #tpu.memory_space<vmem>>, vector<2x8x128xbf16>,
    %c0_24 = arith.constant 0 : index
    %c0_25 = arith.constant 0 : index
    %c3 = arith.constant 3 : index
    %13 = vector.load %arg10[%c0_24, %c0_25, %c3] : memref<2x8x191xbf16, #tpu.memory_space<vmem>>, vector<2x8x128xbf16>
    %c0_26 = arith.constant 0 : index
    %c24 = arith.constant 24 : index
    %c0_27 = arith.constant 0 : index
    %14 = vector.load %arg11[%c0_26, %c24, %c0_27] : memref<2x512x128xbf16, #tpu.memory_space<vmem>>, vector<2x8x128xbf16>
    tpu.vector_store %arg11[%c0_26, %c24, %c0_27], %13 {strides = array<i32>} : memref<2x512x128xbf16, #tpu.memory_space<vmem>>, vector<2x8x128xbf16>,
    %c0_28 = arith.constant 0 : index
    %c0_29 = arith.constant 0 : index
    %c4 = arith.constant 4 : index
    %15 = vector.load %arg10[%c0_28, %c0_29, %c4] : memref<2x8x191xbf16, #tpu.memory_space<vmem>>, vector<2x8x128xbf16>
    %c0_30 = arith.constant 0 : index
    %c32 = arith.constant 32 : index
    %c0_31 = arith.constant 0 : index
    %16 = vector.load %arg11[%c0_30, %c32, %c0_31] : memref<2x512x128xbf16, #tpu.memory_space<vmem>>, vector<2x8x128xbf16>
    tpu.vector_store %arg11[%c0_30, %c32, %c0_31], %15 {strides = array<i32>} : memref<2x512x128xbf16, #tpu.memory_space<vmem>>, vector<2x8x128xbf16>,
    %c0_32 = arith.constant 0 : index
    %c0_33 = arith.constant 0 : index
    %c5 = arith.constant 5 : index
    %17 = vector.load %arg10[%c0_32, %c0_33, %c5] : memref<2x8x191xbf16, #tpu.memory_space<vmem>>, vector<2x8x128xbf16>
    %c0_34 = arith.constant 0 : index
    %c40 = arith.constant 40 : index
    %c0_35 = arith.constant 0 : index
    %18 = vector.load %arg11[%c0_34, %c40, %c0_35] : memref<2x512x128xbf16, #tpu.memory_space<vmem>>, vector<2x8x128xbf16>
    tpu.vector_store %arg11[%c0_34, %c40, %c0_35], %17 {strides = array<i32>} : memref<2x512x128xbf16, #tpu.memory_space<vmem>>, vector<2x8x128xbf16>,
    %c0_36 = arith.constant 0 : index
    %c0_37 = arith.constant 0 : index
    %c6 = arith.constant 6 : index
    %19 = vector.load %arg10[%c0_36, %c0_37, %c6] : memref<2x8x191xbf16, #tpu.memory_space<vmem>>, vector<2x8x128xbf16>
    %c0_38 = arith.constant 0 : index
    %c48 = arith.constant 48 : index
    %c0_39 = arith.constant 0 : index
    %20 = vector.load %arg11[%c0_38, %c48, %c0_39] : memref<2x512x128xbf16, #tpu.memory_space<vmem>>, vector<2x8x128xbf16>
    tpu.vector_store %arg11[%c0_38, %c48, %c0_39], %19 {strides = array<i32>} : memref<2x512x128xbf16, #tpu.memory_space<vmem>>, vector<2x8x128xbf16>,
    %c0_40 = arith.constant 0 : index
    %c0_41 = arith.constant 0 : index
    %c7 = arith.constant 7 : index
    %21 = vector.load %arg10[%c0_40, %c0_41, %c7] : memref<2x8x191xbf16, #tpu.memory_space<vmem>>, vector<2x8x128xbf16>
    %c0_42 = arith.constant 0 : index
    %c56 = arith.constant 56 : index
    %c0_43 = arith.constant 0 : index
    %22 = vector.load %arg11[%c0_42, %c56, %c0_43] : memref<2x512x128xbf16, #tpu.memory_space<vmem>>, vector<2x8x128xbf16>
    tpu.vector_store %arg11[%c0_42, %c56, %c0_43], %21 {strides = array<i32>} : memref<2x512x128xbf16, #tpu.memory_space<vmem>>, vector<2x8x128xbf16>,
    %c0_44 = arith.constant 0 : index
    %c0_45 = arith.constant 0 : index
    %c8_46 = arith.constant 8 : index
    %23 = vector.load %arg10[%c0_44, %c0_45, %c8_46] : memref<2x8x191xbf16, #tpu.memory_space<vmem>>, vector<2x8x128xbf16>
    %c0_47 = arith.constant 0 : index
    %c64 = arith.constant 64 : index
    %c0_48 = arith.constant 0 : index
    %24 = vector.load %arg11[%c0_47, %c64, %c0_48] : memref<2x512x128xbf16, #tpu.memory_space<vmem>>, vector<2x8x128xbf16>
    tpu.vector_store %arg11[%c0_47, %c64, %c0_48], %23 {strides = array<i32>} : memref<2x512x128xbf16, #tpu.memory_space<vmem>>, vector<2x8x128xbf16>,
    %c0_49 = arith.constant 0 : index
    %c0_50 = arith.constant 0 : index
    %c9 = arith.constant 9 : index
    %25 = vector.load %arg10[%c0_49, %c0_50, %c9] : memref<2x8x191xbf16, #tpu.memory_space<vmem>>, vector<2x8x128xbf16>
    %c0_51 = arith.constant 0 : index
    %c72 = arith.constant 72 : index
    %c0_52 = arith.constant 0 : index
    %26 = vector.load %arg11[%c0_51, %c72, %c0_52] : memref<2x512x128xbf16, #tpu.memory_space<vmem>>, vector<2x8x128xbf16>
    tpu.vector_store %arg11[%c0_51, %c72, %c0_52], %25 {strides = array<i32>} : memref<2x512x128xbf16, #tpu.memory_space<vmem>>, vector<2x8x128xbf16>,
    %c0_53 = arith.constant 0 : index
    %c0_54 = arith.constant 0 : index
    %c10 = arith.constant 10 : index
    %27 = vector.load %arg10[%c0_53, %c0_54, %c10] : memref<2x8x191xbf16, #tpu.memory_space<vmem>>, vector<2x8x128xbf16>
    %c0_55 = arith.constant 0 : index
    %c80 = arith.constant 80 : index
    %c0_56 = arith.constant 0 : index
    %28 = vector.load %arg11[%c0_55, %c80, %c0_56] : memref<2x512x128xbf16, #tpu.memory_space<vmem>>, vector<2x8x128xbf16>
    tpu.vector_store %arg11[%c0_55, %c80, %c0_56], %27 {strides = array<i32>} : memref<2x512x128xbf16, #tpu.memory_space<vmem>>, vector<2x8x128xbf16>,
    %c0_57 = arith.constant 0 : index
    %c0_58 = arith.constant 0 : index
    %c11 = arith.constant 11 : index
    %29 = vector.load %arg10[%c0_57, %c0_58, %c11] : memref<2x8x191xbf16, #tpu.memory_space<vmem>>, vector<2x8x128xbf16>
    %c0_59 = arith.constant 0 : index
    %c88 = arith.constant 88 : index
    %c0_60 = arith.constant 0 : index
    %30 = vector.load %arg11[%c0_59, %c88, %c0_60] : memref<2x512x128xbf16, #tpu.memory_space<vmem>>, vector<2x8x128xbf16>
    tpu.vector_store %arg11[%c0_59, %c88, %c0_60], %29 {strides = array<i32>} : memref<2x512x128xbf16, #tpu.memory_space<vmem>>, vector<2x8x128xbf16>,
    %c0_61 = arith.constant 0 : index
    %c0_62 = arith.constant 0 : index
    %c12 = arith.constant 12 : index
    %31 = vector.load %arg10[%c0_61, %c0_62, %c12] : memref<2x8x191xbf16, #tpu.memory_space<vmem>>, vector<2x8x128xbf16>
    %c0_63 = arith.constant 0 : index
    %c96 = arith.constant 96 : index
    %c0_64 = arith.constant 0 : index
    %32 = vector.load %arg11[%c0_63, %c96, %c0_64] : memref<2x512x128xbf16, #tpu.memory_space<vmem>>, vector<2x8x128xbf16>
    tpu.vector_store %arg11[%c0_63, %c96, %c0_64], %31 {strides = array<i32>} : memref<2x512x128xbf16, #tpu.memory_space<vmem>>, vector<2x8x128xbf16>,
    %c0_65 = arith.constant 0 : index
    %c0_66 = arith.constant 0 : index
    %c13 = arith.constant 13 : index
    %33 = vector.load %arg10[%c0_65, %c0_66, %c13] : memref<2x8x191xbf16, #tpu.memory_space<vmem>>, vector<2x8x128xbf16>
    %c0_67 = arith.constant 0 : index
    %c104 = arith.constant 104 : index
    %c0_68 = arith.constant 0 : index
    %34 = vector.load %arg11[%c0_67, %c104, %c0_68] : memref<2x512x128xbf16, #tpu.memory_space<vmem>>, vector<2x8x128xbf16>
    tpu.vector_store %arg11[%c0_67, %c104, %c0_68], %33 {strides = array<i32>} : memref<2x512x128xbf16, #tpu.memory_space<vmem>>, vector<2x8x128xbf16>,
    %c0_69 = arith.constant 0 : index
    %c0_70 = arith.constant 0 : index
    %c14 = arith.constant 14 : index
    %35 = vector.load %arg10[%c0_69, %c0_70, %c14] : memref<2x8x191xbf16, #tpu.memory_space<vmem>>, vector<2x8x128xbf16>
    %c0_71 = arith.constant 0 : index
    %c112 = arith.constant 112 : index
    %c0_72 = arith.constant 0 : index
    %36 = vector.load %arg11[%c0_71, %c112, %c0_72] : memref<2x512x128xbf16, #tpu.memory_space<vmem>>, vector<2x8x128xbf16>
    tpu.vector_store %arg11[%c0_71, %c112, %c0_72], %35 {strides = array<i32>} : memref<2x512x128xbf16, #tpu.memory_space<vmem>>, vector<2x8x128xbf16>,
    %c0_73 = arith.constant 0 : index
    %c0_74 = arith.constant 0 : index
    %c15 = arith.constant 15 : index
    %37 = vector.load %arg10[%c0_73, %c0_74, %c15] : memref<2x8x191xbf16, #tpu.memory_space<vmem>>, vector<2x8x128xbf16>
    %c0_75 = arith.constant 0 : index
    %c120 = arith.constant 120 : index
    %c0_76 = arith.constant 0 : index
    %38 = vector.load %arg11[%c0_75, %c120, %c0_76] : memref<2x512x128xbf16, #tpu.memory_space<vmem>>, vector<2x8x128xbf16>
    tpu.vector_store %arg11[%c0_75, %c120, %c0_76], %37 {strides = array<i32>} : memref<2x512x128xbf16, #tpu.memory_space<vmem>>, vector<2x8x128xbf16>,
    %c0_77 = arith.constant 0 : index
    %c0_78 = arith.constant 0 : index
    %c16_79 = arith.constant 16 : index
    %39 = vector.load %arg10[%c0_77, %c0_78, %c16_79] : memref<2x8x191xbf16, #tpu.memory_space<vmem>>, vector<2x8x128xbf16>
    %c0_80 = arith.constant 0 : index
    %c128 = arith.constant 128 : index
    %c0_81 = arith.constant 0 : index
    %40 = vector.load %arg11[%c0_80, %c128, %c0_81] : memref<2x512x128xbf16, #tpu.memory_space<vmem>>, vector<2x8x128xbf16>
    tpu.vector_store %arg11[%c0_80, %c128, %c0_81], %39 {strides = array<i32>} : memref<2x512x128xbf16, #tpu.memory_space<vmem>>, vector<2x8x128xbf16>,
    %c0_82 = arith.constant 0 : index
    %c0_83 = arith.constant 0 : index
    %c17 = arith.constant 17 : index
    %41 = vector.load %arg10[%c0_82, %c0_83, %c17] : memref<2x8x191xbf16, #tpu.memory_space<vmem>>, vector<2x8x128xbf16>
    %c0_84 = arith.constant 0 : index
    %c136 = arith.constant 136 : index
    %c0_85 = arith.constant 0 : index
    %42 = vector.load %arg11[%c0_84, %c136, %c0_85] : memref<2x512x128xbf16, #tpu.memory_space<vmem>>, vector<2x8x128xbf16>
    tpu.vector_store %arg11[%c0_84, %c136, %c0_85], %41 {strides = array<i32>} : memref<2x512x128xbf16, #tpu.memory_space<vmem>>, vector<2x8x128xbf16>,
    %c0_86 = arith.constant 0 : index
    %c0_87 = arith.constant 0 : index
    %c18 = arith.constant 18 : index
    %43 = vector.load %arg10[%c0_86, %c0_87, %c18] : memref<2x8x191xbf16, #tpu.memory_space<vmem>>, vector<2x8x128xbf16>
    %c0_88 = arith.constant 0 : index
    %c144 = arith.constant 144 : index
    %c0_89 = arith.constant 0 : index
    %44 = vector.load %arg11[%c0_88, %c144, %c0_89] : memref<2x512x128xbf16, #tpu.memory_space<vmem>>, vector<2x8x128xbf16>
    tpu.vector_store %arg11[%c0_88, %c144, %c0_89], %43 {strides = array<i32>} : memref<2x512x128xbf16, #tpu.memory_space<vmem>>, vector<2x8x128xbf16>,
    %c0_90 = arith.constant 0 : index
    %c0_91 = arith.constant 0 : index
    %c19 = arith.constant 19 : index
    %45 = vector.load %arg10[%c0_90, %c0_91, %c19] : memref<2x8x191xbf16, #tpu.memory_space<vmem>>, vector<2x8x128xbf16>
    %c0_92 = arith.constant 0 : index
    %c152 = arith.constant 152 : index
    %c0_93 = arith.constant 0 : index
    %46 = vector.load %arg11[%c0_92, %c152, %c0_93] : memref<2x512x128xbf16, #tpu.memory_space<vmem>>, vector<2x8x128xbf16>
    tpu.vector_store %arg11[%c0_92, %c152, %c0_93], %45 {strides = array<i32>} : memref<2x512x128xbf16, #tpu.memory_space<vmem>>, vector<2x8x128xbf16>,
    %c0_94 = arith.constant 0 : index
    %c0_95 = arith.constant 0 : index
    %c20 = arith.constant 20 : index
    %47 = vector.load %arg10[%c0_94, %c0_95, %c20] : memref<2x8x191xbf16, #tpu.memory_space<vmem>>, vector<2x8x128xbf16>
    %c0_96 = arith.constant 0 : index
    %c160 = arith.constant 160 : index
    %c0_97 = arith.constant 0 : index
    %48 = vector.load %arg11[%c0_96, %c160, %c0_97] : memref<2x512x128xbf16, #tpu.memory_space<vmem>>, vector<2x8x128xbf16>
    tpu.vector_store %arg11[%c0_96, %c160, %c0_97], %47 {strides = array<i32>} : memref<2x512x128xbf16, #tpu.memory_space<vmem>>, vector<2x8x128xbf16>,
    %c0_98 = arith.constant 0 : index
    %c0_99 = arith.constant 0 : index
    %c21 = arith.constant 21 : index
    %49 = vector.load %arg10[%c0_98, %c0_99, %c21] : memref<2x8x191xbf16, #tpu.memory_space<vmem>>, vector<2x8x128xbf16>
    %c0_100 = arith.constant 0 : index
    %c168 = arith.constant 168 : index
    %c0_101 = arith.constant 0 : index
    %50 = vector.load %arg11[%c0_100, %c168, %c0_101] : memref<2x512x128xbf16, #tpu.memory_space<vmem>>, vector<2x8x128xbf16>
    tpu.vector_store %arg11[%c0_100, %c168, %c0_101], %49 {strides = array<i32>} : memref<2x512x128xbf16, #tpu.memory_space<vmem>>, vector<2x8x128xbf16>,
    %c0_102 = arith.constant 0 : index
    %c0_103 = arith.constant 0 : index
    %c22 = arith.constant 22 : index
    %51 = vector.load %arg10[%c0_102, %c0_103, %c22] : memref<2x8x191xbf16, #tpu.memory_space<vmem>>, vector<2x8x128xbf16>
    %c0_104 = arith.constant 0 : index
    %c176 = arith.constant 176 : index
    %c0_105 = arith.constant 0 : index
    %52 = vector.load %arg11[%c0_104, %c176, %c0_105] : memref<2x512x128xbf16, #tpu.memory_space<vmem>>, vector<2x8x128xbf16>
    tpu.vector_store %arg11[%c0_104, %c176, %c0_105], %51 {strides = array<i32>} : memref<2x512x128xbf16, #tpu.memory_space<vmem>>, vector<2x8x128xbf16>,
    %c0_106 = arith.constant 0 : index
    %c0_107 = arith.constant 0 : index
    %c23 = arith.constant 23 : index
    %53 = vector.load %arg10[%c0_106, %c0_107, %c23] : memref<2x8x191xbf16, #tpu.memory_space<vmem>>, vector<2x8x128xbf16>
    %c0_108 = arith.constant 0 : index
    %c184 = arith.constant 184 : index
    %c0_109 = arith.constant 0 : index
    %54 = vector.load %arg11[%c0_108, %c184, %c0_109] : memref<2x512x128xbf16, #tpu.memory_space<vmem>>, vector<2x8x128xbf16>
    tpu.vector_store %arg11[%c0_108, %c184, %c0_109], %53 {strides = array<i32>} : memref<2x512x128xbf16, #tpu.memory_space<vmem>>, vector<2x8x128xbf16>,
    %c0_110 = arith.constant 0 : index
    %c0_111 = arith.constant 0 : index
    %c24_112 = arith.constant 24 : index
    %55 = vector.load %arg10[%c0_110, %c0_111, %c24_112] : memref<2x8x191xbf16, #tpu.memory_space<vmem>>, vector<2x8x128xbf16>
    %c0_113 = arith.constant 0 : index
    %c192 = arith.constant 192 : index
    %c0_114 = arith.constant 0 : index
    %56 = vector.load %arg11[%c0_113, %c192, %c0_114] : memref<2x512x128xbf16, #tpu.memory_space<vmem>>, vector<2x8x128xbf16>
    tpu.vector_store %arg11[%c0_113, %c192, %c0_114], %55 {strides = array<i32>} : memref<2x512x128xbf16, #tpu.memory_space<vmem>>, vector<2x8x128xbf16>,
    %c0_115 = arith.constant 0 : index
    %c0_116 = arith.constant 0 : index
    %c25 = arith.constant 25 : index
    %57 = vector.load %arg10[%c0_115, %c0_116, %c25] : memref<2x8x191xbf16, #tpu.memory_space<vmem>>, vector<2x8x128xbf16>
    %c0_117 = arith.constant 0 : index
    %c200 = arith.constant 200 : index
    %c0_118 = arith.constant 0 : index
    %58 = vector.load %arg11[%c0_117, %c200, %c0_118] : memref<2x512x128xbf16, #tpu.memory_space<vmem>>, vector<2x8x128xbf16>
    tpu.vector_store %arg11[%c0_117, %c200, %c0_118], %57 {strides = array<i32>} : memref<2x512x128xbf16, #tpu.memory_space<vmem>>, vector<2x8x128xbf16>,
    %c0_119 = arith.constant 0 : index
    %c0_120 = arith.constant 0 : index
    %c26 = arith.constant 26 : index
    %59 = vector.load %arg10[%c0_119, %c0_120, %c26] : memref<2x8x191xbf16, #tpu.memory_space<vmem>>, vector<2x8x128xbf16>
    %c0_121 = arith.constant 0 : index
    %c208 = arith.constant 208 : index
    %c0_122 = arith.constant 0 : index
    %60 = vector.load %arg11[%c0_121, %c208, %c0_122] : memref<2x512x128xbf16, #tpu.memory_space<vmem>>, vector<2x8x128xbf16>
    tpu.vector_store %arg11[%c0_121, %c208, %c0_122], %59 {strides = array<i32>} : memref<2x512x128xbf16, #tpu.memory_space<vmem>>, vector<2x8x128xbf16>,
    %c0_123 = arith.constant 0 : index
    %c0_124 = arith.constant 0 : index
    %c27 = arith.constant 27 : index
    %61 = vector.load %arg10[%c0_123, %c0_124, %c27] : memref<2x8x191xbf16, #tpu.memory_space<vmem>>, vector<2x8x128xbf16>
    %c0_125 = arith.constant 0 : index
    %c216 = arith.constant 216 : index
    %c0_126 = arith.constant 0 : index
    %62 = vector.load %arg11[%c0_125, %c216, %c0_126] : memref<2x512x128xbf16, #tpu.memory_space<vmem>>, vector<2x8x128xbf16>
    tpu.vector_store %arg11[%c0_125, %c216, %c0_126], %61 {strides = array<i32>} : memref<2x512x128xbf16, #tpu.memory_space<vmem>>, vector<2x8x128xbf16>,
    %c0_127 = arith.constant 0 : index
    %c0_128 = arith.constant 0 : index
    %c28 = arith.constant 28 : index
    %63 = vector.load %arg10[%c0_127, %c0_128, %c28] : memref<2x8x191xbf16, #tpu.memory_space<vmem>>, vector<2x8x128xbf16>
    %c0_129 = arith.constant 0 : index
    %c224 = arith.constant 224 : index
    %c0_130 = arith.constant 0 : index
    %64 = vector.load %arg11[%c0_129, %c224, %c0_130] : memref<2x512x128xbf16, #tpu.memory_space<vmem>>, vector<2x8x128xbf16>
    tpu.vector_store %arg11[%c0_129, %c224, %c0_130], %63 {strides = array<i32>} : memref<2x512x128xbf16, #tpu.memory_space<vmem>>, vector<2x8x128xbf16>,
    %c0_131 = arith.constant 0 : index
    %c0_132 = arith.constant 0 : index
    %c29 = arith.constant 29 : index
    %65 = vector.load %arg10[%c0_131, %c0_132, %c29] : memref<2x8x191xbf16, #tpu.memory_space<vmem>>, vector<2x8x128xbf16>
    %c0_133 = arith.constant 0 : index
    %c232 = arith.constant 232 : index
    %c0_134 = arith.constant 0 : index
    %66 = vector.load %arg11[%c0_133, %c232, %c0_134] : memref<2x512x128xbf16, #tpu.memory_space<vmem>>, vector<2x8x128xbf16>
    tpu.vector_store %arg11[%c0_133, %c232, %c0_134], %65 {strides = array<i32>} : memref<2x512x128xbf16, #tpu.memory_space<vmem>>, vector<2x8x128xbf16>,
    %c0_135 = arith.constant 0 : index
    %c0_136 = arith.constant 0 : index
    %c30 = arith.constant 30 : index
    %67 = vector.load %arg10[%c0_135, %c0_136, %c30] : memref<2x8x191xbf16, #tpu.memory_space<vmem>>, vector<2x8x128xbf16>
    %c0_137 = arith.constant 0 : index
    %c240 = arith.constant 240 : index
    %c0_138 = arith.constant 0 : index
    %68 = vector.load %arg11[%c0_137, %c240, %c0_138] : memref<2x512x128xbf16, #tpu.memory_space<vmem>>, vector<2x8x128xbf16>
    tpu.vector_store %arg11[%c0_137, %c240, %c0_138], %67 {strides = array<i32>} : memref<2x512x128xbf16, #tpu.memory_space<vmem>>, vector<2x8x128xbf16>,
    %c0_139 = arith.constant 0 : index
    %c0_140 = arith.constant 0 : index
    %c31_141 = arith.constant 31 : index
    %69 = vector.load %arg10[%c0_139, %c0_140, %c31_141] : memref<2x8x191xbf16, #tpu.memory_space<vmem>>, vector<2x8x128xbf16>
    %c0_142 = arith.constant 0 : index
    %c248 = arith.constant 248 : index
    %c0_143 = arith.constant 0 : index
    %70 = vector.load %arg11[%c0_142, %c248, %c0_143] : memref<2x512x128xbf16, #tpu.memory_space<vmem>>, vector<2x8x128xbf16>
    tpu.vector_store %arg11[%c0_142, %c248, %c0_143], %69 {strides = array<i32>} : memref<2x512x128xbf16, #tpu.memory_space<vmem>>, vector<2x8x128xbf16>,
    %c0_144 = arith.constant 0 : index
    %c0_145 = arith.constant 0 : index
    %c32_146 = arith.constant 32 : index
    %71 = vector.load %arg10[%c0_144, %c0_145, %c32_146] : memref<2x8x191xbf16, #tpu.memory_space<vmem>>, vector<2x8x128xbf16>
    %c0_147 = arith.constant 0 : index
    %c256 = arith.constant 256 : index
    %c0_148 = arith.constant 0 : index
    %72 = vector.load %arg11[%c0_147, %c256, %c0_148] : memref<2x512x128xbf16, #tpu.memory_space<vmem>>, vector<2x8x128xbf16>
    tpu.vector_store %arg11[%c0_147, %c256, %c0_148], %71 {strides = array<i32>} : memref<2x512x128xbf16, #tpu.memory_space<vmem>>, vector<2x8x128xbf16>,
    %c0_149 = arith.constant 0 : index
    %c0_150 = arith.constant 0 : index
    %c33 = arith.constant 33 : index
    %73 = vector.load %arg10[%c0_149, %c0_150, %c33] : memref<2x8x191xbf16, #tpu.memory_space<vmem>>, vector<2x8x128xbf16>
    %c0_151 = arith.constant 0 : index
    %c264 = arith.constant 264 : index
    %c0_152 = arith.constant 0 : index
    %74 = vector.load %arg11[%c0_151, %c264, %c0_152] : memref<2x512x128xbf16, #tpu.memory_space<vmem>>, vector<2x8x128xbf16>
    tpu.vector_store %arg11[%c0_151, %c264, %c0_152], %73 {strides = array<i32>} : memref<2x512x128xbf16, #tpu.memory_space<vmem>>, vector<2x8x128xbf16>,
    %c0_153 = arith.constant 0 : index
    %c0_154 = arith.constant 0 : index
    %c34 = arith.constant 34 : index
    %75 = vector.load %arg10[%c0_153, %c0_154, %c34] : memref<2x8x191xbf16, #tpu.memory_space<vmem>>, vector<2x8x128xbf16>
    %c0_155 = arith.constant 0 : index
    %c272 = arith.constant 272 : index
    %c0_156 = arith.constant 0 : index
    %76 = vector.load %arg11[%c0_155, %c272, %c0_156] : memref<2x512x128xbf16, #tpu.memory_space<vmem>>, vector<2x8x128xbf16>
    tpu.vector_store %arg11[%c0_155, %c272, %c0_156], %75 {strides = array<i32>} : memref<2x512x128xbf16, #tpu.memory_space<vmem>>, vector<2x8x128xbf16>,
    %c0_157 = arith.constant 0 : index
    %c0_158 = arith.constant 0 : index
    %c35 = arith.constant 35 : index
    %77 = vector.load %arg10[%c0_157, %c0_158, %c35] : memref<2x8x191xbf16, #tpu.memory_space<vmem>>, vector<2x8x128xbf16>
    %c0_159 = arith.constant 0 : index
    %c280 = arith.constant 280 : index
    %c0_160 = arith.constant 0 : index
    %78 = vector.load %arg11[%c0_159, %c280, %c0_160] : memref<2x512x128xbf16, #tpu.memory_space<vmem>>, vector<2x8x128xbf16>
    tpu.vector_store %arg11[%c0_159, %c280, %c0_160], %77 {strides = array<i32>} : memref<2x512x128xbf16, #tpu.memory_space<vmem>>, vector<2x8x128xbf16>,
    %c0_161 = arith.constant 0 : index
    %c0_162 = arith.constant 0 : index
    %c36 = arith.constant 36 : index
    %79 = vector.load %arg10[%c0_161, %c0_162, %c36] : memref<2x8x191xbf16, #tpu.memory_space<vmem>>, vector<2x8x128xbf16>
    %c0_163 = arith.constant 0 : index
    %c288 = arith.constant 288 : index
    %c0_164 = arith.constant 0 : index
    %80 = vector.load %arg11[%c0_163, %c288, %c0_164] : memref<2x512x128xbf16, #tpu.memory_space<vmem>>, vector<2x8x128xbf16>
    tpu.vector_store %arg11[%c0_163, %c288, %c0_164], %79 {strides = array<i32>} : memref<2x512x128xbf16, #tpu.memory_space<vmem>>, vector<2x8x128xbf16>,
    %c0_165 = arith.constant 0 : index
    %c0_166 = arith.constant 0 : index
    %c37 = arith.constant 37 : index
    %81 = vector.load %arg10[%c0_165, %c0_166, %c37] : memref<2x8x191xbf16, #tpu.memory_space<vmem>>, vector<2x8x128xbf16>
    %c0_167 = arith.constant 0 : index
    %c296 = arith.constant 296 : index
    %c0_168 = arith.constant 0 : index
    %82 = vector.load %arg11[%c0_167, %c296, %c0_168] : memref<2x512x128xbf16, #tpu.memory_space<vmem>>, vector<2x8x128xbf16>
    tpu.vector_store %arg11[%c0_167, %c296, %c0_168], %81 {strides = array<i32>} : memref<2x512x128xbf16, #tpu.memory_space<vmem>>, vector<2x8x128xbf16>,
    %c0_169 = arith.constant 0 : index
    %c0_170 = arith.constant 0 : index
    %c38 = arith.constant 38 : index
    %83 = vector.load %arg10[%c0_169, %c0_170, %c38] : memref<2x8x191xbf16, #tpu.memory_space<vmem>>, vector<2x8x128xbf16>
    %c0_171 = arith.constant 0 : index
    %c304 = arith.constant 304 : index
    %c0_172 = arith.constant 0 : index
    %84 = vector.load %arg11[%c0_171, %c304, %c0_172] : memref<2x512x128xbf16, #tpu.memory_space<vmem>>, vector<2x8x128xbf16>
    tpu.vector_store %arg11[%c0_171, %c304, %c0_172], %83 {strides = array<i32>} : memref<2x512x128xbf16, #tpu.memory_space<vmem>>, vector<2x8x128xbf16>,
    %c0_173 = arith.constant 0 : index
    %c0_174 = arith.constant 0 : index
    %c39 = arith.constant 39 : index
    %85 = vector.load %arg10[%c0_173, %c0_174, %c39] : memref<2x8x191xbf16, #tpu.memory_space<vmem>>, vector<2x8x128xbf16>
    %c0_175 = arith.constant 0 : index
    %c312 = arith.constant 312 : index
    %c0_176 = arith.constant 0 : index
    %86 = vector.load %arg11[%c0_175, %c312, %c0_176] : memref<2x512x128xbf16, #tpu.memory_space<vmem>>, vector<2x8x128xbf16>
    tpu.vector_store %arg11[%c0_175, %c312, %c0_176], %85 {strides = array<i32>} : memref<2x512x128xbf16, #tpu.memory_space<vmem>>, vector<2x8x128xbf16>,
    %c0_177 = arith.constant 0 : index
    %c0_178 = arith.constant 0 : index
    %c40_179 = arith.constant 40 : index
    %87 = vector.load %arg10[%c0_177, %c0_178, %c40_179] : memref<2x8x191xbf16, #tpu.memory_space<vmem>>, vector<2x8x128xbf16>
    %c0_180 = arith.constant 0 : index
    %c320 = arith.constant 320 : index
    %c0_181 = arith.constant 0 : index
    %88 = vector.load %arg11[%c0_180, %c320, %c0_181] : memref<2x512x128xbf16, #tpu.memory_space<vmem>>, vector<2x8x128xbf16>
    tpu.vector_store %arg11[%c0_180, %c320, %c0_181], %87 {strides = array<i32>} : memref<2x512x128xbf16, #tpu.memory_space<vmem>>, vector<2x8x128xbf16>,
    %c0_182 = arith.constant 0 : index
    %c0_183 = arith.constant 0 : index
    %c41 = arith.constant 41 : index
    %89 = vector.load %arg10[%c0_182, %c0_183, %c41] : memref<2x8x191xbf16, #tpu.memory_space<vmem>>, vector<2x8x128xbf16>
    %c0_184 = arith.constant 0 : index
    %c328 = arith.constant 328 : index
    %c0_185 = arith.constant 0 : index
    %90 = vector.load %arg11[%c0_184, %c328, %c0_185] : memref<2x512x128xbf16, #tpu.memory_space<vmem>>, vector<2x8x128xbf16>
    tpu.vector_store %arg11[%c0_184, %c328, %c0_185], %89 {strides = array<i32>} : memref<2x512x128xbf16, #tpu.memory_space<vmem>>, vector<2x8x128xbf16>,
    %c0_186 = arith.constant 0 : index
    %c0_187 = arith.constant 0 : index
    %c42 = arith.constant 42 : index
    %91 = vector.load %arg10[%c0_186, %c0_187, %c42] : memref<2x8x191xbf16, #tpu.memory_space<vmem>>, vector<2x8x128xbf16>
    %c0_188 = arith.constant 0 : index
    %c336 = arith.constant 336 : index
    %c0_189 = arith.constant 0 : index
    %92 = vector.load %arg11[%c0_188, %c336, %c0_189] : memref<2x512x128xbf16, #tpu.memory_space<vmem>>, vector<2x8x128xbf16>
    tpu.vector_store %arg11[%c0_188, %c336, %c0_189], %91 {strides = array<i32>} : memref<2x512x128xbf16, #tpu.memory_space<vmem>>, vector<2x8x128xbf16>,
    %c0_190 = arith.constant 0 : index
    %c0_191 = arith.constant 0 : index
    %c43 = arith.constant 43 : index
    %93 = vector.load %arg10[%c0_190, %c0_191, %c43] : memref<2x8x191xbf16, #tpu.memory_space<vmem>>, vector<2x8x128xbf16>
    %c0_192 = arith.constant 0 : index
    %c344 = arith.constant 344 : index
    %c0_193 = arith.constant 0 : index
    %94 = vector.load %arg11[%c0_192, %c344, %c0_193] : memref<2x512x128xbf16, #tpu.memory_space<vmem>>, vector<2x8x128xbf16>
    tpu.vector_store %arg11[%c0_192, %c344, %c0_193], %93 {strides = array<i32>} : memref<2x512x128xbf16, #tpu.memory_space<vmem>>, vector<2x8x128xbf16>,
    %c0_194 = arith.constant 0 : index
    %c0_195 = arith.constant 0 : index
    %c44 = arith.constant 44 : index
    %95 = vector.load %arg10[%c0_194, %c0_195, %c44] : memref<2x8x191xbf16, #tpu.memory_space<vmem>>, vector<2x8x128xbf16>
    %c0_196 = arith.constant 0 : index
    %c352 = arith.constant 352 : index
    %c0_197 = arith.constant 0 : index
    %96 = vector.load %arg11[%c0_196, %c352, %c0_197] : memref<2x512x128xbf16, #tpu.memory_space<vmem>>, vector<2x8x128xbf16>
    tpu.vector_store %arg11[%c0_196, %c352, %c0_197], %95 {strides = array<i32>} : memref<2x512x128xbf16, #tpu.memory_space<vmem>>, vector<2x8x128xbf16>,
    %c0_198 = arith.constant 0 : index
    %c0_199 = arith.constant 0 : index
    %c45 = arith.constant 45 : index
    %97 = vector.load %arg10[%c0_198, %c0_199, %c45] : memref<2x8x191xbf16, #tpu.memory_space<vmem>>, vector<2x8x128xbf16>
    %c0_200 = arith.constant 0 : index
    %c360 = arith.constant 360 : index
    %c0_201 = arith.constant 0 : index
    %98 = vector.load %arg11[%c0_200, %c360, %c0_201] : memref<2x512x128xbf16, #tpu.memory_space<vmem>>, vector<2x8x128xbf16>
    tpu.vector_store %arg11[%c0_200, %c360, %c0_201], %97 {strides = array<i32>} : memref<2x512x128xbf16, #tpu.memory_space<vmem>>, vector<2x8x128xbf16>,
    %c0_202 = arith.constant 0 : index
    %c0_203 = arith.constant 0 : index
    %c46 = arith.constant 46 : index
    %99 = vector.load %arg10[%c0_202, %c0_203, %c46] : memref<2x8x191xbf16, #tpu.memory_space<vmem>>, vector<2x8x128xbf16>
    %c0_204 = arith.constant 0 : index
    %c368 = arith.constant 368 : index
    %c0_205 = arith.constant 0 : index
    %100 = vector.load %arg11[%c0_204, %c368, %c0_205] : memref<2x512x128xbf16, #tpu.memory_space<vmem>>, vector<2x8x128xbf16>
    tpu.vector_store %arg11[%c0_204, %c368, %c0_205], %99 {strides = array<i32>} : memref<2x512x128xbf16, #tpu.memory_space<vmem>>, vector<2x8x128xbf16>,
    %c0_206 = arith.constant 0 : index
    %c0_207 = arith.constant 0 : index
    %c47 = arith.constant 47 : index
    %101 = vector.load %arg10[%c0_206, %c0_207, %c47] : memref<2x8x191xbf16, #tpu.memory_space<vmem>>, vector<2x8x128xbf16>
    %c0_208 = arith.constant 0 : index
    %c376 = arith.constant 376 : index
    %c0_209 = arith.constant 0 : index
    %102 = vector.load %arg11[%c0_208, %c376, %c0_209] : memref<2x512x128xbf16, #tpu.memory_space<vmem>>, vector<2x8x128xbf16>
    tpu.vector_store %arg11[%c0_208, %c376, %c0_209], %101 {strides = array<i32>} : memref<2x512x128xbf16, #tpu.memory_space<vmem>>, vector<2x8x128xbf16>,
    %c0_210 = arith.constant 0 : index
    %c0_211 = arith.constant 0 : index
    %c48_212 = arith.constant 48 : index
    %103 = vector.load %arg10[%c0_210, %c0_211, %c48_212] : memref<2x8x191xbf16, #tpu.memory_space<vmem>>, vector<2x8x128xbf16>
    %c0_213 = arith.constant 0 : index
    %c384 = arith.constant 384 : index
    %c0_214 = arith.constant 0 : index
    %104 = vector.load %arg11[%c0_213, %c384, %c0_214] : memref<2x512x128xbf16, #tpu.memory_space<vmem>>, vector<2x8x128xbf16>
    tpu.vector_store %arg11[%c0_213, %c384, %c0_214], %103 {strides = array<i32>} : memref<2x512x128xbf16, #tpu.memory_space<vmem>>, vector<2x8x128xbf16>,
    %c0_215 = arith.constant 0 : index
    %c0_216 = arith.constant 0 : index
    %c49 = arith.constant 49 : index
    %105 = vector.load %arg10[%c0_215, %c0_216, %c49] : memref<2x8x191xbf16, #tpu.memory_space<vmem>>, vector<2x8x128xbf16>
    %c0_217 = arith.constant 0 : index
    %c392 = arith.constant 392 : index
    %c0_218 = arith.constant 0 : index
    %106 = vector.load %arg11[%c0_217, %c392, %c0_218] : memref<2x512x128xbf16, #tpu.memory_space<vmem>>, vector<2x8x128xbf16>
    tpu.vector_store %arg11[%c0_217, %c392, %c0_218], %105 {strides = array<i32>} : memref<2x512x128xbf16, #tpu.memory_space<vmem>>, vector<2x8x128xbf16>,
    %c0_219 = arith.constant 0 : index
    %c0_220 = arith.constant 0 : index
    %c50 = arith.constant 50 : index
    %107 = vector.load %arg10[%c0_219, %c0_220, %c50] : memref<2x8x191xbf16, #tpu.memory_space<vmem>>, vector<2x8x128xbf16>
    %c0_221 = arith.constant 0 : index
    %c400 = arith.constant 400 : index
    %c0_222 = arith.constant 0 : index
    %108 = vector.load %arg11[%c0_221, %c400, %c0_222] : memref<2x512x128xbf16, #tpu.memory_space<vmem>>, vector<2x8x128xbf16>
    tpu.vector_store %arg11[%c0_221, %c400, %c0_222], %107 {strides = array<i32>} : memref<2x512x128xbf16, #tpu.memory_space<vmem>>, vector<2x8x128xbf16>,
    %c0_223 = arith.constant 0 : index
    %c0_224 = arith.constant 0 : index
    %c51 = arith.constant 51 : index
    %109 = vector.load %arg10[%c0_223, %c0_224, %c51] : memref<2x8x191xbf16, #tpu.memory_space<vmem>>, vector<2x8x128xbf16>
    %c0_225 = arith.constant 0 : index
    %c408 = arith.constant 408 : index
    %c0_226 = arith.constant 0 : index
    %110 = vector.load %arg11[%c0_225, %c408, %c0_226] : memref<2x512x128xbf16, #tpu.memory_space<vmem>>, vector<2x8x128xbf16>
    tpu.vector_store %arg11[%c0_225, %c408, %c0_226], %109 {strides = array<i32>} : memref<2x512x128xbf16, #tpu.memory_space<vmem>>, vector<2x8x128xbf16>,
    %c0_227 = arith.constant 0 : index
    %c0_228 = arith.constant 0 : index
    %c52 = arith.constant 52 : index
    %111 = vector.load %arg10[%c0_227, %c0_228, %c52] : memref<2x8x191xbf16, #tpu.memory_space<vmem>>, vector<2x8x128xbf16>
    %c0_229 = arith.constant 0 : index
    %c416 = arith.constant 416 : index
    %c0_230 = arith.constant 0 : index
    %112 = vector.load %arg11[%c0_229, %c416, %c0_230] : memref<2x512x128xbf16, #tpu.memory_space<vmem>>, vector<2x8x128xbf16>
    tpu.vector_store %arg11[%c0_229, %c416, %c0_230], %111 {strides = array<i32>} : memref<2x512x128xbf16, #tpu.memory_space<vmem>>, vector<2x8x128xbf16>,
    %c0_231 = arith.constant 0 : index
    %c0_232 = arith.constant 0 : index
    %c53 = arith.constant 53 : index
    %113 = vector.load %arg10[%c0_231, %c0_232, %c53] : memref<2x8x191xbf16, #tpu.memory_space<vmem>>, vector<2x8x128xbf16>
    %c0_233 = arith.constant 0 : index
    %c424 = arith.constant 424 : index
    %c0_234 = arith.constant 0 : index
    %114 = vector.load %arg11[%c0_233, %c424, %c0_234] : memref<2x512x128xbf16, #tpu.memory_space<vmem>>, vector<2x8x128xbf16>
    tpu.vector_store %arg11[%c0_233, %c424, %c0_234], %113 {strides = array<i32>} : memref<2x512x128xbf16, #tpu.memory_space<vmem>>, vector<2x8x128xbf16>,
    %c0_235 = arith.constant 0 : index
    %c0_236 = arith.constant 0 : index
    %c54 = arith.constant 54 : index
    %115 = vector.load %arg10[%c0_235, %c0_236, %c54] : memref<2x8x191xbf16, #tpu.memory_space<vmem>>, vector<2x8x128xbf16>
    %c0_237 = arith.constant 0 : index
    %c432 = arith.constant 432 : index
    %c0_238 = arith.constant 0 : index
    %116 = vector.load %arg11[%c0_237, %c432, %c0_238] : memref<2x512x128xbf16, #tpu.memory_space<vmem>>, vector<2x8x128xbf16>
    tpu.vector_store %arg11[%c0_237, %c432, %c0_238], %115 {strides = array<i32>} : memref<2x512x128xbf16, #tpu.memory_space<vmem>>, vector<2x8x128xbf16>,
    %c0_239 = arith.constant 0 : index
    %c0_240 = arith.constant 0 : index
    %c55 = arith.constant 55 : index
    %117 = vector.load %arg10[%c0_239, %c0_240, %c55] : memref<2x8x191xbf16, #tpu.memory_space<vmem>>, vector<2x8x128xbf16>
    %c0_241 = arith.constant 0 : index
    %c440 = arith.constant 440 : index
    %c0_242 = arith.constant 0 : index
    %118 = vector.load %arg11[%c0_241, %c440, %c0_242] : memref<2x512x128xbf16, #tpu.memory_space<vmem>>, vector<2x8x128xbf16>
    tpu.vector_store %arg11[%c0_241, %c440, %c0_242], %117 {strides = array<i32>} : memref<2x512x128xbf16, #tpu.memory_space<vmem>>, vector<2x8x128xbf16>,
    %c0_243 = arith.constant 0 : index
    %c0_244 = arith.constant 0 : index
    %c56_245 = arith.constant 56 : index
    %119 = vector.load %arg10[%c0_243, %c0_244, %c56_245] : memref<2x8x191xbf16, #tpu.memory_space<vmem>>, vector<2x8x128xbf16>
    %c0_246 = arith.constant 0 : index
    %c448 = arith.constant 448 : index
    %c0_247 = arith.constant 0 : index
    %120 = vector.load %arg11[%c0_246, %c448, %c0_247] : memref<2x512x128xbf16, #tpu.memory_space<vmem>>, vector<2x8x128xbf16>
    tpu.vector_store %arg11[%c0_246, %c448, %c0_247], %119 {strides = array<i32>} : memref<2x512x128xbf16, #tpu.memory_space<vmem>>, vector<2x8x128xbf16>,
    %c0_248 = arith.constant 0 : index
    %c0_249 = arith.constant 0 : index
    %c57 = arith.constant 57 : index
    %121 = vector.load %arg10[%c0_248, %c0_249, %c57] : memref<2x8x191xbf16, #tpu.memory_space<vmem>>, vector<2x8x128xbf16>
    %c0_250 = arith.constant 0 : index
    %c456 = arith.constant 456 : index
    %c0_251 = arith.constant 0 : index
    %122 = vector.load %arg11[%c0_250, %c456, %c0_251] : memref<2x512x128xbf16, #tpu.memory_space<vmem>>, vector<2x8x128xbf16>
    tpu.vector_store %arg11[%c0_250, %c456, %c0_251], %121 {strides = array<i32>} : memref<2x512x128xbf16, #tpu.memory_space<vmem>>, vector<2x8x128xbf16>,
    %c0_252 = arith.constant 0 : index
    %c0_253 = arith.constant 0 : index
    %c58 = arith.constant 58 : index
    %123 = vector.load %arg10[%c0_252, %c0_253, %c58] : memref<2x8x191xbf16, #tpu.memory_space<vmem>>, vector<2x8x128xbf16>
    %c0_254 = arith.constant 0 : index
    %c464 = arith.constant 464 : index
    %c0_255 = arith.constant 0 : index
    %124 = vector.load %arg11[%c0_254, %c464, %c0_255] : memref<2x512x128xbf16, #tpu.memory_space<vmem>>, vector<2x8x128xbf16>
    tpu.vector_store %arg11[%c0_254, %c464, %c0_255], %123 {strides = array<i32>} : memref<2x512x128xbf16, #tpu.memory_space<vmem>>, vector<2x8x128xbf16>,
    %c0_256 = arith.constant 0 : index
    %c0_257 = arith.constant 0 : index
    %c59 = arith.constant 59 : index
    %125 = vector.load %arg10[%c0_256, %c0_257, %c59] : memref<2x8x191xbf16, #tpu.memory_space<vmem>>, vector<2x8x128xbf16>
    %c0_258 = arith.constant 0 : index
    %c472 = arith.constant 472 : index
    %c0_259 = arith.constant 0 : index
    %126 = vector.load %arg11[%c0_258, %c472, %c0_259] : memref<2x512x128xbf16, #tpu.memory_space<vmem>>, vector<2x8x128xbf16>
    tpu.vector_store %arg11[%c0_258, %c472, %c0_259], %125 {strides = array<i32>} : memref<2x512x128xbf16, #tpu.memory_space<vmem>>, vector<2x8x128xbf16>,
    %c0_260 = arith.constant 0 : index
    %c0_261 = arith.constant 0 : index
    %c60 = arith.constant 60 : index
    %127 = vector.load %arg10[%c0_260, %c0_261, %c60] : memref<2x8x191xbf16, #tpu.memory_space<vmem>>, vector<2x8x128xbf16>
    %c0_262 = arith.constant 0 : index
    %c480 = arith.constant 480 : index
    %c0_263 = arith.constant 0 : index
    %128 = vector.load %arg11[%c0_262, %c480, %c0_263] : memref<2x512x128xbf16, #tpu.memory_space<vmem>>, vector<2x8x128xbf16>
    tpu.vector_store %arg11[%c0_262, %c480, %c0_263], %127 {strides = array<i32>} : memref<2x512x128xbf16, #tpu.memory_space<vmem>>, vector<2x8x128xbf16>,
    %c0_264 = arith.constant 0 : index
    %c0_265 = arith.constant 0 : index
    %c61 = arith.constant 61 : index
    %129 = vector.load %arg10[%c0_264, %c0_265, %c61] : memref<2x8x191xbf16, #tpu.memory_space<vmem>>, vector<2x8x128xbf16>
    %c0_266 = arith.constant 0 : index
    %c488 = arith.constant 488 : index
    %c0_267 = arith.constant 0 : index
    %130 = vector.load %arg11[%c0_266, %c488, %c0_267] : memref<2x512x128xbf16, #tpu.memory_space<vmem>>, vector<2x8x128xbf16>
    tpu.vector_store %arg11[%c0_266, %c488, %c0_267], %129 {strides = array<i32>} : memref<2x512x128xbf16, #tpu.memory_space<vmem>>, vector<2x8x128xbf16>,
    %c0_268 = arith.constant 0 : index
    %c0_269 = arith.constant 0 : index
    %c62 = arith.constant 62 : index
    %131 = vector.load %arg10[%c0_268, %c0_269, %c62] : memref<2x8x191xbf16, #tpu.memory_space<vmem>>, vector<2x8x128xbf16>
    %c0_270 = arith.constant 0 : index
    %c496 = arith.constant 496 : index
    %c0_271 = arith.constant 0 : index
    %132 = vector.load %arg11[%c0_270, %c496, %c0_271] : memref<2x512x128xbf16, #tpu.memory_space<vmem>>, vector<2x8x128xbf16>
    tpu.vector_store %arg11[%c0_270, %c496, %c0_271], %131 {strides = array<i32>} : memref<2x512x128xbf16, #tpu.memory_space<vmem>>, vector<2x8x128xbf16>,
    %c0_272 = arith.constant 0 : index
    %c0_273 = arith.constant 0 : index
    %c63 = arith.constant 63 : index
    %133 = vector.load %arg10[%c0_272, %c0_273, %c63] : memref<2x8x191xbf16, #tpu.memory_space<vmem>>, vector<2x8x128xbf16>
    %c0_274 = arith.constant 0 : index
    %c504 = arith.constant 504 : index
    %c0_275 = arith.constant 0 : index
    %134 = vector.load %arg11[%c0_274, %c504, %c0_275] : memref<2x512x128xbf16, #tpu.memory_space<vmem>>, vector<2x8x128xbf16>
    tpu.vector_store %arg11[%c0_274, %c504, %c0_275], %133 {strides = array<i32>} : memref<2x512x128xbf16, #tpu.memory_space<vmem>>, vector<2x8x128xbf16>,
    %c0_276 = arith.constant 0 : index
    %c0_277 = arith.constant 0 : index
    %135 = vector.load %arg2[%c0_276, %c0_277] : memref<16x512xbf16, #tpu.memory_space<vmem>>, vector<16x512xbf16>
    %c0_278 = arith.constant 0 : index
    %c0_279 = arith.constant 0 : index
    %136 = vector.load %arg3[%c0_278, %c0_279] : memref<16x1xf32, #tpu.memory_space<vmem>>, vector<16x1xf32>
    %c0_280 = arith.constant 0 : index
    %c0_281 = arith.constant 0 : index
    %137 = vector.load %arg4[%c0_280, %c0_281] : memref<128x47xbf16, #tpu.memory_space<vmem>>, vector<128x47xbf16>
    %c0_282 = arith.constant 0 : index
    %c0_283 = arith.constant 0 : index
    %c0_284 = arith.constant 0 : index
    %138 = vector.load %arg11[%c0_282, %c0_283, %c0_284] : memref<2x512x128xbf16, #tpu.memory_space<vmem>>, vector<1x512x128xbf16>
    %139 = vector.shape_cast %138 : vector<1x512x128xbf16> to vector<512x128xbf16>
    %cst_285 = arith.constant dense<0.000000e+00> : vector<16x128xf32>
    %140 = tpu.matmul %135, %139, %cst_285 {dimension_numbers = #tpu.dot_dimension_numbers<[1], [0], [0], [1], [0, 0, 1, 1], [], []>} : vector<16x512xbf16>, vector<512x128xbf16>, vector<16x128xf32> -> vector<16x128xf32>
    %141 = vector.broadcast %136 : vector<16x1xf32> to vector<16x128xf32>
    %142 = arith.addf %140, %141 : vector<16x128xf32>
    %cst_286 = arith.constant 0.000000e+00 : f32
    %143 = vector.broadcast %cst_286 : f32 to vector<16x128xf32>
    %144 = arith.cmpf ogt, %142, %143 : vector<16x128xf32>
    %cst_287 = arith.constant 0.000000e+00 : f32
    %145 = vector.broadcast %cst_287 : f32 to vector<16x128xf32>
    %146 = arith.minimumf %142, %145 : vector<16x128xf32>
    %147 = math.exp %146 : vector<16x128xf32>
    %cst_288 = arith.constant 1.000000e+00 : f32
    %148 = vector.broadcast %cst_288 : f32 to vector<16x128xf32>
    %149 = arith.subf %147, %148 : vector<16x128xf32>
    %150 = arith.select %144, %142, %149 : vector<16x128xi1>, vector<16x128xf32>
    %151 = arith.truncf %150 : vector<16x128xf32> to vector<16x128xbf16>
    %cst_289 = arith.constant dense<0.000000e+00> : vector<16x47xf32>
    %152 = tpu.matmul %151, %137, %cst_289 {dimension_numbers = #tpu.dot_dimension_numbers<[1], [0], [0], [1], [0, 0, 1, 1], [], []>} : vector<16x128xbf16>, vector<128x47xbf16>, vector<16x47xf32> -> vector<16x47xf32>
    %153 = arith.truncf %152 : vector<16x47xf32> to vector<16x47xbf16>
    %c0_290 = arith.constant 0 : index
    %c0_291 = arith.constant 0 : index
    %c0_292 = arith.constant 0 : index
    %154 = vector.load %arg12[%c0_290, %c0_291, %c0_292] : memref<2x16x47xbf16, #tpu.memory_space<vmem>>, vector<1x16x47xbf16>
    %155 = vector.shape_cast %154 : vector<1x16x47xbf16> to vector<16x47xbf16>
    %156 = vector.shape_cast %153 : vector<16x47xbf16> to vector<1x16x47xbf16>
    tpu.vector_store %arg12[%c0_290, %c0_291, %c0_292], %156 {strides = array<i32>} : memref<2x16x47xbf16, #tpu.memory_space<vmem>>, vector<1x16x47xbf16>,
    %c1_293 = arith.constant 1 : index
    %c0_294 = arith.constant 0 : index
    %c0_295 = arith.constant 0 : index
    %157 = vector.load %arg11[%c1_293, %c0_294, %c0_295] : memref<2x512x128xbf16, #tpu.memory_space<vmem>>, vector<1x512x128xbf16>
    %158 = vector.shape_cast %157 : vector<1x512x128xbf16> to vector<512x128xbf16>
    %cst_296 = arith.constant dense<0.000000e+00> : vector<16x128xf32>
    %159 = tpu.matmul %135, %158, %cst_296 {dimension_numbers = #tpu.dot_dimension_numbers<[1], [0], [0], [1], [0, 0, 1, 1], [], []>} : vector<16x512xbf16>, vector<512x128xbf16>, vector<16x128xf32> -> vector<16x128xf32>
    %160 = vector.broadcast %136 : vector<16x1xf32> to vector<16x128xf32>
    %161 = arith.addf %159, %160 : vector<16x128xf32>
    %cst_297 = arith.constant 0.000000e+00 : f32
    %162 = vector.broadcast %cst_297 : f32 to vector<16x128xf32>
    %163 = arith.cmpf ogt, %161, %162 : vector<16x128xf32>
    %cst_298 = arith.constant 0.000000e+00 : f32
    %164 = vector.broadcast %cst_298 : f32 to vector<16x128xf32>
    %165 = arith.minimumf %161, %164 : vector<16x128xf32>
    %166 = math.exp %165 : vector<16x128xf32>
    %cst_299 = arith.constant 1.000000e+00 : f32
    %167 = vector.broadcast %cst_299 : f32 to vector<16x128xf32>
    %168 = arith.subf %166, %167 : vector<16x128xf32>
    %169 = arith.select %163, %161, %168 : vector<16x128xi1>, vector<16x128xf32>
    %170 = arith.truncf %169 : vector<16x128xf32> to vector<16x128xbf16>
    %cst_300 = arith.constant dense<0.000000e+00> : vector<16x47xf32>
    %171 = tpu.matmul %170, %137, %cst_300 {dimension_numbers = #tpu.dot_dimension_numbers<[1], [0], [0], [1], [0, 0, 1, 1], [], []>} : vector<16x128xbf16>, vector<128x47xbf16>, vector<16x47xf32> -> vector<16x47xf32>
    %172 = arith.truncf %171 : vector<16x47xf32> to vector<16x47xbf16>
    %c1_301 = arith.constant 1 : index
    %c0_302 = arith.constant 0 : index
    %c0_303 = arith.constant 0 : index
    %173 = vector.load %arg12[%c1_301, %c0_302, %c0_303] : memref<2x16x47xbf16, #tpu.memory_space<vmem>>, vector<1x16x47xbf16>
    %174 = vector.shape_cast %173 : vector<1x16x47xbf16> to vector<16x47xbf16>
    %175 = vector.shape_cast %172 : vector<16x47xbf16> to vector<1x16x47xbf16>
    tpu.vector_store %arg12[%c1_301, %c0_302, %c0_303], %175 {strides = array<i32>} : memref<2x16x47xbf16, #tpu.memory_space<vmem>>, vector<1x16x47xbf16>,
    %c0_304 = arith.constant 0 : index
    %c0_305 = arith.constant 0 : index
    %c0_306 = arith.constant 0 : index
    %176 = vector.load %arg12[%c0_304, %c0_305, %c0_306] : memref<2x16x47xbf16, #tpu.memory_space<vmem>>, vector<2x16x32xbf16>
    %c0_307 = arith.constant 0 : index
    %c0_308 = arith.constant 0 : index
    %c0_309 = arith.constant 0 : index
    %177 = vector.load %arg13[%c0_307, %c0_308, %c0_309] : memref<2x256x32xbf16, #tpu.memory_space<vmem>>, vector<2x16x32xbf16>
    tpu.vector_store %arg13[%c0_307, %c0_308, %c0_309], %176 {strides = array<i32>} : memref<2x256x32xbf16, #tpu.memory_space<vmem>>, vector<2x16x32xbf16>,
    %c0_310 = arith.constant 0 : index
    %c0_311 = arith.constant 0 : index
    %c1_312 = arith.constant 1 : index
    %178 = vector.load %arg12[%c0_310, %c0_311, %c1_312] : memref<2x16x47xbf16, #tpu.memory_space<vmem>>, vector<2x16x32xbf16>
    %c0_313 = arith.constant 0 : index
    %c16_314 = arith.constant 16 : index
    %c0_315 = arith.constant 0 : index
    %179 = vector.load %arg13[%c0_313, %c16_314, %c0_315] : memref<2x256x32xbf16, #tpu.memory_space<vmem>>, vector<2x16x32xbf16>
    tpu.vector_store %arg13[%c0_313, %c16_314, %c0_315], %178 {strides = array<i32>} : memref<2x256x32xbf16, #tpu.memory_space<vmem>>, vector<2x16x32xbf16>,
    %c0_316 = arith.constant 0 : index
    %c0_317 = arith.constant 0 : index
    %c2_318 = arith.constant 2 : index
    %180 = vector.load %arg12[%c0_316, %c0_317, %c2_318] : memref<2x16x47xbf16, #tpu.memory_space<vmem>>, vector<2x16x32xbf16>
    %c0_319 = arith.constant 0 : index
    %c32_320 = arith.constant 32 : index
    %c0_321 = arith.constant 0 : index
    %181 = vector.load %arg13[%c0_319, %c32_320, %c0_321] : memref<2x256x32xbf16, #tpu.memory_space<vmem>>, vector<2x16x32xbf16>
    tpu.vector_store %arg13[%c0_319, %c32_320, %c0_321], %180 {strides = array<i32>} : memref<2x256x32xbf16, #tpu.memory_space<vmem>>, vector<2x16x32xbf16>,
    %c0_322 = arith.constant 0 : index
    %c0_323 = arith.constant 0 : index
    %c3_324 = arith.constant 3 : index
    %182 = vector.load %arg12[%c0_322, %c0_323, %c3_324] : memref<2x16x47xbf16, #tpu.memory_space<vmem>>, vector<2x16x32xbf16>
    %c0_325 = arith.constant 0 : index
    %c48_326 = arith.constant 48 : index
    %c0_327 = arith.constant 0 : index
    %183 = vector.load %arg13[%c0_325, %c48_326, %c0_327] : memref<2x256x32xbf16, #tpu.memory_space<vmem>>, vector<2x16x32xbf16>
    tpu.vector_store %arg13[%c0_325, %c48_326, %c0_327], %182 {strides = array<i32>} : memref<2x256x32xbf16, #tpu.memory_space<vmem>>, vector<2x16x32xbf16>,
    %c0_328 = arith.constant 0 : index
    %c0_329 = arith.constant 0 : index
    %c4_330 = arith.constant 4 : index
    %184 = vector.load %arg12[%c0_328, %c0_329, %c4_330] : memref<2x16x47xbf16, #tpu.memory_space<vmem>>, vector<2x16x32xbf16>
    %c0_331 = arith.constant 0 : index
    %c64_332 = arith.constant 64 : index
    %c0_333 = arith.constant 0 : index
    %185 = vector.load %arg13[%c0_331, %c64_332, %c0_333] : memref<2x256x32xbf16, #tpu.memory_space<vmem>>, vector<2x16x32xbf16>
    tpu.vector_store %arg13[%c0_331, %c64_332, %c0_333], %184 {strides = array<i32>} : memref<2x256x32xbf16, #tpu.memory_space<vmem>>, vector<2x16x32xbf16>,
    %c0_334 = arith.constant 0 : index
    %c0_335 = arith.constant 0 : index
    %c5_336 = arith.constant 5 : index
    %186 = vector.load %arg12[%c0_334, %c0_335, %c5_336] : memref<2x16x47xbf16, #tpu.memory_space<vmem>>, vector<2x16x32xbf16>
    %c0_337 = arith.constant 0 : index
    %c80_338 = arith.constant 80 : index
    %c0_339 = arith.constant 0 : index
    %187 = vector.load %arg13[%c0_337, %c80_338, %c0_339] : memref<2x256x32xbf16, #tpu.memory_space<vmem>>, vector<2x16x32xbf16>
    tpu.vector_store %arg13[%c0_337, %c80_338, %c0_339], %186 {strides = array<i32>} : memref<2x256x32xbf16, #tpu.memory_space<vmem>>, vector<2x16x32xbf16>,
    %c0_340 = arith.constant 0 : index
    %c0_341 = arith.constant 0 : index
    %c6_342 = arith.constant 6 : index
    %188 = vector.load %arg12[%c0_340, %c0_341, %c6_342] : memref<2x16x47xbf16, #tpu.memory_space<vmem>>, vector<2x16x32xbf16>
    %c0_343 = arith.constant 0 : index
    %c96_344 = arith.constant 96 : index
    %c0_345 = arith.constant 0 : index
    %189 = vector.load %arg13[%c0_343, %c96_344, %c0_345] : memref<2x256x32xbf16, #tpu.memory_space<vmem>>, vector<2x16x32xbf16>
    tpu.vector_store %arg13[%c0_343, %c96_344, %c0_345], %188 {strides = array<i32>} : memref<2x256x32xbf16, #tpu.memory_space<vmem>>, vector<2x16x32xbf16>,
    %c0_346 = arith.constant 0 : index
    %c0_347 = arith.constant 0 : index
    %c7_348 = arith.constant 7 : index
    %190 = vector.load %arg12[%c0_346, %c0_347, %c7_348] : memref<2x16x47xbf16, #tpu.memory_space<vmem>>, vector<2x16x32xbf16>
    %c0_349 = arith.constant 0 : index
    %c112_350 = arith.constant 112 : index
    %c0_351 = arith.constant 0 : index
    %191 = vector.load %arg13[%c0_349, %c112_350, %c0_351] : memref<2x256x32xbf16, #tpu.memory_space<vmem>>, vector<2x16x32xbf16>
    tpu.vector_store %arg13[%c0_349, %c112_350, %c0_351], %190 {strides = array<i32>} : memref<2x256x32xbf16, #tpu.memory_space<vmem>>, vector<2x16x32xbf16>,
    %c0_352 = arith.constant 0 : index
    %c0_353 = arith.constant 0 : index
    %c8_354 = arith.constant 8 : index
    %192 = vector.load %arg12[%c0_352, %c0_353, %c8_354] : memref<2x16x47xbf16, #tpu.memory_space<vmem>>, vector<2x16x32xbf16>
    %c0_355 = arith.constant 0 : index
    %c128_356 = arith.constant 128 : index
    %c0_357 = arith.constant 0 : index
    %193 = vector.load %arg13[%c0_355, %c128_356, %c0_357] : memref<2x256x32xbf16, #tpu.memory_space<vmem>>, vector<2x16x32xbf16>
    tpu.vector_store %arg13[%c0_355, %c128_356, %c0_357], %192 {strides = array<i32>} : memref<2x256x32xbf16, #tpu.memory_space<vmem>>, vector<2x16x32xbf16>,
    %c0_358 = arith.constant 0 : index
    %c0_359 = arith.constant 0 : index
    %c9_360 = arith.constant 9 : index
    %194 = vector.load %arg12[%c0_358, %c0_359, %c9_360] : memref<2x16x47xbf16, #tpu.memory_space<vmem>>, vector<2x16x32xbf16>
    %c0_361 = arith.constant 0 : index
    %c144_362 = arith.constant 144 : index
    %c0_363 = arith.constant 0 : index
    %195 = vector.load %arg13[%c0_361, %c144_362, %c0_363] : memref<2x256x32xbf16, #tpu.memory_space<vmem>>, vector<2x16x32xbf16>
    tpu.vector_store %arg13[%c0_361, %c144_362, %c0_363], %194 {strides = array<i32>} : memref<2x256x32xbf16, #tpu.memory_space<vmem>>, vector<2x16x32xbf16>,
    %c0_364 = arith.constant 0 : index
    %c0_365 = arith.constant 0 : index
    %c10_366 = arith.constant 10 : index
    %196 = vector.load %arg12[%c0_364, %c0_365, %c10_366] : memref<2x16x47xbf16, #tpu.memory_space<vmem>>, vector<2x16x32xbf16>
    %c0_367 = arith.constant 0 : index
    %c160_368 = arith.constant 160 : index
    %c0_369 = arith.constant 0 : index
    %197 = vector.load %arg13[%c0_367, %c160_368, %c0_369] : memref<2x256x32xbf16, #tpu.memory_space<vmem>>, vector<2x16x32xbf16>
    tpu.vector_store %arg13[%c0_367, %c160_368, %c0_369], %196 {strides = array<i32>} : memref<2x256x32xbf16, #tpu.memory_space<vmem>>, vector<2x16x32xbf16>,
    %c0_370 = arith.constant 0 : index
    %c0_371 = arith.constant 0 : index
    %c11_372 = arith.constant 11 : index
    %198 = vector.load %arg12[%c0_370, %c0_371, %c11_372] : memref<2x16x47xbf16, #tpu.memory_space<vmem>>, vector<2x16x32xbf16>
    %c0_373 = arith.constant 0 : index
    %c176_374 = arith.constant 176 : index
    %c0_375 = arith.constant 0 : index
    %199 = vector.load %arg13[%c0_373, %c176_374, %c0_375] : memref<2x256x32xbf16, #tpu.memory_space<vmem>>, vector<2x16x32xbf16>
    tpu.vector_store %arg13[%c0_373, %c176_374, %c0_375], %198 {strides = array<i32>} : memref<2x256x32xbf16, #tpu.memory_space<vmem>>, vector<2x16x32xbf16>,
    %c0_376 = arith.constant 0 : index
    %c0_377 = arith.constant 0 : index
    %c12_378 = arith.constant 12 : index
    %200 = vector.load %arg12[%c0_376, %c0_377, %c12_378] : memref<2x16x47xbf16, #tpu.memory_space<vmem>>, vector<2x16x32xbf16>
    %c0_379 = arith.constant 0 : index
    %c192_380 = arith.constant 192 : index
    %c0_381 = arith.constant 0 : index
    %201 = vector.load %arg13[%c0_379, %c192_380, %c0_381] : memref<2x256x32xbf16, #tpu.memory_space<vmem>>, vector<2x16x32xbf16>
    tpu.vector_store %arg13[%c0_379, %c192_380, %c0_381], %200 {strides = array<i32>} : memref<2x256x32xbf16, #tpu.memory_space<vmem>>, vector<2x16x32xbf16>,
    %c0_382 = arith.constant 0 : index
    %c0_383 = arith.constant 0 : index
    %c13_384 = arith.constant 13 : index
    %202 = vector.load %arg12[%c0_382, %c0_383, %c13_384] : memref<2x16x47xbf16, #tpu.memory_space<vmem>>, vector<2x16x32xbf16>
    %c0_385 = arith.constant 0 : index
    %c208_386 = arith.constant 208 : index
    %c0_387 = arith.constant 0 : index
    %203 = vector.load %arg13[%c0_385, %c208_386, %c0_387] : memref<2x256x32xbf16, #tpu.memory_space<vmem>>, vector<2x16x32xbf16>
    tpu.vector_store %arg13[%c0_385, %c208_386, %c0_387], %202 {strides = array<i32>} : memref<2x256x32xbf16, #tpu.memory_space<vmem>>, vector<2x16x32xbf16>,
    %c0_388 = arith.constant 0 : index
    %c0_389 = arith.constant 0 : index
    %c14_390 = arith.constant 14 : index
    %204 = vector.load %arg12[%c0_388, %c0_389, %c14_390] : memref<2x16x47xbf16, #tpu.memory_space<vmem>>, vector<2x16x32xbf16>
    %c0_391 = arith.constant 0 : index
    %c224_392 = arith.constant 224 : index
    %c0_393 = arith.constant 0 : index
    %205 = vector.load %arg13[%c0_391, %c224_392, %c0_393] : memref<2x256x32xbf16, #tpu.memory_space<vmem>>, vector<2x16x32xbf16>
    tpu.vector_store %arg13[%c0_391, %c224_392, %c0_393], %204 {strides = array<i32>} : memref<2x256x32xbf16, #tpu.memory_space<vmem>>, vector<2x16x32xbf16>,
    %c0_394 = arith.constant 0 : index
    %c0_395 = arith.constant 0 : index
    %c15_396 = arith.constant 15 : index
    %206 = vector.load %arg12[%c0_394, %c0_395, %c15_396] : memref<2x16x47xbf16, #tpu.memory_space<vmem>>, vector<2x16x32xbf16>
    %c0_397 = arith.constant 0 : index
    %c240_398 = arith.constant 240 : index
    %c0_399 = arith.constant 0 : index
    %207 = vector.load %arg13[%c0_397, %c240_398, %c0_399] : memref<2x256x32xbf16, #tpu.memory_space<vmem>>, vector<2x16x32xbf16>
    tpu.vector_store %arg13[%c0_397, %c240_398, %c0_399], %206 {strides = array<i32>} : memref<2x256x32xbf16, #tpu.memory_space<vmem>>, vector<2x16x32xbf16>,
    %c0_400 = arith.constant 0 : index
    %c0_401 = arith.constant 0 : index
    %208 = vector.load %arg5[%c0_400, %c0_401] : memref<16x256xbf16, #tpu.memory_space<vmem>>, vector<16x256xbf16>
    %c0_402 = arith.constant 0 : index
    %c0_403 = arith.constant 0 : index
    %209 = vector.load %arg6[%c0_402, %c0_403] : memref<16x1xf32, #tpu.memory_space<vmem>>, vector<16x1xf32>
    %c0_404 = arith.constant 0 : index
    %c0_405 = arith.constant 0 : index
    %c0_406 = arith.constant 0 : index
    %210 = vector.load %arg7[%c0_404, %c0_405, %c0_406] : memref<4x16x32xf32, #tpu.memory_space<vmem>>, vector<4x16x32xf32>
    %c0_407 = arith.constant 0 : index
    %c0_408 = arith.constant 0 : index
    %211 = vector.load %arg8[%c0_407, %c0_408] : memref<4x1xf32, #tpu.memory_space<vmem>>, vector<4x1xf32>
    %c0_409 = arith.constant 0 : index
    %c0_410 = arith.constant 0 : index
    %c0_411 = arith.constant 0 : index
    %212 = vector.load %arg13[%c0_409, %c0_410, %c0_411] : memref<2x256x32xbf16, #tpu.memory_space<vmem>>, vector<1x256x32xbf16>
    %213 = vector.shape_cast %212 : vector<1x256x32xbf16> to vector<256x32xbf16>
    %cst_412 = arith.constant dense<0.000000e+00> : vector<16x32xf32>
    %214 = tpu.matmul %208, %213, %cst_412 {dimension_numbers = #tpu.dot_dimension_numbers<[1], [0], [0], [1], [0, 0, 1, 1], [], []>} : vector<16x256xbf16>, vector<256x32xbf16>, vector<16x32xf32> -> vector<16x32xf32>
    %215 = vector.broadcast %209 : vector<16x1xf32> to vector<16x32xf32>
    %216 = arith.addf %214, %215 : vector<16x32xf32>
    %cst_413 = arith.constant 0.000000e+00 : f32
    %217 = vector.broadcast %cst_413 : f32 to vector<16x32xf32>
    %218 = arith.cmpf ogt, %216, %217 : vector<16x32xf32>
    %cst_414 = arith.constant 0.000000e+00 : f32
    %219 = vector.broadcast %cst_414 : f32 to vector<16x32xf32>
    %220 = arith.minimumf %216, %219 : vector<16x32xf32>
    %221 = math.exp %220 : vector<16x32xf32>
    %cst_415 = arith.constant 1.000000e+00 : f32
    %222 = vector.broadcast %cst_415 : f32 to vector<16x32xf32>
    %223 = arith.subf %221, %222 : vector<16x32xf32>
    %224 = arith.select %218, %216, %223 : vector<16x32xi1>, vector<16x32xf32>
    %225 = vector.shape_cast %224 : vector<16x32xf32> to vector<1x16x32xf32>
    %226 = vector.broadcast %225 : vector<1x16x32xf32> to vector<4x16x32xf32>
    %227 = arith.mulf %210, %226 : vector<4x16x32xf32>
    %cst_416 = arith.constant dense<0.000000e+00> : vector<4x16xf32>
    %228 = vector.multi_reduction <add>, %227, %cst_416 [2] : vector<4x16x32xf32> to vector<4x16xf32>
    %cst_417 = arith.constant dense<0.000000e+00> : vector<4xf32>
    %229 = vector.multi_reduction <add>, %228, %cst_417 [1] : vector<4x16xf32> to vector<4xf32>
    %230 = vector.shape_cast %229 : vector<4xf32> to vector<4x1xf32>
    %231 = arith.addf %230, %211 : vector<4x1xf32>
    %c0_418 = arith.constant 0 : index
    %c0_419 = arith.constant 0 : index
    %c0_420 = arith.constant 0 : index
    %232 = vector.load %arg9[%c0_418, %c0_419, %c0_420] : memref<1x4x2xf32, #tpu.memory_space<vmem>>, vector<1x4x1xf32>
    %233 = vector.shape_cast %232 : vector<1x4x1xf32> to vector<4x1xf32>
    %234 = vector.shape_cast %231 : vector<4x1xf32> to vector<1x4x1xf32>
    tpu.vector_store %arg9[%c0_418, %c0_419, %c0_420], %234 {strides = array<i32>} : memref<1x4x2xf32, #tpu.memory_space<vmem>>, vector<1x4x1xf32>,
    %c1_421 = arith.constant 1 : index
    %c0_422 = arith.constant 0 : index
    %c0_423 = arith.constant 0 : index
    %235 = vector.load %arg13[%c1_421, %c0_422, %c0_423] : memref<2x256x32xbf16, #tpu.memory_space<vmem>>, vector<1x256x32xbf16>
    %236 = vector.shape_cast %235 : vector<1x256x32xbf16> to vector<256x32xbf16>
    %cst_424 = arith.constant dense<0.000000e+00> : vector<16x32xf32>
    %237 = tpu.matmul %208, %236, %cst_424 {dimension_numbers = #tpu.dot_dimension_numbers<[1], [0], [0], [1], [0, 0, 1, 1], [], []>} : vector<16x256xbf16>, vector<256x32xbf16>, vector<16x32xf32> -> vector<16x32xf32>
    %238 = vector.broadcast %209 : vector<16x1xf32> to vector<16x32xf32>
    %239 = arith.addf %237, %238 : vector<16x32xf32>
    %cst_425 = arith.constant 0.000000e+00 : f32
    %240 = vector.broadcast %cst_425 : f32 to vector<16x32xf32>
    %241 = arith.cmpf ogt, %239, %240 : vector<16x32xf32>
    %cst_426 = arith.constant 0.000000e+00 : f32
    %242 = vector.broadcast %cst_426 : f32 to vector<16x32xf32>
    %243 = arith.minimumf %239, %242 : vector<16x32xf32>
    %244 = math.exp %243 : vector<16x32xf32>
    %cst_427 = arith.constant 1.000000e+00 : f32
    %245 = vector.broadcast %cst_427 : f32 to vector<16x32xf32>
    %246 = arith.subf %244, %245 : vector<16x32xf32>
    %247 = arith.select %241, %239, %246 : vector<16x32xi1>, vector<16x32xf32>
    %248 = vector.shape_cast %247 : vector<16x32xf32> to vector<1x16x32xf32>
    %249 = vector.broadcast %248 : vector<1x16x32xf32> to vector<4x16x32xf32>
    %250 = arith.mulf %210, %249 : vector<4x16x32xf32>
    %cst_428 = arith.constant dense<0.000000e+00> : vector<4x16xf32>
    %251 = vector.multi_reduction <add>, %250, %cst_428 [2] : vector<4x16x32xf32> to vector<4x16xf32>
    %cst_429 = arith.constant dense<0.000000e+00> : vector<4xf32>
    %252 = vector.multi_reduction <add>, %251, %cst_429 [1] : vector<4x16xf32> to vector<4xf32>
    %253 = vector.shape_cast %252 : vector<4xf32> to vector<4x1xf32>
    %254 = arith.addf %253, %211 : vector<4x1xf32>
    %c0_430 = arith.constant 0 : index
    %c0_431 = arith.constant 0 : index
    %c1_432 = arith.constant 1 : index
    %255 = vector.load %arg9[%c0_430, %c0_431, %c1_432] : memref<1x4x2xf32, #tpu.memory_space<vmem>>, vector<1x4x1xf32>
    %256 = vector.shape_cast %255 : vector<1x4x1xf32> to vector<4x1xf32>
    %257 = vector.shape_cast %254 : vector<4x1xf32> to vector<1x4x1xf32>
    tpu.vector_store %arg9[%c0_430, %c0_431, %c1_432], %257 {strides = array<i32>} : memref<1x4x2xf32, #tpu.memory_space<vmem>>, vector<1x4x1xf32>,
    return
  }
  func.func @transform_0(%arg0: i32) -> (i32, i32, i32) {
    %c0_i32 = arith.constant 0 : i32
    %c0_i32_0 = arith.constant 0 : i32
    %c0_i32_1 = arith.constant 0 : i32
    return %arg0, %c0_i32, %c0_i32_0 : i32, i32, i32
  }
  func.func @transform_1(%arg0: i32) -> (i32, i32) {
    %c0_i32 = arith.constant 0 : i32
    %c0_i32_0 = arith.constant 0 : i32
    %c0_i32_1 = arith.constant 0 : i32
    return %c0_i32, %c0_i32_0 : i32, i32
  }
  func.func @transform_2(%arg0: i32) -> (i32, i32) {
    %c0_i32 = arith.constant 0 : i32
    %c0_i32_0 = arith.constant 0 : i32
    %c0_i32_1 = arith.constant 0 : i32
    return %c0_i32, %c0_i32_0 : i32, i32
  }
  func.func @transform_3(%arg0: i32) -> (i32, i32) {
    %c0_i32 = arith.constant 0 : i32
    %c0_i32_0 = arith.constant 0 : i32
    %c0_i32_1 = arith.constant 0 : i32
    return %c0_i32, %c0_i32_0 : i32, i32
  }
  func.func @transform_4(%arg0: i32) -> (i32, i32) {
    %c0_i32 = arith.constant 0 : i32
    %c0_i32_0 = arith.constant 0 : i32
    %c0_i32_1 = arith.constant 0 : i32
    return %c0_i32, %c0_i32_0 : i32, i32
  }
  func.func @transform_5(%arg0: i32) -> (i32, i32) {
    %c0_i32 = arith.constant 0 : i32
    %c0_i32_0 = arith.constant 0 : i32
    %c0_i32_1 = arith.constant 0 : i32
    return %c0_i32, %c0_i32_0 : i32, i32
  }
  func.func @transform_6(%arg0: i32) -> (i32, i32, i32) {
    %c0_i32 = arith.constant 0 : i32
    %c0_i32_0 = arith.constant 0 : i32
    %c0_i32_1 = arith.constant 0 : i32
    %c0_i32_2 = arith.constant 0 : i32
    return %c0_i32, %c0_i32_0, %c0_i32_1 : i32, i32, i32
  }
  func.func @transform_7(%arg0: i32) -> (i32, i32) {
    %c0_i32 = arith.constant 0 : i32
    %c0_i32_0 = arith.constant 0 : i32
    %c0_i32_1 = arith.constant 0 : i32
    return %c0_i32, %c0_i32_0 : i32, i32
  }
  func.func @transform_8(%arg0: i32) -> (i32, i32, i32) {
    %c0_i32 = arith.constant 0 : i32
    %c0_i32_0 = arith.constant 0 : i32
    %c0_i32_1 = arith.constant 0 : i32
    return %arg0, %c0_i32, %c0_i32_0 : i32, i32, i32
  }
}

</mosaic_0001>

<bundles_post_ra>
// kernel: eegnet_forward.1
= control target key start
LH: loop header
LB: loop body
LE: loop exit
PB: predicated region body
PF: predicated region fallthrough
CT: control target
= control target key end

     0   :  { %s3908_s27 = smov 0   ;;  %s4653_s0 = inlined_call_operand.vmem [shape: f32[4,8,128], index: 0, kind: input, shape index: {}]   ;;  %s4654_s1 = inlined_call_operand.vmem [shape: bf16[16,512], index: 1, kind: input, shape index: {}]   ;;  %s4655_s2 = inlined_call_operand.vmem [shape: f32[16,1], index: 2, kind: input, shape index: {}]   ;;  %s4656_s3 = inlined_call_operand.vmem [shape: bf16[128,47], index: 3, kind: input, shape index: {}]   ;;  %s4657_s4 = inlined_call_operand.vmem [shape: bf16[16,256], index: 4, kind: input, shape index: {}]   ;;  %s4658_s5 = inlined_call_operand.vmem [shape: f32[16,1], index: 5, kind: input, shape index: {}]   ;;  %s4659_s6 = inlined_call_operand.vmem [shape: f32[4,16,32], index: 6, kind: input, shape index: {}]   ;;  %s4660_s7 = inlined_call_operand.vmem [shape: f32[4,1], index: 7, kind: input, shape index: {}]   ;;  %s4661_s8 = inlined_call_operand.vmem [shape: f32[2,4,2], index: 8, kind: output, shape index: {}]  }
   0x1 LB: > { %s3914_s28 = sadd.s32 4294967295, %s3795_s27   ;;  %p3132_p0 = scmp.ge.s32.totalorder %s3795_s27, 1  ;;  %s3795_s27 = sphi %s3908_s27, %s18_s27  }
   0x2   : > { %p263_p1 = scmp.lt.s32.totalorder %s3795_s27, 3 }
   0x4   : > { %p264_p2 = pnand %p3132_p0, %p263_p1 }
   0x5   : > { %s3133_s29 = sshll.u32 (!%p264_p2), %s3914_s28, 1  ;;  %s3798_s12 = smov (!%p264_p2), 31  }
   0x6   : > { %267 = sbr.rel (%p264_p2) target bundleno = 1723 (0x6bb), region = 52  ;;  %p297_p3 = scmp.lt.s32.totalorder (!%p264_p2), %s3133_s29, 3 }
   0x7   : > { %s3799_s13 = smov (!%p264_p2), 81   ;;  %s3800_s14 = smov (!%p264_p2), 82  }
   0x8   : > { %s3801_s15 = smov (!%p264_p2), 113   ;;  %s4665_s16 = smov (!%p264_p2), 65  }
   0x9   : > { %s3803_s17 = smov (!%p264_p2), 114   ;;  %s4663_s18 = smov (!%p264_p2), 66  }
   0xa   : > { %s3805_s19 = smov (!%p264_p2), 84   ;;  %s3806_s20 = smov (!%p264_p2), 98  }
   0xb   : > { %vm307_vm0 = vcmask 248832   ;;  %vm310_vm1 = vcmask 511224   ;;  %v3797_v0 = vmov 0   ;;  %s4874_s29 = smov (!%p297_p3, %s3133_s29), 3  ;;  %vm330_vm2 = vcmask 1043704   ;;  %s3807_s21 = smov 97  }
   0xc   : > { %308 = vst.msk [vmem:[#allocation2] sm:$0xf] %vm307_vm0, %v3797_v0  ;;  %3770 = vset.pattern.permute.xlu1 %v3797_v0  ;;  %3771 = vset.pattern.permute.xlu2 %v3797_v0  ;;  %s3134_s30 = sshll.u32 %s4874_s29, 3  ;;  %vm331_vm3 = vcmask 252932   ;;  %vm325_vm4 = vcmask 252928   ;;  %s3808_s22 = smov 83  }
   0xd   : > { %311 = vst.msk [vmem:[#allocation2 + $0x4] sm:$0xf] %vm310_vm1, %v3797_v0  ;;  %3772 = vset.pattern.permute.xlu0 %v3797_v0  ;;  %s3922_s11 = scalar_lea.vmem %s4653_s0, %s3134_s30  ;;  %vm3926_vm5 = vmor %vm331_vm3, %vm330_vm2  ;;  %s3809_s23 = smov 115   ;;  %vm587_vm6 = vcmask 924672   ;;  %vm4712_vm7 = vcmask 539648   ;;  %vm859_vm8 = vcmask 793600  }
   0xe   : > { %309 = vst.msk [vmem:[#allocation2 + $0x8] sm:$0xf] %vm307_vm0, %v3797_v0  ;;  %v313_v1 = vld [vmem:[%s3922_s11] sm:$0xff]  ;;  %s3810_s24 = smov 116   ;;  %s4662_s25 = smov 68   ;;  %vm1131_vm9 = vcmask 662528  }
   0xf   : > { %312 = vst.msk [vmem:[#allocation2 + $0xc] sm:$0xf] %vm310_vm1, %v3797_v0  ;;  %v315_v2 = vpack.c.bf16 %v313_v1, %v313_v1  ;;  %s3812_s26 = smov 100   ;;  %s4664_s29 = smov 67   ;;  %vm1114_vm10 = vcmask 670720   ;;  %vm4720_vm11 = vcmask 949248  }
  0x10   : > { %s3814_s30 = smov 99   ;;  %s4666_s9 = smov 85   ;;  %vm4713_vm12 = vcmask 531456   ;;  %vm570_vm13 = vcmask 932864   ;;  %vm4707_vm14 = vcmask 547840   ;;  %vm4729_vm15 = vcmask 687104  }
  0x11   : > { %319 = vrot.lane.b32.xlu0 %v315_v2, %s3798_s12  ;;  %s4667_s10 = smov 86   ;;  %vm842_vm0 = vcmask 801792   ;;  %vm4719_vm1 = vcmask 703488   ;;  %vm1097_vm2 = vcmask 678912   ;;  %vm4725_vm3 = vcmask 941056   ;;  %p302_p4 = scmp.lt.s32.totalorder %s3914_s28, 1 }
  0x12   : > { %v3146_v4 = vld [vmem:[%s4654_s1 + $0x8] sm:$0xf] }
  0x13   : > { %s4876_s28 = smov (!%p302_p4, %s3914_s28), 1 }
  0x83   : > { %v320_v3 = vpop.permute.xlu0 %319 }
  0x84   : > { %v323_v5 = vrot.slane %v320_v3, 4 }
  0x86   : > { %v326_v6 = vsel %vm325_vm4, %v323_v5, %v320_v3 }
  0x87   : > { %333 = vst.msk [vmem:[#allocation2] sm:$0xff] %vm3926_vm5, %v326_v6 }
  0x8e   : > { %v3933_v7 = vld [vmem:[#allocation2] sm:$0xff] }
  0x8f   : > { %v335_v8 = vld [vmem:[#allocation2] sm:$0xf]  ;;  %1125 = vrot.lane.b32.xlu1 %v3933_v7, %s3799_s13  ;;  %1108 = vrot.lane.b32.xlu0 %v3933_v7, %s3800_s14 }
  0x90   : > { %337 = vst [vmem:[#allocation3] sm:$0xf] %v335_v8  ;;  %581 = vrot.lane.b32.xlu2 %v3933_v7, %s3801_s15 }
  0x97   : > { %1397 = vrot.lane.b32.xlu0 %v3933_v7, %s4665_s16  ;;  %564 = vrot.lane.b32.xlu1 %v3933_v7, %s3803_s17  ;;  %s4673_s16 = smov 101  }
  0x98   : > { %1380 = vrot.lane.b32.xlu2 %v3933_v7, %s4663_s18  ;;  %s4669_s18 = smov 118  }
  0x9f   : > { %1074 = vrot.lane.b32.xlu0 %v3933_v7, %s3805_s19  ;;  %836 = vrot.lane.b32.xlu1 %v3933_v7, %s3806_s20 }
  0xa0   : > { %853 = vrot.lane.b32.xlu2 %v3933_v7, %s3807_s21 }
  0xa7   : > { %1091 = vrot.lane.b32.xlu1 %v3933_v7, %s3808_s22  ;;  %547 = vrot.lane.b32.xlu0 %v3933_v7, %s3809_s23 }
  0xa8   : > { %530 = vrot.lane.b32.xlu2 %v3933_v7, %s3810_s24 }
  0xaf   : > { %1346 = vrot.lane.b32.xlu1 %v3933_v7, %s4662_s25  ;;  %802 = vrot.lane.b32.xlu0 %v3933_v7, %s3812_s26  ;;  %s4668_s25 = smov 70  }
  0xb0   : > { %1363 = vrot.lane.b32.xlu2 %v3933_v7, %s4664_s29  ;;  %s4671_s29 = smov 117  }
  0xb7   : > { %819 = vrot.lane.b32.xlu1 %v3933_v7, %s3814_s30  ;;  %1057 = vrot.lane.b32.xlu0 %v3933_v7, %s4666_s9  ;;  %s4674_s9 = smov 69  }
  0xb8   : > { %1040 = vrot.lane.b32.xlu2 %v3933_v7, %s4667_s10  ;;  %s4675_s10 = smov 102  }
  0xbf   : > { %1312 = vrot.lane.b32.xlu0 %v3933_v7, %s4668_s25  ;;  %496 = vrot.lane.b32.xlu1 %v3933_v7, %s4669_s18  ;;  %s4676_s25 = smov 88   ;;  %s4677_s18 = smov 120  }
  0xc0   : > { %513 = vrot.lane.b32.xlu2 %v3933_v7, %s4671_s29  ;;  %s4679_s29 = smov 87  }
  0xc7   : > { %785 = vrot.lane.b32.xlu0 %v3933_v7, %s4673_s16  ;;  %1329 = vrot.lane.b32.xlu1 %v3933_v7, %s4674_s9  ;;  %s4680_s16 = smov 119   ;;  %s4682_s9 = smov 71  }
  0xc8   : > { %768 = vrot.lane.b32.xlu2 %v3933_v7, %s4675_s10  ;;  %s4683_s10 = smov 72  }
  0xcf   : > { %1006 = vrot.lane.b32.xlu1 %v3933_v7, %s4676_s25  ;;  %462 = vrot.lane.b32.xlu0 %v3933_v7, %s4677_s18  ;;  %s3829_s25 = smov 104   ;;  %s4684_s18 = smov 90  }
  0xd0   : > { %1023 = vrot.lane.b32.xlu2 %v3933_v7, %s4679_s29  ;;  %s4685_s29 = smov 103  }
  0xd7   : > { %479 = vrot.lane.b32.xlu1 %v3933_v7, %s4680_s16  ;;  %1295 = vrot.lane.b32.xlu0 %v3933_v7, %s4682_s9  ;;  %s4686_s16 = smov 89   ;;  %s4689_s9 = smov 121  }
  0xd8   : > { %1278 = vrot.lane.b32.xlu2 %v3933_v7, %s4683_s10  ;;  %s4687_s10 = smov 122  }
  0xdf   : > { %734 = vrot.lane.b32.xlu1 %v3933_v7, %s3829_s25  ;;  %972 = vrot.lane.b32.xlu0 %v3933_v7, %s4684_s18  ;;  %s4691_s18 = smov 74  }
  0xe0   : > { %751 = vrot.lane.b32.xlu2 %v3933_v7, %s4685_s29  ;;  %s4693_s29 = smov 106  }
  0xe7   : > { %989 = vrot.lane.b32.xlu1 %v3933_v7, %s4686_s16  ;;  %445 = vrot.lane.b32.xlu0 %v3933_v7, %s4689_s9  ;;  %s4692_s16 = smov 73   ;;  %s4770_s9 = smov 91  }
  0xe8   : > { %428 = vrot.lane.b32.xlu2 %v3933_v7, %s4687_s10  ;;  %s4694_s10 = smov 105  }
  0xea   : > { %v582_v9 = vpop.permute.xlu2 %581 }
  0xeb   : > { %v585_v10 = vrot.slane %v582_v9, 4 }
  0xed   : > { %v588_v11 = vsel %vm587_vm6, %v582_v9, %v585_v10 }
  0xee   : > { %592 = vst [vmem:[#allocation3 + $0x3c] sm:$0xf] %v588_v11 }
  0xef   : > { %1244 = vrot.lane.b32.xlu1 %v3933_v7, %s4691_s18  ;;  %700 = vrot.lane.b32.xlu0 %v3933_v7, %s4693_s29  ;;  %s4702_s18 = smov 92   ;;  %s4698_s29 = smov 124  }
  0xf0   : > { %1261 = vrot.lane.b32.xlu2 %v3933_v7, %s4692_s16  ;;  %s4695_s16 = smov 76  }
  0xf2   : > { %v1381_v12 = vpop.permute.xlu2 %1380 }
  0xf3   : > { %v1384_v13 = vrot.slane %v1381_v12, 4 }
  0xf5   : > { %v1387_v14 = vsel %vm4712_vm7, %v1381_v12, %v1384_v13  ;;  %vm4718_vm7 = vcmask 556032  }
  0xf6   : > { %1391 = vst [vmem:[#allocation3 + $0xf8] sm:$0xf] %v1387_v14 }
  0xf7   : > { %717 = vrot.lane.b32.xlu1 %v3933_v7, %s4694_s10  ;;  %955 = vrot.lane.b32.xlu0 %v3933_v7, %s4770_s9  ;;  %s4696_s10 = smov 123   ;;  %s4786_s9 = smov 68  }
  0xf8   : > { %938 = vrot.lane.b32.xlu2 %v3933_v7, %s4702_s18  ;;  %s4703_s18 = smov 126  }
  0xfa   : > { %v854_v15 = vpop.permute.xlu2 %853 }
  0xfb   : > { %v857_v16 = vrot.slane %v854_v15, 4 }
  0xfd   : > { %v860_v17 = vsel %vm859_vm8, %v854_v15, %v857_v16 }
  0xfe   : > { %864 = vst [vmem:[#allocation3 + $0x7c] sm:$0xf] %v860_v17  ;;  %v314_v17 = vld [vmem:[%s3922_s11 + $0x8] sm:$0xff]  ;;  %s4799_s11 = smov 92  }
  0xff   : > { %1210 = vrot.lane.b32.xlu0 %v3933_v7, %s4695_s16  ;;  %394 = vrot.lane.b32.xlu1 %v3933_v7, %s4698_s29  ;;  %s4701_s16 = smov 107   ;;  %s4771_s29 = smov 108  }
 0x100   : > { %411 = vrot.lane.b32.xlu2 %v3933_v7, %s4696_s10  ;;  %s4700_s10 = smov 75  }
 0x101   : > { %v1126_v18 = vpop.permute.xlu1 %1125  ;;  %v1109_v19 = vpop.permute.xlu0 %1108 }
 0x102   : > { %v1129_v20 = vrot.slane %v1126_v18, 4  ;;  %v1112_v21 = vrot.slane %v1109_v19, 4  ;;  %v531_v22 = vpop.permute.xlu2 %530 }
 0x103   : > { %v534_v23 = vrot.slane %v531_v22, 4 }
 0x104   : > { %v1132_v24 = vsel %vm1131_vm9, %v1126_v18, %v1129_v20  ;;  %v1115_v25 = vsel %vm1114_vm10, %v1109_v19, %v1112_v21 }
 0x105   : > { %1136 = vst [vmem:[#allocation3 + $0xbc] sm:$0xf] %v1132_v24  ;;  %v537_v26 = vsel %vm4720_vm11, %v531_v22, %v534_v23  ;;  %vm4727_vm11 = vcmask 711680   ;;  %v316_v24 = vpack.c.bf16 %v314_v17, %v314_v17 }
 0x106   : > { %1119 = vst [vmem:[#allocation3 + $0xb8] sm:$0xf] %v1115_v25 }
 0x107   : > { %541 = vst [vmem:[#allocation3 + $0x30] sm:$0xf] %v537_v26  ;;  %683 = vrot.lane.b32.xlu0 %v3933_v7, %s4701_s16  ;;  %1227 = vrot.lane.b32.xlu1 %v3933_v7, %s4700_s10  ;;  %s4705_s10 = smov 94   ;;  %s4706_s16 = smov 93  }
 0x108   : > { %666 = vrot.lane.b32.xlu2 %v3933_v7, %s4771_s29  ;;  %s4796_s29 = smov 121  }
 0x109   : > { %v1398_v27 = vpop.permute.xlu0 %1397  ;;  %v565_v28 = vpop.permute.xlu1 %564 }
 0x10a   : > { %v1401_v29 = vrot.slane %v1398_v27, 4  ;;  %v568_v30 = vrot.slane %v565_v28, 4  ;;  %v1364_v31 = vpop.permute.xlu2 %1363 }
 0x10b   : > { %v1367_v32 = vrot.slane %v1364_v31, 4 }
 0x10c   : > { %v1404_v33 = vsel %vm4713_vm12, %v1398_v27, %v1401_v29  ;;  %v571_v34 = vsel %vm570_vm13, %v565_v28, %v568_v30  ;;  %vm808_vm12 = vcmask 818176  }
 0x10d   : > { %1408 = vst [vmem:[#allocation3 + $0xfc] sm:$0xf] %v1404_v33  ;;  %v1370_v35 = vsel %vm4707_vm14, %v1364_v31, %v1367_v32  ;;  %v3621_v36 = vld [vmem:[#allocation3 + $0xb8] sm:$0xff]  ;;  %vm4714_vm14 = vcmask 957440  }
 0x10e   : > { %575 = vst [vmem:[#allocation3 + $0x38] sm:$0xf] %v571_v34  ;;  %1746 = vmatpush.bf16.msra.mxu2 %v3621_v36 }
 0x10f   : > { %1374 = vst [vmem:[#allocation3 + $0xf4] sm:$0xf] %v1370_v35  ;;  %904 = vrot.lane.b32.xlu1 %v3933_v7, %s4705_s10  ;;  %360 = vrot.lane.b32.xlu0 %v3933_v7, %s4703_s18  ;;  %s4710_s18 = smov 125   ;;  %s4708_s10 = smov 78  }
 0x110   : > { %921 = vrot.lane.b32.xlu2 %v3933_v7, %s4706_s16  ;;  %s4709_s16 = smov 77  }
 0x111   : > { %v1075_v37 = vpop.permute.xlu0 %1074  ;;  %v837_v38 = vpop.permute.xlu1 %836 }
 0x112   : > { %v1078_v39 = vrot.slane %v1075_v37, 4  ;;  %v840_v40 = vrot.slane %v837_v38, 4  ;;  %v1041_v41 = vpop.permute.xlu2 %1040 }
 0x113   : > { %v1044_v42 = vrot.slane %v1041_v41, 4 }
 0x114   : > { %v1081_v43 = vsel %vm4729_vm15, %v1075_v37, %v1078_v39  ;;  %v843_v44 = vsel %vm842_vm0, %v837_v38, %v840_v40  ;;  %v3629_v45 = vld [vmem:[#allocation3 + $0xf8] sm:$0xff]  ;;  %vm4734_vm15 = vcmask 564224  }
 0x115   : > { %1085 = vst [vmem:[#allocation3 + $0xb0] sm:$0xf] %v1081_v43  ;;  %v1047_v46 = vsel %vm4719_vm1, %v1041_v41, %v1044_v42  ;;  %v3605_v47 = vld [vmem:[#allocation3 + $0x38] sm:$0xff]  ;;  %1760 = vmatpush.bf16.msra.mxu3 %v3629_v45  ;;  %vm4726_vm1 = vcmask 695296  }
 0x116   : > { %847 = vst [vmem:[#allocation3 + $0x78] sm:$0xf] %v843_v44  ;;  %1718 = vmatpush.bf16.msra.mxu0 %v3605_v47 }
 0x117   : > { %1051 = vst [vmem:[#allocation3 + $0xa8] sm:$0xf] %v1047_v46  ;;  %377 = vrot.lane.b32.xlu1 %v3933_v7, %s4710_s18  ;;  %1193 = vrot.lane.b32.xlu0 %v3933_v7, %s4709_s16  ;;  %s4717_s16 = smov 109   ;;  %s4715_s18 = smov 96  }
 0x118   : > { %1176 = vrot.lane.b32.xlu2 %v3933_v7, %s4708_s10  ;;  %s4716_s10 = smov 110  }
 0x119   : > { %v1092_v48 = vpop.permute.xlu1 %1091  ;;  %v548_v49 = vpop.permute.xlu0 %547 }
 0x11a   : > { %v1095_v50 = vrot.slane %v1092_v48, 4  ;;  %v551_v51 = vrot.slane %v548_v49, 4  ;;  %v514_v52 = vpop.permute.xlu2 %513 }
 0x11b   : > { %v517_v53 = vrot.slane %v514_v52, 4 }
 0x11c   : > { %v1098_v54 = vsel %vm1097_vm2, %v1092_v48, %v1095_v50  ;;  %v554_v55 = vsel %vm4725_vm3, %v548_v49, %v551_v51  ;;  %vm4732_vm3 = vcmask 572416  }
 0x11d   : > { %1102 = vst [vmem:[#allocation3 + $0xb4] sm:$0xf] %v1098_v54  ;;  %v520_v56 = vsel %vm4714_vm14, %v514_v52, %v517_v53  ;;  %v3613_v57 = vld [vmem:[#allocation3 + $0x78] sm:$0xff]  ;;  %vm4730_vm14 = vcmask 834560  }
 0x11e   : > { %558 = vst [vmem:[#allocation3 + $0x34] sm:$0xf] %v554_v55  ;;  %1732 = vmatpush.bf16.msra.mxu1 %v3613_v57 }
 0x11f   : > { %524 = vst [vmem:[#allocation3 + $0x2c] sm:$0xf] %v520_v56  ;;  %632 = vrot.lane.b32.xlu1 %v3933_v7, %s4716_s10  ;;  %870 = vrot.lane.b32.xlu0 %v3933_v7, %s4715_s18  ;;  %s4724_s18 = smov 95   ;;  %s4721_s10 = smov 80  }
 0x120   : > { %649 = vrot.lane.b32.xlu2 %v3933_v7, %s4717_s16  ;;  %s4722_s16 = smov 127  }
 0x121   : > { %v1347_v58 = vpop.permute.xlu1 %1346  ;;  %v803_v59 = vpop.permute.xlu0 %802 }
 0x122   : > { %v1350_v60 = vrot.slane %v1347_v58, 4  ;;  %v806_v61 = vrot.slane %v803_v59, 4  ;;  %v769_v62 = vpop.permute.xlu2 %768 }
 0x123   : > { %v772_v63 = vrot.slane %v769_v62, 4 }
 0x124   : > { %v1353_v0 = vsel %vm4718_vm7, %v1347_v58, %v1350_v60  ;;  %v809_v1 = vsel %vm808_vm12, %v803_v59, %v806_v61  ;;  %v3620_v2 = vld [vmem:[#allocation3 + $0xb0] sm:$0xff]  ;;  %vm4728_vm7 = vcmask 809984  }
 0x125   : > { %1357 = vst [vmem:[#allocation3 + $0xf0] sm:$0xf] %v1353_v0  ;;  %v775_v3 = vsel %vm4730_vm14, %v769_v62, %v772_v63  ;;  %v3604_v5 = vld [vmem:[#allocation3 + $0x30] sm:$0xff]  ;;  %1747 = vmatpush.bf16.msra.mxu2 %v3620_v2  ;;  %vm4735_vm14 = vcmask 842752  }
 0x126   : > { %813 = vst [vmem:[#allocation3 + $0x70] sm:$0xf] %v809_v1  ;;  %1719 = vmatpush.bf16.msra.mxu0 %v3604_v5 }
 0x127   : > { %779 = vst [vmem:[#allocation3 + $0x68] sm:$0xf] %v775_v3  ;;  %887 = vrot.lane.b32.xlu1 %v3933_v7, %s4724_s18  ;;  %1142 = vrot.lane.b32.xlu0 %v3933_v7, %s4721_s10  ;;  %s4767_s10 = smov 79   ;;  %s4768_s18 = smov 112  }
 0x128   : > { %343 = vrot.lane.b32.xlu2 %v3933_v7, %s4722_s16  ;;  %s4769_s16 = smov 111  }
 0x129   : > { %v820_v6 = vpop.permute.xlu1 %819  ;;  %v1058_v8 = vpop.permute.xlu0 %1057 }
 0x12a   : > { %v823_v9 = vrot.slane %v820_v6, 4  ;;  %v1061_v10 = vrot.slane %v1058_v8, 4  ;;  %v1024_v11 = vpop.permute.xlu2 %1023 }
 0x12b   : > { %v1027_v12 = vrot.slane %v1024_v11, 4 }
 0x12c   : > { %v826_v13 = vsel %vm4728_vm7, %v820_v6, %v823_v9  ;;  %v1064_v14 = vsel %vm4726_vm1, %v1058_v8, %v1061_v10  ;;  %v3628_v15 = vld [vmem:[#allocation3 + $0xf0] sm:$0xff]  ;;  %vm4733_vm1 = vcmask 965632   ;;  %vm4736_vm7 = vcmask 826368  }
 0x12d   : > { %830 = vst [vmem:[#allocation3 + $0x74] sm:$0xf] %v826_v13  ;;  %v1030_v16 = vsel %vm4727_vm11, %v1024_v11, %v1027_v12  ;;  %1761 = vmatpush.bf16.msra.mxu3 %v3628_v15  ;;  %vm4731_vm11 = vcmask 588800  }
 0x12e   : > { %1068 = vst [vmem:[#allocation3 + $0xac] sm:$0xf] %v1064_v14 }
 0x12f   : > { %1034 = vst [vmem:[#allocation3 + $0xa4] sm:$0xf] %v1030_v16  ;;  %1159 = vrot.lane.b32.xlu1 %v3933_v7, %s4767_s10  ;;  %615 = vrot.lane.b32.xlu0 %v3933_v7, %s4769_s16  ;;  %s4784_s10 = smov 103   ;;  %s4795_s16 = smov 108  }
 0x130   : > { %598 = vrot.lane.b32.xlu2 %v3933_v7, %s4768_s18  ;;  %s4783_s18 = smov 88  }
 0x131   : > { %v1313_v18 = vpop.permute.xlu0 %1312  ;;  %v497_v19 = vpop.permute.xlu1 %496 }
 0x132   : > { %v1316_v20 = vrot.slane %v1313_v18, 4  ;;  %v1279_v21 = vpop.permute.xlu2 %1278  ;;  %v500_v22 = vrot.slane %v497_v19, 4 }
 0x133   : > { %v1282_v23 = vrot.slane %v1279_v21, 4 }
 0x134   : > { %v1319_v25 = vsel %vm4732_vm3, %v1313_v18, %v1316_v20  ;;  %v503_v26 = vsel %vm4733_vm1, %v497_v19, %v500_v22  ;;  %v3612_v27 = vld [vmem:[#allocation3 + $0x70] sm:$0xff]  ;;  %vm4738_vm3 = vcmask 982016   ;;  %vm4737_vm1 = vcmask 998400  }
 0x135   : > { %1323 = vst [vmem:[#allocation3 + $0xe8] sm:$0xf] %v1319_v25  ;;  %v1285_v28 = vsel %vm4731_vm11, %v1279_v21, %v1282_v23  ;;  %v3619_v29 = vld [vmem:[#allocation3 + $0xa8] sm:$0xff]  ;;  %1733 = vmatpush.bf16.msra.mxu1 %v3612_v27  ;;  %vm4739_vm11 = vcmask 719872  }
 0x136   : > { %1289 = vst [vmem:[#allocation3 + $0xe0] sm:$0xf] %v1285_v28  ;;  %1748 = vmatpush.bf16.msra.mxu2 %v3619_v29 }
 0x137   : > { %507 = vst [vmem:[#allocation3 + $0x28] sm:$0xf] %v503_v26  ;;  %321 = vrot.lane.b32.xlu1 %v316_v24, %s3798_s12  ;;  %s4775_s12 = smov 101  }
 0x139   : > { %v786_v7 = vpop.permute.xlu0 %785  ;;  %v1330_v30 = vpop.permute.xlu1 %1329 }
 0x13a   : > { %v789_v31 = vrot.slane %v786_v7, 4  ;;  %v752_v32 = vpop.permute.xlu2 %751  ;;  %v1333_v33 = vrot.slane %v1330_v30, 4 }
 0x13b   : > { %v755_v34 = vrot.slane %v752_v32, 4 }
 0x13c   : > { %v792_v35 = vsel %vm4736_vm7, %v786_v7, %v789_v31  ;;  %v1336_v36 = vsel %vm4734_vm15, %v1330_v30, %v1333_v33  ;;  %vm4742_vm15 = vcmask 973824   ;;  %vm4740_vm7 = vcmask 596992  }
 0x13d   : > { %796 = vst [vmem:[#allocation3 + $0x6c] sm:$0xf] %v792_v35  ;;  %v758_v37 = vsel %vm4735_vm14, %v752_v32, %v755_v34  ;;  %vm4741_vm14 = vcmask 580608  }
 0x13e   : > { %762 = vst [vmem:[#allocation3 + $0x64] sm:$0xf] %v758_v37  ;;  %v3603_v38 = vld [vmem:[#allocation3 + $0x28] sm:$0xff] }
 0x13f   : > { %1340 = vst [vmem:[#allocation3 + $0xec] sm:$0xf] %v1336_v36  ;;  %1720 = vmatpush.bf16.msra.mxu0 %v3603_v38 }
 0x141   : > { %v1007_v39 = vpop.permute.xlu1 %1006  ;;  %v463_v40 = vpop.permute.xlu0 %462 }
 0x142   : > { %v1010_v41 = vrot.slane %v1007_v39, 4  ;;  %v466_v42 = vrot.slane %v463_v40, 4  ;;  %v429_v43 = vpop.permute.xlu2 %428 }
 0x143   : > { %v432_v44 = vrot.slane %v429_v43, 4 }
 0x144   : > { %v1013_v45 = vsel %vm4739_vm11, %v1007_v39, %v1010_v41  ;;  %v469_v46 = vsel %vm4738_vm3, %v463_v40, %v466_v42  ;;  %v3611_v47 = vld [vmem:[#allocation3 + $0x68] sm:$0xff]  ;;  %vm4744_vm3 = vcmask 736256   ;;  %vm4743_vm11 = vcmask 752640  }
 0x145   : > { %1017 = vst [vmem:[#allocation3 + $0xa0] sm:$0xf] %v1013_v45  ;;  %v435_v48 = vsel %vm4737_vm1, %v429_v43, %v432_v44  ;;  %1734 = vmatpush.bf16.msra.mxu1 %v3611_v47  ;;  %vm4745_vm1 = vcmask 850944  }
 0x146   : > { %473 = vst [vmem:[#allocation3 + $0x20] sm:$0xf] %v469_v46  ;;  %v3627_v49 = vld [vmem:[#allocation3 + $0xe8] sm:$0xff] }
 0x147   : > { %439 = vst [vmem:[#allocation3 + $0x18] sm:$0xf] %v435_v48  ;;  %1762 = vmatpush.bf16.msra.mxu3 %v3627_v49 }
 0x149   : > { %v480_v50 = vpop.permute.xlu1 %479  ;;  %v1296_v51 = vpop.permute.xlu0 %1295 }
 0x14a   : > { %v483_v52 = vrot.slane %v480_v50, 4  ;;  %v1299_v53 = vrot.slane %v1296_v51, 4  ;;  %v1262_v54 = vpop.permute.xlu2 %1261 }
 0x14b   : > { %v1265_v55 = vrot.slane %v1262_v54, 4 }
 0x14c   : > { %v486_v56 = vsel %vm4742_vm15, %v480_v50, %v483_v52  ;;  %v1302_v57 = vsel %vm4741_vm14, %v1296_v51, %v1299_v53  ;;  %v3618_v58 = vld [vmem:[#allocation3 + $0xa0] sm:$0xff]  ;;  %vm4747_vm14 = vcmask 990208   ;;  %vm4746_vm15 = vcmask 1006592  }
 0x14d   : > { %490 = vst [vmem:[#allocation3 + $0x24] sm:$0xf] %v486_v56  ;;  %v1268_v59 = vsel %vm4740_vm7, %v1262_v54, %v1265_v55  ;;  %1749 = vmatpush.bf16.msra.mxu2 %v3618_v58  ;;  %vm4748_vm7 = vcmask 728064  }
 0x14e   : > { %1306 = vst [vmem:[#allocation3 + $0xe4] sm:$0xf] %v1302_v57 }
 0x14f   : > { %1272 = vst [vmem:[#allocation3 + $0xdc] sm:$0xf] %v1268_v59 }
 0x151   : > { %v735_v60 = vpop.permute.xlu1 %734  ;;  %v973_v61 = vpop.permute.xlu0 %972 }
 0x152   : > { %v738_v62 = vrot.slane %v735_v60, 4  ;;  %v976_v63 = vrot.slane %v973_v61, 4  ;;  %v939_v0 = vpop.permute.xlu2 %938 }
 0x153   : > { %v942_v1 = vrot.slane %v939_v0, 4 }
 0x154   : > { %v741_v2 = vsel %vm4745_vm1, %v735_v60, %v738_v62  ;;  %v979_v3 = vsel %vm4744_vm3, %v973_v61, %v976_v63  ;;  %v3602_v5 = vld [vmem:[#allocation3 + $0x20] sm:$0xff]  ;;  %vm4751_vm3 = vcmask 867328   ;;  %vm4750_vm1 = vcmask 883712  }
 0x155   : > { %745 = vst [vmem:[#allocation3 + $0x60] sm:$0xf] %v741_v2  ;;  %v945_v6 = vsel %vm4743_vm11, %v939_v0, %v942_v1  ;;  %v3626_v8 = vld [vmem:[#allocation3 + $0xe0] sm:$0xff]  ;;  %1721 = vmatpush.bf16.msra.mxu0 %v3602_v5  ;;  %vm4749_vm11 = vcmask 605184  }
 0x156   : > { %983 = vst [vmem:[#allocation3 + $0x98] sm:$0xf] %v979_v3  ;;  %1763 = vmatpush.bf16.msra.mxu3 %v3626_v8 }
 0x157   : > { %949 = vst [vmem:[#allocation3 + $0x90] sm:$0xf] %v945_v6 }
 0x159   : > { %v990_v9 = vpop.permute.xlu1 %989  ;;  %v446_v10 = vpop.permute.xlu0 %445 }
 0x15a   : > { %v993_v11 = vrot.slane %v990_v9, 4  ;;  %v449_v12 = vrot.slane %v446_v10, 4  ;;  %v412_v13 = vpop.permute.xlu2 %411 }
 0x15b   : > { %v415_v14 = vrot.slane %v412_v13, 4 }
 0x15c   : > { %v996_v15 = vsel %vm4748_vm7, %v990_v9, %v993_v11  ;;  %v452_v16 = vsel %vm4747_vm14, %v446_v10, %v449_v12  ;;  %v3610_v17 = vld [vmem:[#allocation3 + $0x60] sm:$0xff]  ;;  %vm4753_vm14 = vcmask 744448   ;;  %vm4752_vm7 = vcmask 760832  }
 0x15d   : > { %1000 = vst [vmem:[#allocation3 + $0x9c] sm:$0xf] %v996_v15  ;;  %v418_v18 = vsel %vm4746_vm15, %v412_v13, %v415_v14  ;;  %1735 = vmatpush.bf16.msra.mxu1 %v3610_v17  ;;  %vm4754_vm15 = vcmask 859136  }
 0x15e   : > { %456 = vst [vmem:[#allocation3 + $0x1c] sm:$0xf] %v452_v16 }
 0x15f   : > { %422 = vst [vmem:[#allocation3 + $0x14] sm:$0xf] %v418_v18 }
 0x161   : > { %v1245_v19 = vpop.permute.xlu1 %1244  ;;  %v701_v20 = vpop.permute.xlu0 %700 }
 0x162   : > { %v1248_v21 = vrot.slane %v1245_v19, 4  ;;  %v704_v22 = vrot.slane %v701_v20, 4  ;;  %v667_v23 = vpop.permute.xlu2 %666 }
 0x163   : > { %v670_v24 = vrot.slane %v667_v23, 4 }
 0x164   : > { %v1251_v25 = vsel %vm4749_vm11, %v1245_v19, %v1248_v21  ;;  %v707_v26 = vsel %vm4751_vm3, %v701_v20, %v704_v22  ;;  %v3617_v27 = vld [vmem:[#allocation3 + $0x98] sm:$0xff]  ;;  %vm4756_vm11 = vcmask 621568   ;;  %vm4755_vm3 = vcmask 637952  }
 0x165   : > { %1255 = vst [vmem:[#allocation3 + $0xd8] sm:$0xf] %v1251_v25  ;;  %v673_v28 = vsel %vm4750_vm1, %v667_v23, %v670_v24  ;;  %v3601_v29 = vld [vmem:[#allocation3 + $0x18] sm:$0xff]  ;;  %1750 = vmatpush.bf16.msra.mxu2 %v3617_v27  ;;  %vm4757_vm1 = vcmask 1014784  }
 0x166   : > { %711 = vst [vmem:[#allocation3 + $0x58] sm:$0xf] %v707_v26  ;;  %1722 = vmatpush.bf16.msra.mxu0 %v3601_v29 }
 0x167   : > { %677 = vst [vmem:[#allocation3 + $0x50] sm:$0xf] %v673_v28 }
 0x169   : > { %v718_v7 = vpop.permute.xlu1 %717  ;;  %v956_v30 = vpop.permute.xlu0 %955 }
 0x16a   : > { %v721_v31 = vrot.slane %v718_v7, 4  ;;  %v959_v32 = vrot.slane %v956_v30, 4  ;;  %v922_v33 = vpop.permute.xlu2 %921 }
 0x16b   : > { %v925_v34 = vrot.slane %v922_v33, 4 }
 0x16c   : > { %v724_v35 = vsel %vm4754_vm15, %v718_v7, %v721_v31  ;;  %v962_v36 = vsel %vm4753_vm14, %v956_v30, %v959_v32  ;;  %v3625_v37 = vld [vmem:[#allocation3 + $0xd8] sm:$0xff]  ;;  %vm4758_vm14 = vcmask 613376   ;;  %vm4759_vm15 = vcmask 891904  }
 0x16d   : > { %728 = vst [vmem:[#allocation3 + $0x5c] sm:$0xf] %v724_v35  ;;  %v928_v38 = vsel %vm4752_vm7, %v922_v33, %v925_v34  ;;  %1764 = vmatpush.bf16.msra.mxu3 %v3625_v37  ;;  %vm4760_vm7 = vcmask 875520  }
 0x16e   : > { %966 = vst [vmem:[#allocation3 + $0x94] sm:$0xf] %v962_v36 }
 0x16f   : > { %932 = vst [vmem:[#allocation3 + $0x8c] sm:$0xf] %v928_v38 }
 0x171   : > { %v1211_v39 = vpop.permute.xlu0 %1210  ;;  %v395_v40 = vpop.permute.xlu1 %394 }
 0x172   : > { %v1214_v41 = vrot.slane %v1211_v39, 4  ;;  %v1177_v42 = vpop.permute.xlu2 %1176  ;;  %v398_v43 = vrot.slane %v395_v40, 4 }
 0x173   : > { %v1180_v44 = vrot.slane %v1177_v42, 4 }
 0x174   : > { %v1217_v45 = vsel %vm4756_vm11, %v1211_v39, %v1214_v41  ;;  %v401_v46 = vsel %vm4757_vm1, %v395_v40, %v398_v43  ;;  %v3609_v47 = vld [vmem:[#allocation3 + $0x58] sm:$0xff]  ;;  %vm4762_vm11 = vcmask 1031168   ;;  %vm4761_vm1 = vcmask 1039360  }
 0x175   : > { %1221 = vst [vmem:[#allocation3 + $0xd0] sm:$0xf] %v1217_v45  ;;  %v1183_v48 = vsel %vm4755_vm3, %v1177_v42, %v1180_v44  ;;  %v3616_v49 = vld [vmem:[#allocation3 + $0x90] sm:$0xff]  ;;  %1736 = vmatpush.bf16.msra.mxu1 %v3609_v47  ;;  %vm910_vm3 = vcmask 769024  }
 0x176   : > { %1187 = vst [vmem:[#allocation3 + $0xc8] sm:$0xf] %v1183_v48  ;;  %1751 = vmatpush.bf16.msra.mxu2 %v3616_v49  ;;  %v3589_v48 = vld [vmem:[%s4654_s1 + $0x14] sm:$0xf0] }
 0x177   : > { %405 = vst [vmem:[#allocation3 + $0x10] sm:$0xf] %v401_v46  ;;  %v4143_v49 = vor.u32 %v3589_v48, %v3146_v4 }
 0x179   : > { %v684_v50 = vpop.permute.xlu0 %683  ;;  %v1228_v51 = vpop.permute.xlu1 %1227 }
 0x17a   : > { %v687_v52 = vrot.slane %v684_v50, 4  ;;  %v650_v53 = vpop.permute.xlu2 %649  ;;  %v1231_v54 = vrot.slane %v1228_v51, 4 }
 0x17b   : > { %v653_v55 = vrot.slane %v650_v53, 4 }
 0x17c   : > { %v690_v56 = vsel %vm4760_vm7, %v684_v50, %v687_v52  ;;  %v1234_v57 = vsel %vm4758_vm14, %v1228_v51, %v1231_v54  ;;  %vm4764_vm14 = vcmask 1022976   ;;  %vm4766_vm7 = vcmask 916480   ;;  %v3587_v50 = vld [vmem:[%s4654_s1 + $0xc] sm:$0xf]  ;;  %v3148_v51 = vld [vmem:[%s4654_s1 + $0x18] sm:$0xf0] }
 0x17d   : > { %694 = vst [vmem:[#allocation3 + $0x54] sm:$0xf] %v690_v56  ;;  %v656_v58 = vsel %vm4759_vm15, %v650_v53, %v653_v55  ;;  %vm4763_vm15 = vcmask 629760   ;;  %v3138_v52 = vld [vmem:[%s4654_s1] sm:$0xf]  ;;  %v4159_v53 = vor.u32 %v3587_v50, %v3148_v51 }
 0x17e   : > { %660 = vst [vmem:[#allocation3 + $0x4c] sm:$0xf] %v656_v58  ;;  %v3600_v59 = vld [vmem:[#allocation3 + $0x10] sm:$0xff]  ;;  %v3588_v54 = vld [vmem:[%s4654_s1 + $0xc] sm:$0xf0] }
 0x17f   : > { %1238 = vst [vmem:[#allocation3 + $0xd4] sm:$0xf] %v1234_v57  ;;  %1723 = vmatpush.bf16.msra.mxu0 %v3600_v59  ;;  %v4166_v55 = vor.u32 %v3588_v54, %v3138_v52  ;;  %v3586_v56 = vld [vmem:[%s4654_s1 + $0x4] sm:$0xf]  ;;  %v3140_v57 = vld [vmem:[%s4654_s1 + $0x10] sm:$0xf0] }
 0x180   : > { %v4175_v58 = vor.u32 %v3586_v56, %v3140_v57  ;;  %v1414_v59 = vld [vmem:[%s4655_s2] sm:$0xff] }
 0x181   : > { %v905_v60 = vpop.permute.xlu1 %904  ;;  %v361_v62 = vpop.permute.xlu0 %360 }
 0x182   : > { %v908_v61 = vrot.slane %v905_v60, 4  ;;  %v344_v63 = vpop.permute.xlu2 %343  ;;  %v364_v0 = vrot.slane %v361_v62, 4 }
 0x183   : > { %v347_v1 = vrot.slane %v344_v63, 4 }
 0x184   : > { %v911_v2 = vsel %vm910_vm3, %v905_v60, %v908_v61  ;;  %v3608_v3 = vld [vmem:[#allocation3 + $0x50] sm:$0xff]  ;;  %v367_v5 = vsel %vm4762_vm11, %v361_v62, %v364_v0  ;;  %vm4765_vm11 = vcmask 785408   ;;  %v1415_v60 = vld [vmem:[%s4655_s2 + $0x8] sm:$0xff] }
 0x185   : > { %915 = vst [vmem:[#allocation3 + $0x88] sm:$0xf] %v911_v2  ;;  %v350_v6 = vsel %vm4761_vm1, %v344_v63, %v347_v1  ;;  %1737 = vmatpush.bf16.msra.mxu1 %v3608_v3  ;;  %vm638_vm1 = vcmask 900096   ;;  %v4258_v3 = vld [vmem:[%s4656_s3 + $0x38] sm:$0xff] }
 0x186   : > { %371 = vst [vmem:[#allocation3 + $0x8] sm:$0xf] %v367_v5  ;;  %v3624_v8 = vld [vmem:[#allocation3 + $0xd0] sm:$0xff] }
 0x187   : > { %354 = vst [vmem:[#allocation3 + $0x4] sm:$0xf] %v350_v6  ;;  %1765 = vmatpush.bf16.msra.mxu3 %v3624_v8 }
 0x189   : > { %v378_v9 = vpop.permute.xlu1 %377  ;;  %v1194_v11 = vpop.permute.xlu0 %1193 }
 0x18a   : > { %v381_v10 = vrot.slane %v378_v9, 4  ;;  %v599_v12 = vpop.permute.xlu2 %598  ;;  %v1197_v13 = vrot.slane %v1194_v11, 4 }
 0x18b   : > { %v602_v14 = vrot.slane %v599_v12, 4 }
 0x18c   : > { %v384_v15 = vsel %vm4764_vm14, %v378_v9, %v381_v10  ;;  %v3615_v16 = vld [vmem:[#allocation3 + $0x88] sm:$0xff]  ;;  %v1200_v17 = vsel %vm4763_vm15, %v1194_v11, %v1197_v13  ;;  %vm893_vm15 = vcmask 777216   ;;  %vm1148_vm14 = vcmask 654336   ;;  %v4265_v9 = vld [vmem:[%s4656_s3 + $0x30] sm:$0xff] }
 0x18d   : > { %388 = vst [vmem:[#allocation3 + $0xc] sm:$0xf] %v384_v15  ;;  %v605_v18 = vsel %vm4766_vm7, %v599_v12, %v602_v14  ;;  %1752 = vmatpush.bf16.msra.mxu2 %v3615_v16  ;;  %vm621_vm7 = vcmask 908288   ;;  %v4277_v12 = vld [vmem:[%s4656_s3 + $0x28] sm:$0xff] }
 0x18e   : > { %1204 = vst [vmem:[#allocation3 + $0xcc] sm:$0xf] %v1200_v17  ;;  %v3598_v27 = vld [vmem:[#allocation3] sm:$0xff] }
 0x18f   : > { %609 = vst [vmem:[#allocation3 + $0x40] sm:$0xf] %v605_v18 }
 0x191   : > { %v633_v19 = vpop.permute.xlu1 %632  ;;  %v871_v21 = vpop.permute.xlu0 %870 }
 0x192   : > { %v636_v20 = vrot.slane %v633_v19, 4  ;;  %v874_v22 = vrot.slane %v871_v21, 4 }
 0x194   : > { %v639_v23 = vsel %vm638_vm1, %v633_v19, %v636_v20  ;;  %v3599_v24 = vld [vmem:[#allocation3 + $0x8] sm:$0xff]  ;;  %v877_v25 = vsel %vm4765_vm11, %v871_v21, %v874_v22  ;;  %vm1165_vm11 = vcmask 646144   ;;  %v4286_v20 = vld [vmem:[%s4656_s3 + $0x20] sm:$0xff] }
 0x195   : > { %643 = vst [vmem:[#allocation3 + $0x48] sm:$0xf] %v639_v23  ;;  %v3623_v26 = vld [vmem:[#allocation3 + $0xc8] sm:$0xff]  ;;  %1724 = vmatpush.bf16.msra.mxu0 %v3599_v24 }
 0x196   : > { %881 = vst [vmem:[#allocation3 + $0x80] sm:$0xf] %v877_v25  ;;  %1766 = vmatpush.bf16.msra.mxu3 %v3623_v26  ;;  %v4298_v23 = vld [vmem:[%s4656_s3 + $0x18] sm:$0xff] }
 0x199   : > { %v888_v28 = vpop.permute.xlu1 %887  ;;  %v1143_v7 = vpop.permute.xlu0 %1142  ;;  %1725 = vmatpush.bf16.msra.mxu0 %v3598_v27 }
 0x19a   : > { %v891_v29 = vrot.slane %v888_v28, 4  ;;  %v1146_v30 = vrot.slane %v1143_v7, 4 }
 0x19c   : > { %v894_v31 = vsel %vm893_vm15, %v888_v28, %v891_v29  ;;  %v3607_v32 = vld [vmem:[#allocation3 + $0x48] sm:$0xff]  ;;  %v1149_v33 = vsel %vm1148_vm14, %v1143_v7, %v1146_v30  ;;  %1726 = vmatmul.bf16.vlgmr.msra.gmra.mxu0 %v4166_v55 }
 0x19d   : > { %898 = vst [vmem:[#allocation3 + $0x84] sm:$0xf] %v894_v31  ;;  %1738 = vmatpush.bf16.msra.mxu1 %v3607_v32  ;;  %1835 = vmatpush.bf16.msrb.mxu0 %v4258_v3  ;;  %v4307_v32 = vld [vmem:[%s4656_s3 + $0x10] sm:$0xff] }
 0x19e   : > { %1153 = vst [vmem:[#allocation3 + $0xc0] sm:$0xf] %v1149_v33 }
 0x1a1   : > { %v1160_v34 = vpop.permute.xlu1 %1159  ;;  %v616_v36 = vpop.permute.xlu0 %615  ;;  %1836 = vmatpush.bf16.msrb.mxu0 %v4265_v9 }
 0x1a2   : > { %v1163_v35 = vrot.slane %v1160_v34, 4  ;;  %v619_v37 = vrot.slane %v616_v36, 4 }
 0x1a4   : > { %v1166_v38 = vsel %vm1165_vm11, %v1160_v34, %v1163_v35  ;;  %v3614_v39 = vld [vmem:[#allocation3 + $0x80] sm:$0xff]  ;;  %v622_v40 = vsel %vm621_vm7, %v616_v36, %v619_v37  ;;  %v4319_v35 = vld [vmem:[%s4656_s3 + $0x8] sm:$0xff] }
 0x1a5   : > { %1170 = vst [vmem:[#allocation3 + $0xc4] sm:$0xf] %v1166_v38  ;;  %1753 = vmatpush.bf16.msra.mxu2 %v3614_v39  ;;  %1837 = vmatpush.bf16.msrb.mxu0 %v4277_v12 }
 0x1a6   : > { %626 = vst [vmem:[#allocation3 + $0x44] sm:$0xf] %v622_v40 }
 0x1a8   : > { %1754 = vmatmul.bf16.vlgmr.msra.gmra.mxu2 %v4143_v49 }
 0x1a9   : > { %v322_v41 = vpop.permute.xlu1 %321  ;;  %1838 = vmatpush.bf16.msrb.mxu0 %v4286_v20 }
 0x1aa   : > { %v324_v42 = vrot.slane %v322_v41, 4 }
 0x1ac   : > { %v327_v43 = vsel %vm325_vm4, %v324_v42, %v322_v41  ;;  %v3622_v44 = vld [vmem:[#allocation3 + $0xc0] sm:$0xff]  ;;  %vm4807_vm4 = vcmask 834560  }
 0x1ad   : > { %334 = vst.msk [vmem:[#allocation2 + $0x8] sm:$0xff] %vm3926_vm5, %v327_v43  ;;  %v3606_v45 = vld [vmem:[#allocation3 + $0x40] sm:$0xff]  ;;  %1767 = vmatpush.bf16.msra.mxu3 %v3622_v44  ;;  %1839 = vmatpush.bf16.msrb.mxu0 %v4298_v23  ;;  %vm4811_vm5 = vcmask 687104   ;;  %v4328_v44 = vld [vmem:[%s4656_s3] sm:$0xff] }
 0x1ae   : > { %1739 = vmatpush.bf16.msra.mxu1 %v3606_v45 }
 0x1b0   : > { %1768 = vmatmul.bf16.vlgmr.msra.gmra.mxu3 %v4159_v53 }
 0x1b1   : > { %1740 = vmatmul.bf16.vlgmr.msra.gmra.mxu1 %v4175_v58  ;;  %1840 = vmatpush.bf16.msrb.mxu0 %v4307_v32 }
 0x1b4   : > { %v4129_v46 = vld [vmem:[#allocation2 + $0x8] sm:$0xff] }
 0x1b5   : > { %v336_v47 = vld [vmem:[#allocation2 + $0x8] sm:$0xf]  ;;  %1110 = vrot.lane.b32.xlu1 %v4129_v46, %s3800_s14  ;;  %855 = vrot.lane.b32.xlu0 %v4129_v46, %s3807_s21  ;;  %s4779_s14 = smov 85   ;;  %s4781_s21 = smov 118  }
 0x1b6   : > { %338 = vst [vmem:[#allocation3 + $0x100] sm:$0xf] %v336_v47  ;;  %838 = vrot.lane.b32.xlu2 %v4129_v46, %s3806_s20  ;;  %s4782_s20 = smov 87   ;;  %1841 = vmatpush.bf16.msrb.mxu0 %v4319_v35 }
 0x1ba   : > { %1842 = vmatpush.bf16.msrb.mxu0 %v4328_v44 }
 0x1bd   : > { %583 = vrot.lane.b32.xlu1 %v4129_v46, %s3801_s15  ;;  %566 = vrot.lane.b32.xlu0 %v4129_v46, %s3803_s17 }
 0x1be   : > { %1127 = vrot.lane.b32.xlu2 %v4129_v46, %s3799_s13  ;;  %s4774_s13 = smov 86  }
 0x1c5   : > { %1076 = vrot.lane.b32.xlu1 %v4129_v46, %s3805_s19  ;;  %821 = vrot.lane.b32.xlu0 %v4129_v46, %s3814_s30  ;;  %s4776_s19 = smov 102   ;;  %s4777_s30 = smov 65  }
 0x1c6   : > { %804 = vrot.lane.b32.xlu2 %v4129_v46, %s3812_s26  ;;  %s4778_s26 = smov 66  }
 0x1cd   : > { %549 = vrot.lane.b32.xlu1 %v4129_v46, %s3809_s23  ;;  %532 = vrot.lane.b32.xlu0 %v4129_v46, %s3810_s24 }
 0x1ce   : > { %1093 = vrot.lane.b32.xlu2 %v4129_v46, %s3808_s22  ;;  %s4780_s22 = smov 117  }
 0x1d5   : > { %1042 = vrot.lane.b32.xlu1 %v4129_v46, %s4774_s13  ;;  %787 = vrot.lane.b32.xlu0 %v4129_v46, %s4775_s12  ;;  %s4787_s12 = smov 119   ;;  %s4800_s13 = smov 107  }
 0x1d6   : > { %770 = vrot.lane.b32.xlu2 %v4129_v46, %s4776_s19  ;;  %s4788_s19 = smov 120  }
 0x1dd   : > { %1399 = vrot.lane.b32.xlu1 %v4129_v46, %s4777_s30  ;;  %1382 = vrot.lane.b32.xlu0 %v4129_v46, %s4778_s26  ;;  %s4789_s30 = smov 90   ;;  %s4790_s26 = smov 105  }
 0x1de   : > { %1059 = vrot.lane.b32.xlu2 %v4129_v46, %s4779_s14  ;;  %s4791_s14 = smov 106  }
 0x1e5   : > { %736 = vrot.lane.b32.xlu1 %v4129_v46, %s3829_s25  ;;  %515 = vrot.lane.b32.xlu0 %v4129_v46, %s4780_s22  ;;  %s4785_s25 = smov 67  }
 0x1e6   : > { %498 = vrot.lane.b32.xlu2 %v4129_v46, %s4781_s21 }
 0x1ed   : > { %1025 = vrot.lane.b32.xlu1 %v4129_v46, %s4782_s20  ;;  %1008 = vrot.lane.b32.xlu0 %v4129_v46, %s4783_s18  ;;  %s4792_s20 = smov 69   ;;  %s4793_s18 = smov 70  }
 0x1ee   : > { %753 = vrot.lane.b32.xlu2 %v4129_v46, %s4784_s10  ;;  %s4794_s10 = smov 89  }
 0x1f5   : > { %1498 = vperm.xlu1 %3770, %v1414_v59   ;;  %1365 = vrot.lane.b32.xlu0 %v4129_v46, %s4785_s25  ;;  %s4797_s25 = smov 122  }
 0x1f6   : > { %1348 = vrot.lane.b32.xlu2 %v4129_v46, %s4786_s9  ;;  %s4798_s9 = smov 91  }
 0x1fd   : > { %481 = vrot.lane.b32.xlu1 %v4129_v46, %s4787_s12  ;;  %464 = vrot.lane.b32.xlu0 %v4129_v46, %s4788_s19 }
 0x1fe   : > { %1503 = vperm.xlu2 %3771, %v1415_v60  }
 0x205   : > { %974 = vrot.lane.b32.xlu1 %v4129_v46, %s4789_s30  ;;  %719 = vrot.lane.b32.xlu0 %v4129_v46, %s4790_s26  ;;  %s4804_s26 = smov 109   ;;  %s4809_s30 = smov 93  }
 0x206   : > { %702 = vrot.lane.b32.xlu2 %v4129_v46, %s4791_s14  ;;  %s4805_s14 = smov 110  }
 0x20d   : > { %1331 = vrot.lane.b32.xlu1 %v4129_v46, %s4792_s20  ;;  %1314 = vrot.lane.b32.xlu0 %v4129_v46, %s4793_s18  ;;  %s4801_s18 = smov 124   ;;  %s4806_s20 = smov 123  }
 0x20e   : > { %991 = vrot.lane.b32.xlu2 %v4129_v46, %s4794_s10  ;;  %s4802_s10 = smov 71  }
 0x210   : > { %v839_v61 = vpop.permute.xlu2 %838 }
 0x211   : > { %v841_v62 = vrot.slane %v839_v61, 4 }
 0x213   : > { %v844_v63 = vsel %vm842_vm0, %v839_v61, %v841_v62  ;;  %vm4824_vm0 = vcmask 826368  }
 0x214   : > { %848 = vst [vmem:[#allocation3 + $0x178] sm:$0xf] %v844_v63 }
 0x215   : > { %668 = vrot.lane.b32.xlu1 %v4129_v46, %s4795_s16  ;;  %447 = vrot.lane.b32.xlu0 %v4129_v46, %s4796_s29  ;;  %s4803_s16 = smov 72  }
 0x216   : > { %430 = vrot.lane.b32.xlu2 %v4129_v46, %s4797_s25 }
 0x218   : > { %v1128_v0 = vpop.permute.xlu2 %1127 }
 0x219   : > { %v1130_v1 = vrot.slane %v1128_v0, 4 }
 0x21b   : > { %v1133_v2 = vsel %vm1131_vm9, %v1128_v0, %v1130_v1  ;;  %vm4817_vm9 = vcmask 941056  }
 0x21c   : > { %1137 = vst [vmem:[#allocation3 + $0x1bc] sm:$0xf] %v1133_v2 }
 0x21d   : > { %957 = vrot.lane.b32.xlu1 %v4129_v46, %s4798_s9  ;;  %940 = vrot.lane.b32.xlu0 %v4129_v46, %s4799_s11  ;;  %s4814_s11 = smov 125   ;;  %s4827_s9 = smov 76  }
 0x21e   : > { %685 = vrot.lane.b32.xlu2 %v4129_v46, %s4800_s13  ;;  %s4808_s13 = smov 74  }
 0x220   : > { %v805_v5 = vpop.permute.xlu2 %804 }
 0x221   : > { %v807_v6 = vrot.slane %v805_v5, 4 }
 0x223   : > { %v810_v8 = vsel %vm808_vm12, %v805_v5, %v807_v6  ;;  %vm4819_vm12 = vcmask 965632  }
 0x224   : > { %814 = vst [vmem:[#allocation3 + $0x170] sm:$0xf] %v810_v8 }
 0x225   : > { %396 = vrot.lane.b32.xlu1 %v4129_v46, %s4801_s18  ;;  %1297 = vrot.lane.b32.xlu0 %v4129_v46, %s4802_s10  ;;  %s4822_s10 = smov 112  }
 0x226   : > { %1280 = vrot.lane.b32.xlu2 %v4129_v46, %s4803_s16  ;;  %s4826_s16 = smov 75  }
 0x227   : > { %v1111_v10 = vpop.permute.xlu1 %1110  ;;  %v856_v11 = vpop.permute.xlu0 %855 }
 0x228   : > { %v1113_v13 = vrot.slane %v1111_v10, 4  ;;  %v858_v14 = vrot.slane %v856_v11, 4  ;;  %v1094_v15 = vpop.permute.xlu2 %1093 }
 0x229   : > { %v1096_v16 = vrot.slane %v1094_v15, 4 }
 0x22a   : > { %v1116_v17 = vsel %vm1114_vm10, %v1111_v10, %v1113_v13  ;;  %v861_v18 = vsel %vm859_vm8, %v856_v11, %v858_v14  ;;  %vm4813_vm8 = vcmask 695296   ;;  %vm4818_vm10 = vcmask 949248   ;;  %v4349_v10 = vpop.f32.mrf.mxu0 }
 0x22b   : > { %1120 = vst [vmem:[#allocation3 + $0x1b8] sm:$0xf] %v1116_v17  ;;  %v1099_v19 = vsel %vm1097_vm2, %v1094_v15, %v1096_v16  ;;  %vm4825_vm2 = vcmask 842752  }
 0x22c   : > { %865 = vst [vmem:[#allocation3 + $0x17c] sm:$0xf] %v861_v18 }
 0x22d   : > { %1103 = vst [vmem:[#allocation3 + $0x1b4] sm:$0xf] %v1099_v19  ;;  %651 = vrot.lane.b32.xlu1 %v4129_v46, %s4804_s26  ;;  %634 = vrot.lane.b32.xlu0 %v4129_v46, %s4805_s14  ;;  %s4810_s26 = smov 94   ;;  %s4821_s14 = smov 111  }
 0x22e   : > { %413 = vrot.lane.b32.xlu2 %v4129_v46, %s4806_s20  ;;  %v4357_v11 = vpop.f32.mrf.mxu1 }
 0x22f   : > { %v584_v21 = vpop.permute.xlu1 %583  ;;  %v567_v22 = vpop.permute.xlu0 %566 }
 0x230   : > { %v586_v24 = vrot.slane %v584_v21, 4  ;;  %v569_v25 = vrot.slane %v567_v22, 4  ;;  %v771_v26 = vpop.permute.xlu2 %770 }
 0x231   : > { %v773_v27 = vrot.slane %v771_v26, 4 }
 0x232   : > { %v589_v28 = vsel %vm587_vm6, %v584_v21, %v586_v24  ;;  %v572_v29 = vsel %vm570_vm13, %v567_v22, %v569_v25  ;;  %v3653_v7 = vld [vmem:[#allocation3 + $0x1b8] sm:$0xff]  ;;  %vm4812_vm6 = vcmask 809984   ;;  %vm4823_vm13 = vcmask 703488  }
 0x233   : > { %593 = vst [vmem:[#allocation3 + $0x13c] sm:$0xf] %v589_v28  ;;  %v776_v30 = vsel %vm4807_vm4, %v771_v26, %v773_v27  ;;  %v3645_v31 = vld [vmem:[#allocation3 + $0x178] sm:$0xff]  ;;  %2139 = vmatpush.bf16.msrb.mxu3 %v3653_v7  ;;  %vm4829_vm4 = vcmask 531456   ;;  %v1755_v26 = vpop.f32.mrf.mxu2  ;;  %v1769_v27 = vpop.f32.mrf.mxu3 }
 0x234   : > { %576 = vst [vmem:[#allocation3 + $0x138] sm:$0xf] %v572_v29  ;;  %2125 = vmatpush.bf16.msrb.mxu2 %v3645_v31  ;;  %v1729_v28 = vpop.f32.mrf.mxu0 }
 0x235   : > { %780 = vst [vmem:[#allocation3 + $0x168] sm:$0xf] %v776_v30  ;;  %1246 = vrot.lane.b32.xlu1 %v4129_v46, %s4808_s13  ;;  %923 = vrot.lane.b32.xlu0 %v4129_v46, %s4809_s30  ;;  %s4815_s13 = smov 126   ;;  %s4816_s30 = smov 73  }
 0x236   : > { %906 = vrot.lane.b32.xlu2 %v4129_v46, %s4810_s26  ;;  %s4820_s26 = smov 96  }
 0x237   : > { %v1077_v33 = vpop.permute.xlu1 %1076  ;;  %v822_v34 = vpop.permute.xlu0 %821 }
 0x238   : > { %v1079_v36 = vrot.slane %v1077_v33, 4  ;;  %v824_v37 = vrot.slane %v822_v34, 4  ;;  %v1060_v38 = vpop.permute.xlu2 %1059 }
 0x239   : > { %v1062_v39 = vrot.slane %v1060_v38, 4 }
 0x23a   : > { %v1082_v40 = vsel %vm4811_vm5, %v1077_v33, %v1079_v36  ;;  %v827_v41 = vsel %vm4812_vm6, %v822_v34, %v824_v37  ;;  %vm4830_vm5 = vcmask 539648   ;;  %vm4831_vm6 = vcmask 556032   ;;  %v1743_v36 = vpop.f32.mrf.mxu1 }
 0x23b   : > { %1086 = vst [vmem:[#allocation3 + $0x1b0] sm:$0xf] %v1082_v40  ;;  %v1065_v42 = vsel %vm4813_vm8, %v1060_v38, %v1062_v39  ;;  %v3637_v43 = vld [vmem:[#allocation3 + $0x138] sm:$0xff]  ;;  %vm4835_vm8 = vcmask 850944  }
 0x23c   : > { %831 = vst [vmem:[#allocation3 + $0x174] sm:$0xf] %v827_v41  ;;  %2111 = vmatpush.bf16.msrb.mxu1 %v3637_v43  ;;  %v1757_v41 = vpop.f32.mrf.mxu2 }
 0x23d   : > { %1069 = vst [vmem:[#allocation3 + $0x1ac] sm:$0xf] %v1065_v42  ;;  %379 = vrot.lane.b32.xlu1 %v4129_v46, %s4814_s11  ;;  %362 = vrot.lane.b32.xlu0 %v4129_v46, %s4815_s13 }
 0x23e   : > { %1263 = vrot.lane.b32.xlu2 %v4129_v46, %s4816_s30  ;;  %s4828_s30 = smov 95  }
 0x23f   : > { %v550_v45 = vpop.permute.xlu1 %549  ;;  %v533_v47 = vpop.permute.xlu0 %532 }
 0x240   : > { %v552_v4 = vrot.slane %v550_v45, 4  ;;  %v535_v48 = vrot.slane %v533_v47, 4  ;;  %v499_v50 = vpop.permute.xlu2 %498 }
 0x241   : > { %v501_v51 = vrot.slane %v499_v50, 4 }
 0x242   : > { %v555_v52 = vsel %vm4817_vm9, %v550_v45, %v552_v4  ;;  %v538_v54 = vsel %vm4818_vm10, %v533_v47, %v535_v48  ;;  %v3652_v56 = vld [vmem:[#allocation3 + $0x1b0] sm:$0xff]  ;;  %vm4836_vm9 = vcmask 957440   ;;  %vm4839_vm10 = vcmask 711680  }
 0x243   : > { %559 = vst [vmem:[#allocation3 + $0x134] sm:$0xf] %v555_v52  ;;  %v504_v57 = vsel %vm4819_vm12, %v499_v50, %v501_v51  ;;  %v3644_v59 = vld [vmem:[#allocation3 + $0x170] sm:$0xff]  ;;  %2140 = vmatpush.bf16.msrb.mxu3 %v3652_v56  ;;  %v1771_v51 = vpop.f32.mrf.mxu3  ;;  %vm4840_vm12 = vcmask 719872  }
 0x244   : > { %542 = vst [vmem:[#allocation3 + $0x130] sm:$0xf] %v538_v54  ;;  %2126 = vmatpush.bf16.msrb.mxu2 %v3644_v59 }
 0x245   : > { %508 = vst [vmem:[#allocation3 + $0x128] sm:$0xf] %v504_v57  ;;  %872 = vrot.lane.b32.xlu1 %v4129_v46, %s4820_s26  ;;  %617 = vrot.lane.b32.xlu0 %v4129_v46, %s4821_s14  ;;  %s4832_s26 = smov 77   ;;  %s4833_s14 = smov 78  }
 0x246   : > { %600 = vrot.lane.b32.xlu2 %v4129_v46, %s4822_s10  ;;  %s4834_s10 = smov 127  }
 0x247   : > { %v1043_v60 = vpop.permute.xlu1 %1042  ;;  %v788_v61 = vpop.permute.xlu0 %787 }
 0x248   : > { %v1045_v62 = vrot.slane %v1043_v60, 4  ;;  %v790_v63 = vrot.slane %v788_v61, 4  ;;  %v754_v0 = vpop.permute.xlu2 %753 }
 0x249   : > { %v756_v1 = vrot.slane %v754_v0, 4 }
 0x24a   : > { %v1048_v2 = vsel %vm4823_vm13, %v1043_v60, %v1045_v62  ;;  %v793_v5 = vsel %vm4824_vm0, %v788_v61, %v790_v63  ;;  %vm4841_vm13 = vcmask 867328   ;;  %vm4842_vm0 = vcmask 547840  }
 0x24b   : > { %1052 = vst [vmem:[#allocation3 + $0x1a8] sm:$0xf] %v1048_v2  ;;  %v759_v6 = vsel %vm4825_vm2, %v754_v0, %v756_v1  ;;  %v3636_v8 = vld [vmem:[#allocation3 + $0x130] sm:$0xff]  ;;  %vm4843_vm2 = vcmask 728064  }
 0x24c   : > { %797 = vst [vmem:[#allocation3 + $0x16c] sm:$0xf] %v793_v5  ;;  %2112 = vmatpush.bf16.msrb.mxu1 %v3636_v8 }
 0x24d   : > { %763 = vst [vmem:[#allocation3 + $0x164] sm:$0xf] %v759_v6  ;;  %1229 = vrot.lane.b32.xlu1 %v4129_v46, %s4826_s16  ;;  %1212 = vrot.lane.b32.xlu0 %v4129_v46, %s4827_s9  ;;  %s4837_s16 = smov 79   ;;  %s4838_s9 = smov 80  }
 0x24e   : > { %889 = vrot.lane.b32.xlu2 %v4129_v46, %s4828_s30 }
 0x24f   : > { %v1400_v13 = vpop.permute.xlu1 %1399  ;;  %v1383_v14 = vpop.permute.xlu0 %1382 }
 0x250   : > { %v1402_v15 = vrot.slane %v1400_v13, 4  ;;  %v1385_v16 = vrot.slane %v1383_v14, 4  ;;  %v1349_v17 = vpop.permute.xlu2 %1348 }
 0x251   : > { %v1351_v18 = vrot.slane %v1349_v17, 4 }
 0x252   : > { %v1405_v19 = vsel %vm4829_vm4, %v1400_v13, %v1402_v15  ;;  %v1388_v21 = vsel %vm4830_vm5, %v1383_v14, %v1385_v16  ;;  %v3651_v22 = vld [vmem:[#allocation3 + $0x1a8] sm:$0xff]  ;;  %vm4844_vm4 = vcmask 973824   ;;  %vm4845_vm5 = vcmask 982016  }
 0x253   : > { %1409 = vst [vmem:[#allocation3 + $0x1fc] sm:$0xf] %v1405_v19  ;;  %v1354_v24 = vsel %vm4831_vm6, %v1349_v17, %v1351_v18  ;;  %v3643_v25 = vld [vmem:[#allocation3 + $0x168] sm:$0xff]  ;;  %2141 = vmatpush.bf16.msrb.mxu3 %v3651_v22  ;;  %vm4846_vm6 = vcmask 998400  }
 0x254   : > { %1392 = vst [vmem:[#allocation3 + $0x1f8] sm:$0xf] %v1388_v21  ;;  %2127 = vmatpush.bf16.msrb.mxu2 %v3643_v25 }
 0x255   : > { %1358 = vst [vmem:[#allocation3 + $0x1f0] sm:$0xf] %v1354_v24  ;;  %1195 = vrot.lane.b32.xlu1 %v4129_v46, %s4832_s26  ;;  %1178 = vrot.lane.b32.xlu0 %v4129_v46, %s4833_s14 }
 0x256   : > { %345 = vrot.lane.b32.xlu2 %v4129_v46, %s4834_s10 }
 0x257   : > { %v737_v29 = vpop.permute.xlu1 %736  ;;  %v516_v7 = vpop.permute.xlu0 %515 }
 0x258   : > { %v739_v30 = vrot.slane %v737_v29, 4  ;;  %v518_v31 = vrot.slane %v516_v7, 4  ;;  %v4368_v33 = vpop.permute.xlu2 %1503 }
 0x259   : > { %v1730_v34 = vadd.f32 %v1729_v28, %v4368_v33 }
 0x25a   : > { %v742_v37 = vsel %vm4835_vm8, %v737_v29, %v739_v30  ;;  %v521_v38 = vsel %vm4836_vm9, %v516_v7, %v518_v31  ;;  %vm4847_vm9 = vcmask 736256  }
 0x25b   : > { %746 = vst [vmem:[#allocation3 + $0x160] sm:$0xf] %v742_v37  ;;  %v3661_v39 = vld [vmem:[#allocation3 + $0x1f8] sm:$0xff]  ;;  %v1744_v40 = vadd.f32 %v1743_v36, %v1730_v34 }
 0x25c   : > { %525 = vst [vmem:[#allocation3 + $0x12c] sm:$0xf] %v521_v38  ;;  %2153 = vmatpush.bf16.msra.mxu0 %v3661_v39 }
 0x25d   : > { %1161 = vrot.lane.b32.xlu0 %v4129_v46, %s4837_s16  ;;  %v1758_v48 = vadd.f32 %v1757_v41, %v1744_v40 }
 0x25e   : > { %1144 = vrot.lane.b32.xlu2 %v4129_v46, %s4838_s9 }
 0x25f   : > { %v1026_v42 = vpop.permute.xlu1 %1025  ;;  %v1009_v43 = vpop.permute.xlu0 %1008  ;;  %v1772_v46 = vadd.f32 %v1771_v51, %v1758_v48 }
 0x260   : > { %v1028_v45 = vrot.slane %v1026_v42, 4  ;;  %v1011_v47 = vrot.slane %v1009_v43, 4  ;;  %v703_v4 = vpop.permute.xlu2 %702 }
 0x261   : > { %v705_v50 = vrot.slane %v703_v4, 4  ;;  %v1777_v1 = vmin.f32 %v1772_v46, 0.0  ;;  %vm1775_vm8 = vcmp.gt.f32.partialorder %v1772_v46, 0.0 }
 0x262   : > { %v1031_v52 = vsel %vm4839_vm10, %v1026_v42, %v1028_v45  ;;  %v1014_v54 = vsel %vm4840_vm12, %v1009_v43, %v1011_v47  ;;  %v3642_v56 = vld [vmem:[#allocation3 + $0x160] sm:$0xff]  ;;  %vm4848_vm10 = vcmask 859136   ;;  %vm4849_vm12 = vcmask 875520  }
 0x263   : > { %1035 = vst [vmem:[#allocation3 + $0x1a4] sm:$0xf] %v1031_v52  ;;  %v708_v57 = vsel %vm4841_vm13, %v703_v4, %v705_v50  ;;  %v3635_v59 = vld [vmem:[#allocation3 + $0x128] sm:$0xff]  ;;  %2128 = vmatpush.bf16.msrb.mxu2 %v3642_v56  ;;  %v1780_v15 = vmul.f32 1.442695, %v1777_v1 }
 0x264   : > { %1018 = vst [vmem:[#allocation3 + $0x1a0] sm:$0xf] %v1014_v54  ;;  %2113 = vmatpush.bf16.msrb.mxu1 %v3635_v59 }
 0x265   : > { %712 = vst [vmem:[#allocation3 + $0x158] sm:$0xf] %v708_v57  ;;  %3773 = vpow2.f32 %v1780_v15 }
 0x267   : > { %v4380_v60 = vpop.permute.xlu1 %1498  ;;  %v1366_v61 = vpop.permute.xlu0 %1365 }
 0x268   : > { %v1728_v62 = vadd.f32 %v4349_v10, %v4380_v60  ;;  %v1368_v63 = vrot.slane %v1366_v61, 4  ;;  %v992_v0 = vpop.permute.xlu2 %991 }
 0x269   : > { %v994_v2 = vrot.slane %v992_v0, 4 }
 0x26a   : > { %v1742_v5 = vadd.f32 %v4357_v11, %v1728_v62  ;;  %v1371_v6 = vsel %vm4842_vm0, %v1366_v61, %v1368_v63  ;;  %vm4850_vm0 = vcmask 564224  }
 0x26b   : > { %1375 = vst [vmem:[#allocation3 + $0x1f4] sm:$0xf] %v1371_v6  ;;  %v997_v8 = vsel %vm4843_vm2, %v992_v0, %v994_v2  ;;  %v3650_v13 = vld [vmem:[#allocation3 + $0x1a0] sm:$0xff]  ;;  %vm4851_vm2 = vcmask 572416  }
 0x26c   : > { %v1756_v14 = vadd.f32 %v1755_v26, %v1742_v5  ;;  %1001 = vst [vmem:[#allocation3 + $0x19c] sm:$0xf] %v997_v8  ;;  %2142 = vmatpush.bf16.msrb.mxu3 %v3650_v13 }
 0x26e   : > { %v1770_v16 = vadd.f32 %v1769_v27, %v1756_v14  ;;  %v3774_v27 = vpop.eup %3773 }
 0x26f   : > { %v482_v17 = vpop.permute.xlu1 %481  ;;  %v465_v18 = vpop.permute.xlu0 %464  ;;  %v3281_v37 = vadd.f32 -1.0, %v3774_v27 }
 0x270   : > { %v484_v10 = vrot.slane %v482_v17, 4  ;;  %v467_v19 = vrot.slane %v465_v18, 4  ;;  %v431_v21 = vpop.permute.xlu2 %430  ;;  %v1776_v22 = vmin.f32 %v1770_v16, 0.0  ;;  %vm1774_vm13 = vcmp.gt.f32.partialorder %v1770_v16, 0.0 }
 0x271   : > { %v433_v24 = vrot.slane %v431_v21, 4  ;;  %v1785_v4 = vsel %vm1775_vm8, %v1772_v46, %v3281_v37  ;;  %vm4855_vm8 = vcmask 1006592  }
 0x272   : > { %v487_v11 = vsel %vm4844_vm4, %v482_v17, %v484_v10  ;;  %v470_v25 = vsel %vm4845_vm5, %v465_v18, %v467_v19  ;;  %v3660_v28 = vld [vmem:[#allocation3 + $0x1f0] sm:$0xff]  ;;  %v1778_v29 = vmul.f32 1.442695, %v1776_v22  ;;  %vm4852_vm4 = vcmask 588800  }
 0x273   : > { %491 = vst [vmem:[#allocation3 + $0x124] sm:$0xf] %v487_v11  ;;  %v436_v26 = vsel %vm4846_vm6, %v431_v21, %v433_v24  ;;  %2154 = vmatpush.bf16.msra.mxu0 %v3660_v28  ;;  %vm4853_vm5 = vcmask 883712   ;;  %vm4854_vm6 = vcmask 990208  }
 0x274   : > { %474 = vst [vmem:[#allocation3 + $0x120] sm:$0xf] %v470_v25  ;;  %3775 = vpow2.f32 %v1778_v29 }
 0x275   : > { %440 = vst [vmem:[#allocation3 + $0x118] sm:$0xf] %v436_v26 }
 0x277   : > { %v975_v7 = vpop.permute.xlu1 %974  ;;  %v720_v30 = vpop.permute.xlu0 %719 }
 0x278   : > { %v977_v31 = vrot.slane %v975_v7, 4  ;;  %v722_v34 = vrot.slane %v720_v30, 4  ;;  %v686_v36 = vpop.permute.xlu2 %685 }
 0x279   : > { %v688_v38 = vrot.slane %v686_v36, 4 }
 0x27a   : > { %v3776_v39 = vpop.eup %3775  ;;  %v980_v40 = vsel %vm4847_vm9, %v975_v7, %v977_v31  ;;  %v725_v41 = vsel %vm4848_vm10, %v720_v30, %v722_v34  ;;  %vm4856_vm9 = vcmask 744448   ;;  %vm4857_vm10 = vcmask 752640  }
 0x27b   : > { %984 = vst [vmem:[#allocation3 + $0x198] sm:$0xf] %v980_v40  ;;  %v691_v42 = vsel %vm4849_vm12, %v686_v36, %v688_v38  ;;  %v3634_v43 = vld [vmem:[#allocation3 + $0x120] sm:$0xff]  ;;  %v3280_v45 = vadd.f32 -1.0, %v3776_v39  ;;  %vm4858_vm12 = vcmask 1014784  }
 0x27c   : > { %729 = vst [vmem:[#allocation3 + $0x15c] sm:$0xf] %v725_v41  ;;  %2114 = vmatpush.bf16.msrb.mxu1 %v3634_v43 }
 0x27d   : > { %695 = vst [vmem:[#allocation3 + $0x154] sm:$0xf] %v691_v42  ;;  %v1784_v47 = vsel %vm1774_vm13, %v1770_v16, %v3280_v45  ;;  %vm4859_vm13 = vcmask 580608  }
 0x27e   : > { %v1786_v48 = vpack.c.bf16 %v1785_v4, %v1784_v47 }
 0x27f   : > { %v1332_v50 = vpop.permute.xlu1 %1331  ;;  %v1315_v51 = vpop.permute.xlu0 %1314 }
 0x280   : > { %v1334_v52 = vrot.slane %v1332_v50, 4  ;;  %v1317_v54 = vrot.slane %v1315_v51, 4  ;;  %v1281_v56 = vpop.permute.xlu2 %1280  ;;  %1843 = vmatmul.bf16.vlgmr.msrb.gmra.mxu0 %v1786_v48 }
 0x281   : > { %v1283_v57 = vrot.slane %v1281_v56, 4 }
 0x282   : > { %v1337_v59 = vsel %vm4850_vm0, %v1332_v50, %v1334_v52  ;;  %v1320_v61 = vsel %vm4851_vm2, %v1315_v51, %v1317_v54  ;;  %v3649_v62 = vld [vmem:[#allocation3 + $0x198] sm:$0xff]  ;;  %vm4860_vm0 = vcmask 596992   ;;  %vm4862_vm2 = vcmask 916480  }
 0x283   : > { %1341 = vst [vmem:[#allocation3 + $0x1ec] sm:$0xf] %v1337_v59  ;;  %v1286_v63 = vsel %vm4852_vm4, %v1281_v56, %v1283_v57  ;;  %v3641_v0 = vld [vmem:[#allocation3 + $0x158] sm:$0xff]  ;;  %2143 = vmatpush.bf16.msrb.mxu3 %v3649_v62  ;;  %vm4863_vm4 = vcmask 605184  }
 0x284   : > { %1324 = vst [vmem:[#allocation3 + $0x1e8] sm:$0xf] %v1320_v61  ;;  %2129 = vmatpush.bf16.msrb.mxu2 %v3641_v0 }
 0x285   : > { %1290 = vst [vmem:[#allocation3 + $0x1e0] sm:$0xf] %v1286_v63 }
 0x287   : > { %v669_v46 = vpop.permute.xlu1 %668  ;;  %v448_v1 = vpop.permute.xlu0 %447 }
 0x288   : > { %v671_v2 = vrot.slane %v669_v46, 4  ;;  %v450_v5 = vrot.slane %v448_v1, 4  ;;  %v414_v6 = vpop.permute.xlu2 %413 }
 0x289   : > { %v416_v8 = vrot.slane %v414_v6, 4 }
 0x28a   : > { %v674_v13 = vsel %vm4853_vm5, %v669_v46, %v671_v2  ;;  %v453_v14 = vsel %vm4854_vm6, %v448_v1, %v450_v5  ;;  %vm4864_vm5 = vcmask 760832   ;;  %vm4866_vm6 = vcmask 1031168  }
 0x28b   : > { %678 = vst [vmem:[#allocation3 + $0x150] sm:$0xf] %v674_v13  ;;  %v419_v15 = vsel %vm4855_vm8, %v414_v6, %v416_v8  ;;  %v3659_v16 = vld [vmem:[#allocation3 + $0x1e8] sm:$0xff]  ;;  %vm4867_vm8 = vcmask 1039360  }
 0x28c   : > { %457 = vst [vmem:[#allocation3 + $0x11c] sm:$0xf] %v453_v14  ;;  %2155 = vmatpush.bf16.msra.mxu0 %v3659_v16 }
 0x28d   : > { %423 = vst [vmem:[#allocation3 + $0x114] sm:$0xf] %v419_v15 }
 0x28f   : > { %v958_v17 = vpop.permute.xlu1 %957  ;;  %v941_v18 = vpop.permute.xlu0 %940 }
 0x290   : > { %v960_v10 = vrot.slane %v958_v17, 4  ;;  %v943_v19 = vrot.slane %v941_v18, 4  ;;  %v907_v21 = vpop.permute.xlu2 %906 }
 0x291   : > { %v909_v22 = vrot.slane %v907_v21, 4 }
 0x292   : > { %v963_v24 = vsel %vm4856_vm9, %v958_v17, %v960_v10  ;;  %v946_v11 = vsel %vm4857_vm10, %v941_v18, %v943_v19  ;;  %v3640_v25 = vld [vmem:[#allocation3 + $0x150] sm:$0xff]  ;;  %vm4869_vm9 = vcmask 613376   ;;  %vm4870_vm10 = vcmask 621568  }
 0x293   : > { %967 = vst [vmem:[#allocation3 + $0x194] sm:$0xf] %v963_v24  ;;  %v912_v28 = vsel %vm910_vm3, %v907_v21, %v909_v22  ;;  %v3633_v29 = vld [vmem:[#allocation3 + $0x118] sm:$0xff]  ;;  %2130 = vmatpush.bf16.msrb.mxu2 %v3640_v25  ;;  %vm4861_vm3 = vcmask 891904  }
 0x294   : > { %950 = vst [vmem:[#allocation3 + $0x190] sm:$0xf] %v946_v11  ;;  %2115 = vmatpush.bf16.msrb.mxu1 %v3633_v29 }
 0x295   : > { %916 = vst [vmem:[#allocation3 + $0x188] sm:$0xf] %v912_v28 }
 0x297   : > { %v397_v26 = vpop.permute.xlu1 %396  ;;  %v1298_v27 = vpop.permute.xlu0 %1297 }
 0x298   : > { %v399_v7 = vrot.slane %v397_v26, 4  ;;  %v1300_v30 = vrot.slane %v1298_v27, 4  ;;  %v1264_v31 = vpop.permute.xlu2 %1263 }
 0x299   : > { %v1266_v34 = vrot.slane %v1264_v31, 4 }
 0x29a   : > { %v402_v36 = vsel %vm4858_vm12, %v397_v26, %v399_v7  ;;  %v1303_v37 = vsel %vm4859_vm13, %v1298_v27, %v1300_v30  ;;  %vm1851_vm12 = vcmask 379904  }
 0x29b   : > { %406 = vst [vmem:[#allocation3 + $0x110] sm:$0xf] %v402_v36  ;;  %v1269_v38 = vsel %vm4860_vm0, %v1264_v31, %v1266_v34  ;;  %v3648_v39 = vld [vmem:[#allocation3 + $0x190] sm:$0xff] }
 0x29c   : > { %1307 = vst [vmem:[#allocation3 + $0x1e4] sm:$0xf] %v1303_v37  ;;  %2144 = vmatpush.bf16.msrb.mxu3 %v3648_v39 }
 0x29d   : > { %1273 = vst [vmem:[#allocation3 + $0x1dc] sm:$0xf] %v1269_v38 }
 0x29f   : > { %v652_v40 = vpop.permute.xlu1 %651  ;;  %v635_v41 = vpop.permute.xlu0 %634 }
 0x2a0   : > { %v654_v42 = vrot.slane %v652_v40, 4  ;;  %v637_v43 = vrot.slane %v635_v41, 4  ;;  %v601_v45 = vpop.permute.xlu2 %600 }
 0x2a1   : > { %v603_v47 = vrot.slane %v601_v45, 4 }
 0x2a2   : > { %v657_v4 = vsel %vm4861_vm3, %v652_v40, %v654_v42  ;;  %v640_v48 = vsel %vm638_vm1, %v635_v41, %v637_v43  ;;  %v3632_v50 = vld [vmem:[#allocation3 + $0x110] sm:$0xff]  ;;  %vm4865_vm1 = vcmask 1022976  }
 0x2a3   : > { %661 = vst [vmem:[#allocation3 + $0x14c] sm:$0xf] %v657_v4  ;;  %v606_v51 = vsel %vm4862_vm2, %v601_v45, %v603_v47  ;;  %v3658_v52 = vld [vmem:[#allocation3 + $0x1e0] sm:$0xff]  ;;  %2116 = vmatpush.bf16.msrb.mxu1 %v3632_v50  ;;  %vm2777_vm2 = vcmask 261120  }
 0x2a4   : > { %644 = vst [vmem:[#allocation3 + $0x148] sm:$0xf] %v640_v48  ;;  %2156 = vmatpush.bf16.msra.mxu0 %v3658_v52 }
 0x2a5   : > { %610 = vst [vmem:[#allocation3 + $0x140] sm:$0xf] %v606_v51 }
 0x2a7   : > { %v1247_v54 = vpop.permute.xlu1 %1246  ;;  %v924_v56 = vpop.permute.xlu0 %923 }
 0x2a8   : > { %v1249_v57 = vrot.slane %v1247_v54, 4  ;;  %v926_v59 = vrot.slane %v924_v56, 4  ;;  %v890_v61 = vpop.permute.xlu2 %889 }
 0x2a9   : > { %v892_v62 = vrot.slane %v890_v61, 4 }
 0x2aa   : > { %v1252_v63 = vsel %vm4863_vm4, %v1247_v54, %v1249_v57  ;;  %v929_v0 = vsel %vm4864_vm5, %v924_v56, %v926_v59 }
 0x2ab   : > { %1256 = vst [vmem:[#allocation3 + $0x1d8] sm:$0xf] %v1252_v63  ;;  %v895_v46 = vsel %vm893_vm15, %v890_v61, %v892_v62  ;;  %v3639_v1 = vld [vmem:[#allocation3 + $0x148] sm:$0xff]  ;;  %vm4868_vm15 = vcmask 785408  }
 0x2ac   : > { %933 = vst [vmem:[#allocation3 + $0x18c] sm:$0xf] %v929_v0  ;;  %2131 = vmatpush.bf16.msrb.mxu2 %v3639_v1 }
 0x2ad   : > { %899 = vst [vmem:[#allocation3 + $0x184] sm:$0xf] %v895_v46 }
 0x2af   : > { %v380_v2 = vpop.permute.xlu1 %379  ;;  %v363_v5 = vpop.permute.xlu0 %362 }
 0x2b0   : > { %v382_v6 = vrot.slane %v380_v2, 4  ;;  %v365_v8 = vrot.slane %v363_v5, 4  ;;  %v346_v13 = vpop.permute.xlu2 %345 }
 0x2b1   : > { %v348_v14 = vrot.slane %v346_v13, 4 }
 0x2b2   : > { %v385_v15 = vsel %vm4865_vm1, %v380_v2, %v382_v6  ;;  %v368_v16 = vsel %vm4866_vm6, %v363_v5, %v365_v8  ;;  %v3657_v17 = vld [vmem:[#allocation3 + $0x1d8] sm:$0xff]  ;;  %vm2815_vm6 = vcmask 130112  }
 0x2b3   : > { %389 = vst [vmem:[#allocation3 + $0x10c] sm:$0xf] %v385_v15  ;;  %v351_v18 = vsel %vm4867_vm8, %v346_v13, %v348_v14  ;;  %v3647_v10 = vld [vmem:[#allocation3 + $0x188] sm:$0xff]  ;;  %2157 = vmatpush.bf16.msra.mxu0 %v3657_v17  ;;  %vm2826_vm8 = vcmask 1041409  }
 0x2b4   : > { %372 = vst [vmem:[#allocation3 + $0x108] sm:$0xf] %v368_v16  ;;  %2145 = vmatpush.bf16.msrb.mxu3 %v3647_v10 }
 0x2b5   : > { %355 = vst [vmem:[#allocation3 + $0x104] sm:$0xf] %v351_v18 }
 0x2b7   : > { %v873_v19 = vpop.permute.xlu1 %872  ;;  %v618_v21 = vpop.permute.xlu0 %617 }
 0x2b8   : > { %v875_v22 = vrot.slane %v873_v19, 4  ;;  %v620_v24 = vrot.slane %v618_v21, 4  ;;  %v1145_v11 = vpop.permute.xlu2 %1144 }
 0x2b9   : > { %v1147_v25 = vrot.slane %v1145_v11, 4 }
 0x2ba   : > { %v878_v28 = vsel %vm4868_vm15, %v873_v19, %v875_v22  ;;  %v623_v29 = vsel %vm621_vm7, %v618_v21, %v620_v24  ;;  %vm4871_vm7 = vcmask 629760   ;;  %vm2828_vm15 = vcmask 1042434  }
 0x2bb   : > { %882 = vst [vmem:[#allocation3 + $0x180] sm:$0xf] %v878_v28  ;;  %v1150_v26 = vsel %vm1148_vm14, %v1145_v11, %v1147_v25  ;;  %v3631_v27 = vld [vmem:[#allocation3 + $0x108] sm:$0xff]  ;;  %vm4872_vm14 = vcmask 637952  }
 0x2bc   : > { %627 = vst [vmem:[#allocation3 + $0x144] sm:$0xf] %v623_v29  ;;  %2117 = vmatpush.bf16.msrb.mxu1 %v3631_v27  ;;  %v3630_v31 = vld [vmem:[#allocation3 + $0x100] sm:$0xff] }
 0x2bd   : > { %1154 = vst [vmem:[#allocation3 + $0x1c0] sm:$0xf] %v1150_v26 }
 0x2bf   : > { %v1230_v7 = vpop.permute.xlu1 %1229  ;;  %v1213_v30 = vpop.permute.xlu0 %1212 }
 0x2c0   : > { %v1232_v34 = vrot.slane %v1230_v7, 4  ;;  %v1215_v36 = vrot.slane %v1213_v30, 4  ;;  %2118 = vmatpush.bf16.msrb.mxu1 %v3630_v31 }
 0x2c2   : > { %v1235_v37 = vsel %vm4869_vm9, %v1230_v7, %v1232_v34  ;;  %v1218_v38 = vsel %vm4870_vm10, %v1213_v30, %v1215_v36  ;;  %v3646_v39 = vld [vmem:[#allocation3 + $0x180] sm:$0xff]  ;;  %vm2830_vm9 = vcmask 1043459   ;;  %vm2833_vm10 = vcmask 125952  }
 0x2c3   : > { %1239 = vst [vmem:[#allocation3 + $0x1d4] sm:$0xf] %v1235_v37  ;;  %v3638_v40 = vld [vmem:[#allocation3 + $0x140] sm:$0xff]  ;;  %2119 = vmatmul.bf16.vlgmr.msrb.gmra.mxu1 %v4166_v55  ;;  %2146 = vmatpush.bf16.msrb.mxu3 %v3646_v39 }
 0x2c4   : > { %2180 = vmatpush.bf16.msra.mxu1 %v4258_v3  ;;  %1222 = vst [vmem:[#allocation3 + $0x1d0] sm:$0xf] %v1218_v38  ;;  %2132 = vmatpush.bf16.msrb.mxu2 %v3638_v40 }
 0x2c6   : > { %2147 = vmatmul.bf16.vlgmr.msrb.gmra.mxu3 %v4143_v49 }
 0x2c7   : > { %v1196_v41 = vpop.permute.xlu1 %1195  ;;  %v1179_v42 = vpop.permute.xlu0 %1178  ;;  %2133 = vmatmul.bf16.vlgmr.msrb.gmra.mxu2 %v4175_v58 }
 0x2c8   : > { %2181 = vmatpush.bf16.msra.mxu1 %v4265_v9  ;;  %v1198_v43 = vrot.slane %v1196_v41, 4  ;;  %v1181_v45 = vrot.slane %v1179_v42, 4 }
 0x2ca   : > { %v1201_v47 = vsel %vm4871_vm7, %v1196_v41, %v1198_v43  ;;  %v1184_v3 = vsel %vm4872_vm14, %v1179_v42, %v1181_v45  ;;  %vm2838_vm7 = vcmask 3072   ;;  %vm3073_vm14 = vcmask 11272  }
 0x2cb   : > { %1205 = vst [vmem:[#allocation3 + $0x1cc] sm:$0xf] %v1201_v47  ;;  %v3656_v55 = vld [vmem:[#allocation3 + $0x1d0] sm:$0xff] }
 0x2cc   : > { %2182 = vmatpush.bf16.msra.mxu1 %v4277_v12  ;;  %1188 = vst [vmem:[#allocation3 + $0x1c8] sm:$0xf] %v1184_v3  ;;  %2158 = vmatpush.bf16.msra.mxu0 %v3656_v55 }
 0x2cf   : > { %v1162_v9 = vpop.permute.xlu0 %1161 }
 0x2d0   : > { %2183 = vmatpush.bf16.msra.mxu1 %v4286_v20  ;;  %v1164_v4 = vrot.slane %v1162_v9, 4 }
 0x2d2   : > { %v1167_v49 = vsel %vm1165_vm11, %v1162_v9, %v1164_v4  ;;  %vm2203_vm11 = vcmask 257024  }
 0x2d3   : > { %1171 = vst [vmem:[#allocation3 + $0x1c4] sm:$0xf] %v1167_v49  ;;  %v3655_v58 = vld [vmem:[#allocation3 + $0x1c8] sm:$0xff] }
 0x2d4   : > { %2184 = vmatpush.bf16.msra.mxu1 %v4298_v23  ;;  %2159 = vmatpush.bf16.msra.mxu0 %v3655_v58 }
 0x2d8   : > { %2185 = vmatpush.bf16.msra.mxu1 %v4307_v32 }
 0x2da   : > { %v3654_v48 = vld [vmem:[#allocation3 + $0x1c0] sm:$0xff] }
 0x2db   : > { %2160 = vmatpush.bf16.msra.mxu0 %v3654_v48 }
 0x2dc   : > { %2186 = vmatpush.bf16.msra.mxu1 %v4319_v35 }
 0x2de   : > { %2161 = vmatmul.bf16.vlgmr.msra.gmra.mxu0 %v4159_v53 }
 0x2e0   : > { %2187 = vmatpush.bf16.msra.mxu1 %v4328_v44 }
 0x2fd   : > { %v1844_v12 = vpop.f32.mrf.mxu0 }
 0x2fe   : > { %v1849_v20 = vpack.c.bf16 %v1844_v12, %v1844_v12 }
 0x300   : > { %1852 = vst.msk [vmem:[#allocation4] sm:$0xf] %vm1851_vm12, %v1849_v20 }
 0x305   : > { %v1846_v23 = vpop.f32.mrf.mxu0 }
 0x306   : > { %v1850_v50 = vpack.c.bf16 %v1846_v23, %v1846_v23 }
 0x307   : > { %v2199_v51 = vld [vmem:[#allocation4] sm:$0xf] }
 0x308   : > { %v2544_v52 = vld [vmem:[#allocation4] sm:$0xf]  ;;  %2204 = vst.msk [vmem:[#allocation5] sm:$0xf] %vm2203_vm11, %v2199_v51 }
 0x309   : > { %v2352_v54 = vld [vmem:[#allocation4] sm:$0xf]  ;;  %2552 = vrot.lane.b32.xlu0 %v2544_v52, %s3801_s15  ;;  %1853 = vst.msk [vmem:[#allocation4 + $0x4] sm:$0xf] %vm1851_vm12, %v1850_v50 }
 0x30a   : > { %2360 = vrot.lane.b32.xlu1 %v2352_v54, %s4796_s29  ;;  %v2328_v32 = vld [vmem:[#allocation4] sm:$0xf] }
 0x30b   : > { %2336 = vrot.lane.b32.xlu2 %v2328_v32, %s4797_s25  ;;  %v2520_v53 = vld [vmem:[#allocation4] sm:$0xf] }
 0x30c   : > { %v2304_v35 = vld [vmem:[#allocation4] sm:$0xf] }
 0x30d   : > { %v2496_v56 = vld [vmem:[#allocation4] sm:$0xf] }
 0x30e   : > { %v2472_v57 = vld [vmem:[#allocation4] sm:$0xf] }
 0x30f   : > { %v2280_v59 = vld [vmem:[#allocation4] sm:$0xf] }
 0x310   : > { %v2200_v44 = vld [vmem:[#allocation4 + $0x4] sm:$0xf] }
 0x311   : > { %2312 = vrot.lane.b32.xlu0 %v2304_v35, %s4806_s20  ;;  %2205 = vst.msk [vmem:[#allocation5 + $0x4] sm:$0xf] %vm2203_vm11, %v2200_v44  ;;  %v2353_v61 = vld [vmem:[#allocation4 + $0x4] sm:$0xf] }
 0x312   : > { %2528 = vrot.lane.b32.xlu1 %v2520_v53, %s3803_s17  ;;  %v2545_v62 = vld [vmem:[#allocation4 + $0x4] sm:$0xf] }
 0x313   : > { %2504 = vrot.lane.b32.xlu2 %v2496_v56, %s3809_s23  ;;  %v2329_v63 = vld [vmem:[#allocation4 + $0x4] sm:$0xf] }
 0x314   : > { %v2521_v0 = vld [vmem:[#allocation4 + $0x4] sm:$0xf] }
 0x315   : > { %v2497_v46 = vld [vmem:[#allocation4 + $0x4] sm:$0xf] }
 0x316   : > { %v2305_v1 = vld [vmem:[#allocation4 + $0x4] sm:$0xf] }
 0x317   : > { %v2281_v2 = vld [vmem:[#allocation4 + $0x4] sm:$0xf] }
 0x318   : > { %v2473_v5 = vld [vmem:[#allocation4 + $0x4] sm:$0xf] }
 0x319   : > { %2480 = vrot.lane.b32.xlu0 %v2472_v57, %s3810_s24 }
 0x31a   : > { %2288 = vrot.lane.b32.xlu1 %v2280_v59, %s4801_s18 }
 0x31b   : > { %2362 = vrot.lane.b32.xlu2 %v2353_v61, %s4796_s29 }
 0x321   : > { %2338 = vrot.lane.b32.xlu0 %v2329_v63, %s4797_s25 }
 0x322   : > { %2554 = vrot.lane.b32.xlu1 %v2545_v62, %s3801_s15 }
 0x323   : > { %2530 = vrot.lane.b32.xlu2 %v2521_v0, %s3803_s17 }
 0x329   : > { %2506 = vrot.lane.b32.xlu0 %v2497_v46, %s3809_s23 }
 0x32a   : > { %2314 = vrot.lane.b32.xlu1 %v2305_v1, %s4806_s20 }
 0x32b   : > { %2290 = vrot.lane.b32.xlu2 %v2281_v2, %s4801_s18 }
 0x332   : > { %2482 = vrot.lane.b32.xlu1 %v2473_v5, %s3810_s24 }
 0x340   : > { %v2120_v6 = vpop.f32.mrf.mxu1 }
 0x341   : > { %v2121_v13 = vadd.f32 %v2120_v6, %v4380_v60 }
 0x348   : > { %v2122_v16 = vpop.f32.mrf.mxu1 }
 0x349   : > { %v2148_v14 = vpop.f32.mrf.mxu3  ;;  %v2123_v19 = vadd.f32 %v2122_v16, %v4368_v33 }
 0x34a   : > { %v2134_v8 = vpop.f32.mrf.mxu2 }
 0x34b   : > { %v2135_v15 = vadd.f32 %v2134_v8, %v2121_v13 }
 0x34d   : > { %v2149_v17 = vadd.f32 %v2148_v14, %v2135_v15 }
 0x351   : > { %v2150_v11 = vpop.f32.mrf.mxu3 }
 0x352   : > { %v2136_v18 = vpop.f32.mrf.mxu2 }
 0x353   : > { %v2137_v22 = vadd.f32 %v2136_v18, %v2123_v19 }
 0x355   : > { %v2151_v25 = vadd.f32 %v2150_v11, %v2137_v22 }
 0x35b   : > { %v2162_v10 = vpop.f32.mrf.mxu0 }
 0x35c   : > { %v2163_v21 = vadd.f32 %v2162_v10, %v2149_v17 }
 0x35e   : > { %v2169_v24 = vmin.f32 %v2163_v21, 0.0  ;;  %vm2167_vm13 = vcmp.gt.f32.partialorder %v2163_v21, 0.0 }
 0x360   : > { %v2171_v28 = vmul.f32 1.442695, %v2169_v24 }
 0x362   : > { %3777 = vpow2.f32 %v2171_v28 }
 0x363   : > { %v2164_v26 = vpop.f32.mrf.mxu0 }
 0x364   : > { %v2165_v27 = vadd.f32 %v2164_v26, %v2151_v25 }
 0x365   : > { %v2337_v29 = vpop.permute.xlu2 %2336 }
 0x366   : > { %2348 = vst.msk [vmem:[#allocation5 + $0x30] sm:$0xf] %vm2203_vm11, %v2337_v29  ;;  %v2170_v60 = vmin.f32 %v2165_v27, 0.0  ;;  %vm2168_vm0 = vcmp.gt.f32.partialorder %v2165_v27, 0.0 }
 0x368   : > { %v2173_v7 = vmul.f32 1.442695, %v2170_v60  ;;  %v3778_v31 = vpop.eup %3777 }
 0x369   : > { %v3442_v33 = vadd.f32 -1.0, %v3778_v31 }
 0x36a   : > { %3779 = vpow2.f32 %v2173_v7 }
 0x36b   : > { %v2177_v38 = vsel %vm2167_vm13, %v2163_v21, %v3442_v33  ;;  %v2448_v33 = vld [vmem:[#allocation4] sm:$0xf] }
 0x36d   : > { %v2505_v30 = vpop.permute.xlu2 %2504 }
 0x36e   : > { %2516 = vst.msk [vmem:[#allocation5 + $0x68] sm:$0xf] %vm2203_vm11, %v2505_v30  ;;  %v2257_v30 = vld [vmem:[#allocation4 + $0x4] sm:$0xf] }
 0x370   : > { %v3780_v34 = vpop.eup %3779 }
 0x371   : > { %v3443_v36 = vadd.f32 -1.0, %v3780_v34 }
 0x373   : > { %v2178_v39 = vsel %vm2168_vm0, %v2165_v27, %v3443_v36  ;;  %v2256_v36 = vld [vmem:[#allocation4] sm:$0xf] }
 0x374   : > { %v2179_v40 = vpack.c.bf16 %v2178_v39, %v2177_v38  ;;  %v2233_v38 = vld [vmem:[#allocation4 + $0x4] sm:$0xf] }
 0x375   : > { %v2363_v37 = vpop.permute.xlu2 %2362  ;;  %v2449_v39 = vld [vmem:[#allocation4 + $0x4] sm:$0xf] }
 0x376   : > { %2373 = vst.msk [vmem:[#allocation5 + $0x3c] sm:$0xf] %vm2203_vm11, %v2363_v37  ;;  %2188 = vmatmul.bf16.vlgmr.msra.gmra.mxu1 %v2179_v40  ;;  %v2232_v37 = vld [vmem:[#allocation4] sm:$0xf] }
 0x37b   : > { %v2553_v41 = vpop.permute.xlu0 %2552 }
 0x37c   : > { %v2361_v42 = vpop.permute.xlu1 %2360  ;;  %2564 = vst.msk [vmem:[#allocation5 + $0x78] sm:$0xf] %vm2203_vm11, %v2553_v41  ;;  %v2425_v41 = vld [vmem:[#allocation4 + $0x4] sm:$0xf] }
 0x37d   : > { %v2531_v43 = vpop.permute.xlu2 %2530  ;;  %2372 = vst.msk [vmem:[#allocation5 + $0x38] sm:$0xf] %vm2203_vm11, %v2361_v42  ;;  %v2208_v42 = vld [vmem:[#allocation4] sm:$0xf] }
 0x37e   : > { %2541 = vst.msk [vmem:[#allocation5 + $0x74] sm:$0xf] %vm2203_vm11, %v2531_v43  ;;  %v2424_v43 = vld [vmem:[#allocation4] sm:$0xf] }
 0x383   : > { %v2313_v47 = vpop.permute.xlu0 %2312 }
 0x384   : > { %v2529_v45 = vpop.permute.xlu1 %2528  ;;  %v3671_v55 = vld [vmem:[#allocation5 + $0x38] sm:$0xff]  ;;  %2324 = vst.msk [vmem:[#allocation5 + $0x28] sm:$0xf] %vm2203_vm11, %v2313_v47  ;;  %v2400_v47 = vld [vmem:[#allocation4] sm:$0xf] }
 0x385   : > { %2540 = vst.msk [vmem:[#allocation5 + $0x70] sm:$0xf] %vm2203_vm11, %v2529_v45  ;;  %v2291_v3 = vpop.permute.xlu2 %2290  ;;  %2729 = vmatpush.bf16.msra.mxu2 %v3671_v55  ;;  %v2209_v55 = vld [vmem:[#allocation4 + $0x4] sm:$0xf] }
 0x386   : > { %2301 = vst.msk [vmem:[#allocation5 + $0x24] sm:$0xf] %vm2203_vm11, %v2291_v3  ;;  %v2401_v3 = vld [vmem:[#allocation4 + $0x4] sm:$0xf] }
 0x38b   : > { %v2481_v9 = vpop.permute.xlu0 %2480 }
 0x38c   : > { %v2289_v4 = vpop.permute.xlu1 %2288  ;;  %2492 = vst.msk [vmem:[#allocation5 + $0x60] sm:$0xf] %vm2203_vm11, %v2481_v9  ;;  %v3678_v50 = vld [vmem:[#allocation5 + $0x70] sm:$0xff] }
 0x38d   : > { %2300 = vst.msk [vmem:[#allocation5 + $0x20] sm:$0xf] %vm2203_vm11, %v2289_v4  ;;  %v2570_v4 = vld [vmem:[%s4658_s5] sm:$0xff] }
 0x393   : > { %v2339_v58 = vpop.permute.xlu0 %2338 }
 0x394   : > { %v2555_v49 = vpop.permute.xlu1 %2554  ;;  %2349 = vst.msk [vmem:[#allocation5 + $0x34] sm:$0xf] %vm2203_vm11, %v2339_v58  ;;  %v3668_v32 = vld [vmem:[#allocation5 + $0x20] sm:$0xff]  ;;  %v2376_v58 = vld [vmem:[#allocation4] sm:$0xf] }
 0x395   : > { %2565 = vst.msk [vmem:[#allocation5 + $0x7c] sm:$0xf] %vm2203_vm11, %v2555_v49  ;;  %v2377_v49 = vld [vmem:[#allocation4 + $0x4] sm:$0xf] }
 0x39b   : > { %v2507_v48 = vpop.permute.xlu0 %2506  ;;  %v3670_v23 = vld [vmem:[#allocation5 + $0x30] sm:$0xff] }
 0x39c   : > { %v2315_v12 = vpop.permute.xlu1 %2314  ;;  %v3679_v20 = vld [vmem:[#allocation5 + $0x78] sm:$0xff]  ;;  %2517 = vst.msk [vmem:[#allocation5 + $0x6c] sm:$0xf] %vm2203_vm11, %v2507_v48  ;;  %2730 = vmatpush.bf16.msra.mxu2 %v3670_v23  ;;  %v2571_v23 = vld [vmem:[%s4658_s5 + $0x8] sm:$0xff] }
 0x39d   : > { %2325 = vst.msk [vmem:[#allocation5 + $0x2c] sm:$0xf] %vm2203_vm11, %v2315_v12  ;;  %2743 = vmatpush.bf16.msra.mxu3 %v3679_v20 }
 0x3a1   : > { %2744 = vmatpush.bf16.msra.mxu3 %v3678_v50 }
 0x3a3   : > { %v3677_v52 = vld [vmem:[#allocation5 + $0x68] sm:$0xff] }
 0x3a4   : > { %v2483_v51 = vpop.permute.xlu1 %2482  ;;  %v3669_v54 = vld [vmem:[#allocation5 + $0x28] sm:$0xff] }
 0x3a5   : > { %2493 = vst.msk [vmem:[#allocation5 + $0x64] sm:$0xf] %vm2203_vm11, %v2483_v51  ;;  %2745 = vmatpush.bf16.msra.mxu3 %v3677_v52  ;;  %2731 = vmatpush.bf16.msra.mxu2 %v3669_v54 }
 0x3a9   : > { %2732 = vmatpush.bf16.msra.mxu2 %v3668_v32 }
 0x3ac   : > { %v3676_v53 = vld [vmem:[#allocation5 + $0x60] sm:$0xff] }
 0x3ad   : > { %2746 = vmatpush.bf16.msra.mxu3 %v3676_v53 }
 0x3f3   : > { %v2189_v35 = vpop.f32.mrf.mxu1 }
 0x3f4   : > { %v2194_v44 = vpack.c.bf16 %v2189_v35, %v2189_v35 }
 0x3f6   : > { %2197 = vst.msk [vmem:[#allocation4 + $0x8] sm:$0xf] %vm1851_vm12, %v2194_v44 }
 0x3fb   : > { %v2191_v56 = vpop.f32.mrf.mxu1 }
 0x3fc   : > { %v2195_v57 = vpack.c.bf16 %v2191_v56, %v2191_v56 }
 0x3fd   : > { %v2201_v59 = vld [vmem:[#allocation4 + $0x8] sm:$0xf] }
 0x3fe   : > { %v2546_v61 = vld [vmem:[#allocation4 + $0x8] sm:$0xf]  ;;  %2206 = vst.msk [vmem:[#allocation5 + $0x80] sm:$0xf] %vm2203_vm11, %v2201_v59 }
 0x3ff   : > { %v2354_v62 = vld [vmem:[#allocation4 + $0x8] sm:$0xf]  ;;  %2556 = vrot.lane.b32.xlu0 %v2546_v61, %s3801_s15  ;;  %2198 = vst.msk [vmem:[#allocation4 + $0xc] sm:$0xf] %vm1851_vm12, %v2195_v57 }
 0x400   : > { %2364 = vrot.lane.b32.xlu1 %v2354_v62, %s4796_s29  ;;  %v2330_v63 = vld [vmem:[#allocation4 + $0x8] sm:$0xf] }
 0x401   : > { %2340 = vrot.lane.b32.xlu2 %v2330_v63, %s4797_s25  ;;  %v2306_v0 = vld [vmem:[#allocation4 + $0x8] sm:$0xf] }
 0x402   : > { %v2522_v46 = vld [vmem:[#allocation4 + $0x8] sm:$0xf] }
 0x403   : > { %v2498_v2 = vld [vmem:[#allocation4 + $0x8] sm:$0xf] }
 0x404   : > { %v2474_v5 = vld [vmem:[#allocation4 + $0x8] sm:$0xf] }
 0x405   : > { %v2282_v6 = vld [vmem:[#allocation4 + $0x8] sm:$0xf] }
 0x406   : > { %v2202_v1 = vld [vmem:[#allocation4 + $0xc] sm:$0xf]  ;;  %v2258_v8 = vld [vmem:[#allocation4 + $0x8] sm:$0xf] }
 0x407   : > { %2316 = vrot.lane.b32.xlu0 %v2306_v0, %s4806_s20  ;;  %2207 = vst.msk [vmem:[#allocation5 + $0x84] sm:$0xf] %vm2203_vm11, %v2202_v1  ;;  %v2234_v13 = vld [vmem:[#allocation4 + $0x8] sm:$0xf]  ;;  %v2331_v10 = vld [vmem:[#allocation4 + $0xc] sm:$0xf] }
 0x408   : > { %2532 = vrot.lane.b32.xlu1 %v2522_v46, %s3803_s17  ;;  %v2450_v14 = vld [vmem:[#allocation4 + $0x8] sm:$0xf]  ;;  %v2547_v19 = vld [vmem:[#allocation4 + $0xc] sm:$0xf] }
 0x409   : > { %2508 = vrot.lane.b32.xlu2 %v2498_v2, %s3809_s23  ;;  %v2426_v15 = vld [vmem:[#allocation4 + $0x8] sm:$0xf]  ;;  %v2355_v21 = vld [vmem:[#allocation4 + $0xc] sm:$0xf] }
 0x40a   : > { %v2402_v16 = vld [vmem:[#allocation4 + $0x8] sm:$0xf]  ;;  %v2499_v22 = vld [vmem:[#allocation4 + $0xc] sm:$0xf] }
 0x40b   : > { %v2210_v17 = vld [vmem:[#allocation4 + $0x8] sm:$0xf]  ;;  %v2307_v24 = vld [vmem:[#allocation4 + $0xc] sm:$0xf] }
 0x40c   : > { %v2378_v18 = vld [vmem:[#allocation4 + $0x8] sm:$0xf]  ;;  %v2523_v11 = vld [vmem:[#allocation4 + $0xc] sm:$0xf] }
 0x40d   : > { %v2259_v25 = vld [vmem:[#allocation4 + $0xc] sm:$0xf] }
 0x40e   : > { %v2475_v28 = vld [vmem:[#allocation4 + $0xc] sm:$0xf] }
 0x40f   : > { %2484 = vrot.lane.b32.xlu0 %v2474_v5, %s3810_s24  ;;  %v2283_v29 = vld [vmem:[#allocation4 + $0xc] sm:$0xf] }
 0x410   : > { %2292 = vrot.lane.b32.xlu1 %v2282_v6, %s4801_s18  ;;  %v2427_v26 = vld [vmem:[#allocation4 + $0xc] sm:$0xf] }
 0x411   : > { %2268 = vrot.lane.b32.xlu2 %v2258_v8, %s4814_s11  ;;  %v2235_v27 = vld [vmem:[#allocation4 + $0xc] sm:$0xf] }
 0x412   : > { %v2451_v60 = vld [vmem:[#allocation4 + $0xc] sm:$0xf] }
 0x413   : > { %v2403_v7 = vld [vmem:[#allocation4 + $0xc] sm:$0xf] }
 0x414   : > { %v2211_v31 = vld [vmem:[#allocation4 + $0xc] sm:$0xf] }
 0x415   : > { %v2379_v34 = vld [vmem:[#allocation4 + $0xc] sm:$0xf] }
 0x417   : > { %2244 = vrot.lane.b32.xlu0 %v2234_v13, %s4815_s13 }
 0x418   : > { %2460 = vrot.lane.b32.xlu1 %v2450_v14, %s4780_s22 }
 0x419   : > { %2436 = vrot.lane.b32.xlu2 %v2426_v15, %s4781_s21 }
 0x41f   : > { %2412 = vrot.lane.b32.xlu0 %v2402_v16, %s4787_s12 }
 0x420   : > { %2220 = vrot.lane.b32.xlu1 %v2210_v17, %s4834_s10 }
 0x421   : > { %2388 = vrot.lane.b32.xlu2 %v2378_v18, %s4788_s19 }
 0x427   : > { %2342 = vrot.lane.b32.xlu0 %v2331_v10, %s4797_s25 }
 0x428   : > { %2558 = vrot.lane.b32.xlu1 %v2547_v19, %s3801_s15 }
 0x429   : > { %2366 = vrot.lane.b32.xlu2 %v2355_v21, %s4796_s29 }
 0x42f   : > { %2510 = vrot.lane.b32.xlu0 %v2499_v22, %s3809_s23 }
 0x430   : > { %2318 = vrot.lane.b32.xlu1 %v2307_v24, %s4806_s20  ;;  %s3135_s20 = sshll.u32 %s4876_s28, 2 }
 0x431   : > { %2534 = vrot.lane.b32.xlu2 %v2523_v11, %s3803_s17  ;;  %s305_s30 = scalar_lea.vmem %s4661_s8, %s3135_s20 }
 0x437   : > { %2270 = vrot.lane.b32.xlu0 %v2259_v25, %s4814_s11 }
 0x438   : > { %2486 = vrot.lane.b32.xlu1 %v2475_v28, %s3810_s24 }
 0x439   : > { %2294 = vrot.lane.b32.xlu2 %v2283_v29, %s4801_s18  ;;  %s3862_s18 = smov 1  }
 0x43f   : > { %2438 = vrot.lane.b32.xlu0 %v2427_v26, %s4781_s21 }
 0x440   : > { %2246 = vrot.lane.b32.xlu1 %v2235_v27, %s4815_s13 }
 0x441   : > { %2462 = vrot.lane.b32.xlu2 %v2451_v60, %s4780_s22 }
 0x447   : > { %2266 = vrot.lane.b32.xlu0 %v2257_v30, %s4814_s11  ;;  %v3446_v30 = vld [vmem:[%s4657_s4] sm:$0xf] }
 0x448   : > { %2414 = vrot.lane.b32.xlu1 %v2403_v7, %s4787_s12 }
 0x449   : > { %2222 = vrot.lane.b32.xlu2 %v2211_v31, %s4834_s10  ;;  %v3663_v31 = vld [vmem:[%s4657_s4 + $0x4] sm:$0xf0] }
 0x44f   : > { %2390 = vrot.lane.b32.xlu0 %v2379_v34, %s4788_s19 }
 0x450   : > { %2456 = vrot.lane.b32.xlu1 %v2448_v33, %s4780_s22 }
 0x451   : > { %2264 = vrot.lane.b32.xlu2 %v2256_v36, %s4814_s11 }
 0x457   : > { %2240 = vrot.lane.b32.xlu0 %v2232_v37, %s4815_s13 }
 0x458   : > { %2242 = vrot.lane.b32.xlu1 %v2233_v38, %s4815_s13  ;;  %v3680_v38 = vld [vmem:[#allocation5 + $0x80] sm:$0xff] }
 0x459   : > { %2458 = vrot.lane.b32.xlu2 %v2449_v39, %s4780_s22 }
 0x45b   : > { %v2341_v40 = vpop.permute.xlu2 %2340 }
 0x45c   : > { %2350 = vst.msk [vmem:[#allocation5 + $0xb0] sm:$0xf] %vm2203_vm11, %v2341_v40  ;;  %v3447_v40 = vor.u32 %v3663_v31, %v3446_v30  ;;  %v2578_v30 = vld [vmem:[%s4659_s6 + $0x30] sm:$0xff]  ;;  %v2577_v31 = vld [vmem:[%s4659_s6 + $0x28] sm:$0xff] }
 0x45f   : > { %2434 = vrot.lane.b32.xlu0 %v2425_v41, %s4781_s21  ;;  %v3662_v41 = vld [vmem:[%s4657_s4 + $0x4] sm:$0xf] }
 0x460   : > { %2216 = vrot.lane.b32.xlu1 %v2208_v42, %s4834_s10  ;;  %v3448_v42 = vld [vmem:[%s4657_s4 + $0x8] sm:$0xf0] }
 0x461   : > { %2432 = vrot.lane.b32.xlu2 %v2424_v43, %s4781_s21 }
 0x463   : > { %v2509_v45 = vpop.permute.xlu2 %2508 }
 0x464   : > { %2518 = vst.msk [vmem:[#allocation5 + $0xe8] sm:$0xf] %vm2203_vm11, %v2509_v45 }
 0x467   : > { %2408 = vrot.lane.b32.xlu0 %v2400_v47, %s4787_s12 }
 0x468   : > { %2410 = vrot.lane.b32.xlu1 %v2401_v3, %s4787_s12 }
 0x469   : > { %2218 = vrot.lane.b32.xlu2 %v2209_v55, %s4834_s10 }
 0x46b   : > { %v2269_v9 = vpop.permute.xlu2 %2268 }
 0x46c   : > { %2278 = vst.msk [vmem:[#allocation5 + $0x98] sm:$0xf] %vm2203_vm11, %v2269_v9  ;;  %v3451_v9 = vor.u32 %v3662_v41, %v3448_v42 }
 0x46f   : > { %2386 = vrot.lane.b32.xlu0 %v2377_v49, %s4788_s19 }
 0x470   : > { %2615 = vperm.xlu1 %3770, %v2570_v4  }
 0x471   : > { %2384 = vrot.lane.b32.xlu2 %v2376_v58, %s4788_s19  ;;  %v2557_v48 = vpop.permute.xlu0 %2556 }
 0x472   : > { %v2365_v12 = vpop.permute.xlu1 %2364  ;;  %2566 = vst.msk [vmem:[#allocation5 + $0xf8] sm:$0xf] %vm2203_vm11, %v2557_v48 }
 0x473   : > { %v2437_v20 = vpop.permute.xlu2 %2436  ;;  %2374 = vst.msk [vmem:[#allocation5 + $0xb8] sm:$0xf] %vm2203_vm11, %v2365_v12 }
 0x474   : > { %2446 = vst.msk [vmem:[#allocation5 + $0xd0] sm:$0xf] %vm2203_vm11, %v2437_v20 }
 0x479   : > { %2620 = vperm.xlu2 %3771, %v2571_v23   ;;  %v2317_v50 = vpop.permute.xlu0 %2316 }
 0x47a   : > { %v2533_v51 = vpop.permute.xlu1 %2532  ;;  %2326 = vst.msk [vmem:[#allocation5 + $0xa8] sm:$0xf] %vm2203_vm11, %v2317_v50  ;;  %v3664_v50 = vld [vmem:[#allocation5] sm:$0xff] }
 0x47b   : > { %v2389_v52 = vpop.permute.xlu2 %2388  ;;  %2542 = vst.msk [vmem:[#allocation5 + $0xf0] sm:$0xf] %vm2203_vm11, %v2533_v51 }
 0x47c   : > { %2398 = vst.msk [vmem:[#allocation5 + $0xc0] sm:$0xf] %vm2203_vm11, %v2389_v52 }
 0x481   : > { %v2485_v54 = vpop.permute.xlu0 %2484 }
 0x482   : > { %v2293_v32 = vpop.permute.xlu1 %2292  ;;  %2494 = vst.msk [vmem:[#allocation5 + $0xe0] sm:$0xf] %vm2203_vm11, %v2485_v54 }
 0x483   : > { %v2367_v53 = vpop.permute.xlu2 %2366  ;;  %2302 = vst.msk [vmem:[#allocation5 + $0xa0] sm:$0xf] %vm2203_vm11, %v2293_v32 }
 0x484   : > { %2375 = vst.msk [vmem:[#allocation5 + $0xbc] sm:$0xf] %vm2203_vm11, %v2367_v53 }
 0x489   : > { %v2245_v35 = vpop.permute.xlu0 %2244 }
 0x48a   : > { %v2461_v44 = vpop.permute.xlu1 %2460  ;;  %2254 = vst.msk [vmem:[#allocation5 + $0x90] sm:$0xf] %vm2203_vm11, %v2245_v35 }
 0x48b   : > { %v2535_v56 = vpop.permute.xlu2 %2534  ;;  %2470 = vst.msk [vmem:[#allocation5 + $0xd8] sm:$0xf] %vm2203_vm11, %v2461_v44  ;;  %v3687_v57 = vld [vmem:[#allocation5 + $0xb8] sm:$0xff] }
 0x48c   : > { %2543 = vst.msk [vmem:[#allocation5 + $0xf4] sm:$0xf] %vm2203_vm11, %v2535_v56  ;;  %2969 = vmatpush.bf16.msrb.mxu0 %v3687_v57 }
 0x491   : > { %v2413_v59 = vpop.permute.xlu0 %2412 }
 0x492   : > { %v2221_v61 = vpop.permute.xlu1 %2220  ;;  %2422 = vst.msk [vmem:[#allocation5 + $0xc8] sm:$0xf] %vm2203_vm11, %v2413_v59 }
 0x493   : > { %v2295_v62 = vpop.permute.xlu2 %2294  ;;  %2230 = vst.msk [vmem:[#allocation5 + $0x88] sm:$0xf] %vm2203_vm11, %v2221_v61  ;;  %v3694_v13 = vld [vmem:[#allocation5 + $0xf0] sm:$0xff] }
 0x494   : > { %2303 = vst.msk [vmem:[#allocation5 + $0xa4] sm:$0xf] %vm2203_vm11, %v2295_v62 }
 0x499   : > { %v2343_v63 = vpop.permute.xlu0 %2342 }
 0x49a   : > { %v2559_v0 = vpop.permute.xlu1 %2558  ;;  %2351 = vst.msk [vmem:[#allocation5 + $0xb4] sm:$0xf] %vm2203_vm11, %v2343_v63 }
 0x49b   : > { %v2463_v46 = vpop.permute.xlu2 %2462  ;;  %2567 = vst.msk [vmem:[#allocation5 + $0xfc] sm:$0xf] %vm2203_vm11, %v2559_v0  ;;  %v3684_v10 = vld [vmem:[#allocation5 + $0xa0] sm:$0xff] }
 0x49c   : > { %2471 = vst.msk [vmem:[#allocation5 + $0xdc] sm:$0xf] %vm2203_vm11, %v2463_v46 }
 0x4a1   : > { %v2511_v1 = vpop.permute.xlu0 %2510  ;;  %v3686_v5 = vld [vmem:[#allocation5 + $0xb0] sm:$0xff] }
 0x4a2   : > { %v2319_v2 = vpop.permute.xlu1 %2318  ;;  %2519 = vst.msk [vmem:[#allocation5 + $0xec] sm:$0xf] %vm2203_vm11, %v2511_v1  ;;  %v3695_v8 = vld [vmem:[#allocation5 + $0xf8] sm:$0xff]  ;;  %2970 = vmatpush.bf16.msrb.mxu0 %v3686_v5 }
 0x4a3   : > { %v2223_v6 = vpop.permute.xlu2 %2222  ;;  %2327 = vst.msk [vmem:[#allocation5 + $0xac] sm:$0xf] %vm2203_vm11, %v2319_v2  ;;  %2983 = vmatpush.bf16.msrb.mxu1 %v3695_v8  ;;  %v3691_v25 = vld [vmem:[#allocation5 + $0xd8] sm:$0xff]  ;;  %v2572_v8 = vld [vmem:[%s4659_s6] sm:$0xff] }
 0x4a4   : > { %2231 = vst.msk [vmem:[#allocation5 + $0x8c] sm:$0xf] %vm2203_vm11, %v2223_v6 }
 0x4a7   : > { %2984 = vmatpush.bf16.msrb.mxu1 %v3694_v13  ;;  %v2574_v13 = vld [vmem:[%s4659_s6 + $0x10] sm:$0xff] }
 0x4a9   : > { %v2271_v14 = vpop.permute.xlu0 %2270  ;;  %v3693_v16 = vld [vmem:[#allocation5 + $0xe8] sm:$0xff] }
 0x4aa   : > { %v2487_v15 = vpop.permute.xlu1 %2486  ;;  %2279 = vst.msk [vmem:[#allocation5 + $0x9c] sm:$0xf] %vm2203_vm11, %v2271_v14  ;;  %v3685_v18 = vld [vmem:[#allocation5 + $0xa8] sm:$0xff] }
 0x4ab   : > { %v2265_v17 = vpop.permute.xlu2 %2264  ;;  %2495 = vst.msk [vmem:[#allocation5 + $0xe4] sm:$0xf] %vm2203_vm11, %v2487_v15  ;;  %2971 = vmatpush.bf16.msrb.mxu0 %v3685_v18  ;;  %2985 = vmatpush.bf16.msrb.mxu1 %v3693_v16  ;;  %v3681_v7 = vld [vmem:[#allocation5 + $0x88] sm:$0xff] }
 0x4ac   : > { %2276 = vst.msk [vmem:[#allocation5 + $0x18] sm:$0xf] %vm2203_vm11, %v2265_v17 }
 0x4af   : > { %2972 = vmatpush.bf16.msrb.mxu0 %v3684_v10  ;;  %v4593_v10 = vld [vmem:[%s4659_s6 + $0x20] sm:$0xff] }
 0x4b1   : > { %v2439_v19 = vpop.permute.xlu0 %2438  ;;  %v3683_v22 = vld [vmem:[#allocation5 + $0x98] sm:$0xff] }
 0x4b2   : > { %v2247_v21 = vpop.permute.xlu1 %2246  ;;  %2447 = vst.msk [vmem:[#allocation5 + $0xd4] sm:$0xf] %vm2203_vm11, %v2439_v19  ;;  %v3692_v11 = vld [vmem:[#allocation5 + $0xe0] sm:$0xff] }
 0x4b3   : > { %v2459_v24 = vpop.permute.xlu2 %2458  ;;  %2255 = vst.msk [vmem:[#allocation5 + $0x94] sm:$0xf] %vm2203_vm11, %v2247_v21  ;;  %2973 = vmatpush.bf16.msrb.mxu0 %v3683_v22  ;;  %2986 = vmatpush.bf16.msrb.mxu1 %v3692_v11  ;;  %v2575_v22 = vld [vmem:[%s4659_s6 + $0x18] sm:$0xff] }
 0x4b4   : > { %2469 = vst.msk [vmem:[#allocation5 + $0x5c] sm:$0xf] %vm2203_vm11, %v2459_v24  ;;  %v2573_v24 = vld [vmem:[%s4659_s6 + $0x8] sm:$0xff] }
 0x4b7   : > { %2987 = vmatpush.bf16.msrb.mxu1 %v3691_v25 }
 0x4b9   : > { %v2267_v29 = vpop.permute.xlu0 %2266  ;;  %v3690_v26 = vld [vmem:[#allocation5 + $0xd0] sm:$0xff] }
 0x4ba   : > { %v2415_v28 = vpop.permute.xlu1 %2414  ;;  %v3682_v60 = vld [vmem:[#allocation5 + $0x90] sm:$0xff]  ;;  %2277 = vst.msk [vmem:[#allocation5 + $0x1c] sm:$0xf] %vm2203_vm11, %v2267_v29 }
 0x4bb   : > { %2423 = vst.msk [vmem:[#allocation5 + $0xcc] sm:$0xf] %vm2203_vm11, %v2415_v28  ;;  %v2433_v27 = vpop.permute.xlu2 %2432  ;;  %2974 = vmatpush.bf16.msrb.mxu0 %v3682_v60  ;;  %2988 = vmatpush.bf16.msrb.mxu1 %v3690_v26 }
 0x4bc   : > { %2444 = vst.msk [vmem:[#allocation5 + $0x50] sm:$0xf] %vm2203_vm11, %v2433_v27 }
 0x4bf   : > { %2975 = vmatpush.bf16.msrb.mxu0 %v3681_v7  ;;  %v2579_v7 = vld [vmem:[%s4659_s6 + $0x38] sm:$0xff] }
 0x4c1   : > { %v2391_v34 = vpop.permute.xlu0 %2390  ;;  %v3667_v39 = vld [vmem:[#allocation5 + $0x18] sm:$0xff] }
 0x4c2   : > { %v2457_v33 = vpop.permute.xlu1 %2456  ;;  %v3689_v36 = vld [vmem:[#allocation5 + $0xc8] sm:$0xff]  ;;  %2399 = vst.msk [vmem:[#allocation5 + $0xc4] sm:$0xf] %vm2203_vm11, %v2391_v34  ;;  %2733 = vmatpush.bf16.msra.mxu2 %v3667_v39 }
 0x4c3   : > { %2468 = vst.msk [vmem:[#allocation5 + $0x58] sm:$0xf] %vm2203_vm11, %v2457_v33  ;;  %v2219_v37 = vpop.permute.xlu2 %2218  ;;  %2989 = vmatpush.bf16.msrb.mxu1 %v3689_v36  ;;  %2976 = vmatpush.bf16.msrb.mxu0 %v3680_v38 }
 0x4c4   : > { %2229 = vst.msk [vmem:[#allocation5 + $0xc] sm:$0xf] %vm2203_vm11, %v2219_v37 }
 0x4c6   : > { %2977 = vmatmul.bf16.vlgmr.msrb.gmra.mxu0 %v3447_v40 }
 0x4c9   : > { %v2241_v43 = vpop.permute.xlu0 %2240  ;;  %v3688_v55 = vld [vmem:[#allocation5 + $0xc0] sm:$0xff] }
 0x4ca   : > { %v2243_v45 = vpop.permute.xlu1 %2242  ;;  %v3675_v47 = vld [vmem:[#allocation5 + $0x58] sm:$0xff]  ;;  %2252 = vst.msk [vmem:[#allocation5 + $0x10] sm:$0xf] %vm2203_vm11, %v2241_v43  ;;  %2990 = vmatpush.bf16.msrb.mxu1 %v3688_v55 }
 0x4cb   : > { %v2385_v3 = vpop.permute.xlu2 %2384  ;;  %2253 = vst.msk [vmem:[#allocation5 + $0x14] sm:$0xf] %vm2203_vm11, %v2243_v45  ;;  %2747 = vmatpush.bf16.msra.mxu3 %v3675_v47 }
 0x4cc   : > { %2396 = vst.msk [vmem:[#allocation5 + $0x40] sm:$0xf] %vm2203_vm11, %v2385_v3 }
 0x4cd   : > { %2991 = vmatmul.bf16.vlgmr.msrb.gmra.mxu1 %v3451_v9 }
 0x4d1   : > { %v2435_v4 = vpop.permute.xlu0 %2434 }
 0x4d2   : > { %v2217_v49 = vpop.permute.xlu1 %2216  ;;  %2445 = vst.msk [vmem:[#allocation5 + $0x54] sm:$0xf] %vm2203_vm11, %v2435_v4  ;;  %v3666_v58 = vld [vmem:[#allocation5 + $0x10] sm:$0xff] }
 0x4d3   : > { %2228 = vst.msk [vmem:[#allocation5 + $0x8] sm:$0xf] %vm2203_vm11, %v2217_v49  ;;  %2734 = vmatpush.bf16.msra.mxu2 %v3666_v58  ;;  %v2621_v62 = vpop.permute.xlu2 %2620 }
 0x4d9   : > { %v2409_v48 = vpop.permute.xlu0 %2408  ;;  %v3674_v20 = vld [vmem:[#allocation5 + $0x50] sm:$0xff] }
 0x4da   : > { %v2411_v12 = vpop.permute.xlu1 %2410  ;;  %2420 = vst.msk [vmem:[#allocation5 + $0x48] sm:$0xf] %vm2203_vm11, %v2409_v48  ;;  %v3665_v23 = vld [vmem:[#allocation5 + $0x8] sm:$0xff]  ;;  %2748 = vmatpush.bf16.msra.mxu3 %v3674_v20 }
 0x4db   : > { %2421 = vst.msk [vmem:[#allocation5 + $0x4c] sm:$0xf] %vm2203_vm11, %v2411_v12  ;;  %2735 = vmatpush.bf16.msra.mxu2 %v3665_v23 }
 0x4df   : > { %2736 = vmatpush.bf16.msra.mxu2 %v3664_v50 }
 0x4e1   : > { %v2387_v51 = vpop.permute.xlu0 %2386 }
 0x4e2   : > { %2397 = vst.msk [vmem:[#allocation5 + $0x44] sm:$0xf] %vm2203_vm11, %v2387_v51  ;;  %v3673_v52 = vld [vmem:[#allocation5 + $0x48] sm:$0xff]  ;;  %2737 = vmatmul.bf16.vlgmr.msra.gmra.mxu2 %v3447_v40  ;;  %v2616_v53 = vpop.permute.xlu1 %2615 }
 0x4e3   : > { %2749 = vmatpush.bf16.msra.mxu3 %v3673_v52 }
 0x4e9   : > { %v3672_v54 = vld [vmem:[#allocation5 + $0x40] sm:$0xff] }
 0x4ea   : > { %2750 = vmatpush.bf16.msra.mxu3 %v3672_v54 }
 0x4ed   : > { %2751 = vmatmul.bf16.vlgmr.msra.gmra.mxu3 %v3451_v9 }
 0x543   : > { %v2978_v32 = vpop.f32.mrf.mxu0 }
 0x544   : > { %v2979_v35 = vadd.f32 %v2978_v32, %v2616_v53 }
 0x54a   : > { %v2992_v44 = vpop.f32.mrf.mxu1 }
 0x54b   : > { %v2993_v56 = vadd.f32 %v2992_v44, %v2979_v35  ;;  %v2980_v59 = vpop.f32.mrf.mxu0 }
 0x54c   : > { %v2981_v63 = vadd.f32 %v2980_v59, %v2621_v62 }
 0x54d   : > { %v2999_v57 = vmin.f32 %v2993_v56, 0.0  ;;  %vm2997_vm3 = vcmp.gt.f32.partialorder %v2993_v56, 0.0 }
 0x54f   : > { %v3001_v61 = vmul.f32 1.442695, %v2999_v57 }
 0x551   : > { %3781 = vpow2.f32 %v3001_v61 }
 0x552   : > { %v2994_v0 = vpop.f32.mrf.mxu1 }
 0x553   : > { %v2995_v46 = vadd.f32 %v2994_v0, %v2981_v63 }
 0x555   : > { %v3000_v1 = vmin.f32 %v2995_v46, 0.0  ;;  %vm2998_vm4 = vcmp.gt.f32.partialorder %v2995_v46, 0.0 }
 0x557   : > { %v3782_v2 = vpop.eup %3781  ;;  %v3003_v5 = vmul.f32 1.442695, %v3000_v1 }
 0x558   : > { %v3582_v6 = vadd.f32 -1.0, %v3782_v2 }
 0x559   : > { %3783 = vpow2.f32 %v3003_v5 }
 0x55a   : > { %v3007_v14 = vsel %vm2997_vm3, %v2993_v56, %v3582_v6 }
 0x55b   : > { %v3009_v15 = vmul.f32 %v3007_v14, %v2572_v8  ;;  %v3011_v16 = vmul.f32 %v3007_v14, %v2574_v13  ;;  %v3013_v11 = vmul.f32 %v3007_v14, %v4593_v10  ;;  %v3015_v36 = vmul.f32 %v3007_v14, %v2578_v30 }
 0x55d   : > { %v3017_v17 = vsel %vm2777_vm2, %v3009_v15, 0.0  ;;  %v3023_v18 = vsel %vm2777_vm2, %v3011_v16, 0.0  ;;  %v3029_v26 = vsel %vm2777_vm2, %v3013_v11, 0.0  ;;  %v3035_v39 = vsel %vm2777_vm2, %v3015_v36, 0.0 }
 0x55e   : > { %3018 = vadd.xlane.f32.xlu0 %v3017_v17  ;;  %3024 = vadd.xlane.f32.xlu2 %v3023_v18 }
 0x55f   : > { %v3784_v19 = vpop.eup %3783 }
 0x560   : > { %v3583_v21 = vadd.f32 -1.0, %v3784_v19 }
 0x562   : > { %v3008_v25 = vsel %vm2998_vm4, %v2995_v46, %v3583_v21 }
 0x563   : > { %v3012_v28 = vmul.f32 %v3008_v25, %v2575_v22  ;;  %v3010_v29 = vmul.f32 %v3008_v25, %v2573_v24  ;;  %v3016_v34 = vmul.f32 %v3008_v25, %v2579_v7  ;;  %v3014_v37 = vmul.f32 %v3008_v25, %v2577_v31 }
 0x565   : > { %v3026_v27 = vsel %vm2777_vm2, %v3012_v28, 0.0  ;;  %v3020_v60 = vsel %vm2777_vm2, %v3010_v29, 0.0  ;;  %v2738_v33 = vpop.f32.mrf.mxu2  ;;  %v3038_v38 = vsel %vm2777_vm2, %v3016_v34, 0.0  ;;  %v3032_v41 = vsel %vm2777_vm2, %v3014_v37, 0.0 }
 0x566   : > { %3030 = vadd.xlane.f32.xlu0 %v3029_v26  ;;  %3027 = vadd.xlane.f32.xlu2 %v3026_v27  ;;  %v2739_v40 = vadd.f32 %v2738_v33, %v2616_v53 }
 0x567   : > { %3021 = vadd.xlane.f32.xlu1 %v3020_v60 }
 0x56d   : > { %v2740_v47 = vpop.f32.mrf.mxu2 }
 0x56e   : > { %3039 = vadd.xlane.f32.xlu0 %v3038_v38  ;;  %3036 = vadd.xlane.f32.xlu2 %v3035_v39  ;;  %v2741_v55 = vadd.f32 %v2740_v47, %v2621_v62 }
 0x56f   : > { %3033 = vadd.xlane.f32.xlu1 %v3032_v41 }
 0x570   : > { %v2752_v42 = vpop.f32.mrf.mxu3 }
 0x571   : > { %v2753_v43 = vadd.f32 %v2752_v42, %v2739_v40 }
 0x573   : > { %v2759_v45 = vmin.f32 %v2753_v43, 0.0  ;;  %vm2757_vm5 = vcmp.gt.f32.partialorder %v2753_v43, 0.0 }
 0x575   : > { %v2761_v3 = vmul.f32 1.442695, %v2759_v45 }
 0x577   : > { %3785 = vpow2.f32 %v2761_v3 }
 0x578   : > { %v2754_v9 = vpop.f32.mrf.mxu3 }
 0x579   : > { %v2755_v4 = vadd.f32 %v2754_v9, %v2741_v55 }
 0x57b   : > { %v2760_v49 = vmin.f32 %v2755_v4, 0.0  ;;  %vm2758_vm1 = vcmp.gt.f32.partialorder %v2755_v4, 0.0 }
 0x57d   : > { %v3786_v58 = vpop.eup %3785  ;;  %v2763_v48 = vmul.f32 1.442695, %v2760_v49 }
 0x57e   : > { %v3516_v12 = vadd.f32 -1.0, %v3786_v58 }
 0x57f   : > { %3787 = vpow2.f32 %v2763_v48 }
 0x580   : > { %v2767_v20 = vsel %vm2757_vm5, %v2753_v43, %v3516_v12 }
 0x581   : > { %v2771_v23 = vmul.f32 %v2767_v20, %v2574_v13  ;;  %v2769_v50 = vmul.f32 %v2767_v20, %v2572_v8  ;;  %v2773_v62 = vmul.f32 %v2767_v20, %v4593_v10  ;;  %v2775_v63 = vmul.f32 %v2767_v20, %v2578_v30 }
 0x582   : > { %v2810_v8 = vlaneseq }
 0x583   : > { %v2784_v51 = vsel %vm2777_vm2, %v2771_v23, 0.0  ;;  %v2778_v52 = vsel %vm2777_vm2, %v2769_v50, 0.0  ;;  %v2790_v0 = vsel %vm2777_vm2, %v2773_v62, 0.0  ;;  %v2796_v46 = vsel %vm2777_vm2, %v2775_v63, 0.0 }
 0x584   : > { %2785 = vadd.xlane.f32.xlu0 %v2784_v51  ;;  %2779 = vadd.xlane.f32.xlu1 %v2778_v52  ;;  %v2811_v13 = vand.u32 127, %v2810_v8 }
 0x585   : > { %v3788_v54 = vpop.eup %3787 }
 0x586   : > { %v3517_v32 = vadd.f32 -1.0, %v3788_v54  ;;  %v2813_v16 = vadd.s32 4294967288, %v2811_v13 }
 0x588   : > { %v2768_v53 = vsel %vm2758_vm1, %v2755_v4, %v3517_v32 }
 0x589   : > { %v2770_v35 = vmul.f32 %v2768_v53, %v2573_v24  ;;  %v2774_v44 = vmul.f32 %v2768_v53, %v2577_v31  ;;  %v2772_v56 = vmul.f32 %v2768_v53, %v2575_v22  ;;  %v2776_v1 = vmul.f32 %v2768_v53, %v2579_v7  ;;  %v2580_v53 = vld [vmem:[%s4660_s7] sm:$0xf] }
 0x58b   : > { %v2781_v57 = vsel %vm2777_vm2, %v2770_v35, 0.0  ;;  %v2793_v59 = vsel %vm2777_vm2, %v2774_v44, 0.0  ;;  %v2787_v61 = vsel %vm2777_vm2, %v2772_v56, 0.0  ;;  %v2799_v2 = vsel %vm2777_vm2, %v2776_v1, 0.0 }
 0x58c   : > { %2782 = vadd.xlane.f32.xlu2 %v2781_v57  ;;  %2794 = vadd.xlane.f32.xlu0 %v2793_v59 }
 0x58d   : > { %2788 = vadd.xlane.f32.xlu1 %v2787_v61 }
 0x594   : > { %2791 = vadd.xlane.f32.xlu2 %v2790_v0 }
 0x595   : > { %2797 = vadd.xlane.f32.xlu1 %v2796_v46 }
 0x59c   : > { %2800 = vadd.xlane.f32.xlu2 %v2799_v2 }
 0x5d1   : > { %v3019_v5 = vpop.xlane.xlu0 %3018  ;;  %v3025_v6 = vpop.xlane.xlu2 %3024 }
 0x5d2   : > { %v3049_v19 = vperm.slane %v3019_v5, %v2811_v13  ;;  %v3052_v21 = vperm.slane %v3025_v6, %v2811_v13 }
 0x5d9   : > { %v3031_v14 = vpop.xlane.xlu0 %3030  ;;  %v3028_v15 = vpop.xlane.xlu2 %3027 }
 0x5da   : > { %v3022_v17 = vpop.xlane.xlu1 %3021  ;;  %v3053_v10 = vperm.slane %v3028_v15, %v2813_v16  ;;  %v3055_v27 = vperm.slane %v3031_v14, %v2811_v13 }
 0x5db   : > { %v3050_v18 = vperm.slane %v3022_v17, %v2813_v16 }
 0x5dc   : > { %v3054_v25 = vsel %vm2815_vm6, %v3053_v10, %v3052_v21 }
 0x5dd   : > { %v3051_v11 = vsel %vm2815_vm6, %v3050_v18, %v3049_v19 }
 0x5de   : > { %v3061_v31 = vsel %vm2826_vm8, %v3054_v25, %v3051_v11 }
 0x5e1   : > { %v3040_v22 = vpop.xlane.xlu0 %3039  ;;  %v3037_v24 = vpop.xlane.xlu2 %3036 }
 0x5e2   : > { %v3059_v28 = vperm.slane %v3040_v22, %v2813_v16  ;;  %v3034_v29 = vpop.xlane.xlu1 %3033  ;;  %v3058_v26 = vperm.slane %v3037_v24, %v2811_v13 }
 0x5e3   : > { %v3056_v60 = vperm.slane %v3034_v29, %v2813_v16 }
 0x5e4   : > { %v3060_v7 = vsel %vm2815_vm6, %v3059_v28, %v3058_v26 }
 0x5e5   : > { %v3057_v30 = vsel %vm2815_vm6, %v3056_v60, %v3055_v27 }
 0x5e6   : > { %v3062_v33 = vsel %vm2828_vm15, %v3057_v30, %v3061_v31 }
 0x5e7   : > { %v3063_v34 = vsel %vm2830_vm9, %v3060_v7, %v3062_v33 }
 0x5e8   : > { %v3065_v36 = vsel %vm2833_vm10, %v3063_v34, 0.0 }
 0x5e9   : > { %3066 = vadd.xlane.f32.xlu0 %v3065_v36 }
 0x5f7   : > { %v2780_v37 = vpop.xlane.xlu1 %2779  ;;  %v2786_v39 = vpop.xlane.xlu0 %2785 }
 0x5f8   : > { %v2817_v3 = vperm.slane %v2786_v39, %v2811_v13  ;;  %v2812_v55 = vperm.slane %v2780_v37, %v2811_v13 }
 0x5ff   : > { %v2783_v38 = vpop.xlane.xlu2 %2782  ;;  %v2795_v43 = vpop.xlane.xlu0 %2794 }
 0x600   : > { %v2789_v40 = vpop.xlane.xlu1 %2788  ;;  %v2814_v42 = vperm.slane %v2783_v38, %v2813_v16  ;;  %v2821_v9 = vperm.slane %v2795_v43, %v2813_v16 }
 0x601   : > { %v2818_v45 = vperm.slane %v2789_v40, %v2813_v16 }
 0x602   : > { %v2816_v49 = vsel %vm2815_vm6, %v2814_v42, %v2812_v55 }
 0x603   : > { %v2819_v58 = vsel %vm2815_vm6, %v2818_v45, %v2817_v3 }
 0x604   : > { %v2827_v50 = vsel %vm2826_vm8, %v2819_v58, %v2816_v49 }
 0x607   : > { %v2792_v41 = vpop.xlane.xlu2 %2791 }
 0x608   : > { %v2820_v47 = vperm.slane %v2792_v41, %v2811_v13  ;;  %v2798_v4 = vpop.xlane.xlu1 %2797 }
 0x609   : > { %v2823_v20 = vperm.slane %v2798_v4, %v2811_v13 }
 0x60a   : > { %v2822_v48 = vsel %vm2815_vm6, %v2821_v9, %v2820_v47 }
 0x60b   : > { %v2829_v52 = vsel %vm2828_vm15, %v2822_v48, %v2827_v50 }
 0x60f   : > { %v2801_v12 = vpop.xlane.xlu2 %2800 }
 0x610   : > { %v2824_v23 = vperm.slane %v2801_v12, %v2813_v16 }
 0x612   : > { %v2825_v51 = vsel %vm2815_vm6, %v2824_v23, %v2823_v20 }
 0x613   : > { %v2831_v54 = vsel %vm2830_vm9, %v2825_v51, %v2829_v52 }
 0x614   : > { %v2834_v32 = vsel %vm2833_vm10, %v2831_v54, 0.0 }
 0x615   : > { %2835 = vadd.xlane.f32.xlu1 %v2834_v32 }
 0x65c   : > { %v3067_v35 = vpop.xlane.xlu0 %3066 }
 0x65d   : > { %v3068_v44 = vadd.f32 %v3067_v35, %v2580_v53 }
 0x65f   : > { %3070 = vrot.lane.b32.xlu2 %v3068_v44, %s3862_s18 }
 0x688   : > { %v2836_v56 = vpop.xlane.xlu1 %2835 }
 0x689   : > { %v2837_v57 = vadd.f32 %v2836_v56, %v2580_v53 }
 0x68b   : > { %2839 = vst.msk [vmem:[%s305_s30] sm:$0xf] %vm2838_vm7, %v2837_v57 }
 0x6b9   : > { %v3071_v59 = vpop.permute.xlu2 %3070 }
 0x6ba   : > { %3074 = vst.msk [vmem:[%s305_s30] sm:$0xf] %vm3073_vm14, %v3071_v59 }
 0x6bb PF: > { %s18_s27 = sadd.s32 1, %s3795_s27  }
 0x6bc   : > { %p15_p5 = scmp.ge.s32.totalorder %s18_s27, 4  }
 0x6be   :  { %17 = sbr.rel (!%p15_p5) target bundleno = 1 (0x1), region = 85 }

</bundles_post_ra>
